<compile_context>
chip_gen: v7x
topology: tpu7x:2x2x1
jax: 0.10.0
libtpu: 0.0.40
codegen_flags: <defaults>
</compile_context>

<pallas_src>
import numpy as np
import jax
import jax.numpy as jnp
from jax.experimental import pallas as pl
from jax.experimental.pallas import tpu as pltpu

# ---- model hyperparameters (from the PyTorch module) ----
D_MODEL = 9
IMG_SIZE = (32, 32)
N_CHANNELS = 1
PATCH_SIZE = (16, 16)
N_HEADS = 3
N_CLASSES = 10
N_LAYERS = 3
R_MLP = 4

HEAD_SIZE = D_MODEL // N_HEADS
N_PATCHES = (IMG_SIZE[0] // PATCH_SIZE[0]) * (IMG_SIZE[1] // PATCH_SIZE[1])
SEQ_LEN = N_PATCHES + 1
PATCH_DIM = N_CHANNELS * PATCH_SIZE[0] * PATCH_SIZE[1]
D_MLP = D_MODEL * R_MLP
LN_EPS = 1e-5

PACK_W = 128            # lane width of the packed parameter buffer
NEG_BIG = -1e30         # additive mask / logit padding value
SCALE = 1.0 / (HEAD_SIZE ** 0.5)


# ---------------- shared math helpers (kernel + reference) ----------------
def _erf(z):
    # Abramowitz & Stegun 7.1.26 polynomial approximation (max abs err ~1.5e-7).
    # TODO(synk): used instead of lax.erf so exact (erf-based) GELU is guaranteed to lower in Mosaic.
    a1, a2, a3, a4, a5 = (0.254829592, -0.284496736, 1.421413741,
                          -1.453152027, 1.061405429)
    p = 0.3275911
    s = jnp.where(z >= 0, 1.0, -1.0)
    az = jnp.abs(z)
    t = 1.0 / (1.0 + p * az)
    poly = ((((a5 * t + a4) * t + a3) * t + a2) * t + a1) * t
    return s * (1.0 - poly * jnp.exp(-az * az))


def _gelu(z):
    # PyTorch nn.GELU() default is the exact erf-based GELU.
    return 0.5 * z * (1.0 + _erf(z * 0.7071067811865475))


def _layer_norm(z, gamma, beta):
    mu = jnp.mean(z, axis=-1, keepdims=True)
    var = jnp.mean((z - mu) ** 2, axis=-1, keepdims=True)   # biased, like torch LayerNorm
    return (z - mu) * jax.lax.rsqrt(var + LN_EPS) * gamma + beta


def _softmax_exact(z):
    m = jnp.max(z, axis=-1, keepdims=True)
    e = jnp.exp(z - m)
    return e / jnp.sum(e, axis=-1, keepdims=True)


def _softmax_fast(z):
    # In-kernel softmax: divide goes to the (otherwise idle) EUP slot.
    m = jnp.max(z, axis=-1, keepdims=True)
    e = jnp.exp(z - m)
    return e * pl.reciprocal(jnp.sum(e, axis=-1, keepdims=True), approx=True)


# ---------------- packed parameter buffer layout ----------------
def _build_layout(batch):
    """Each logical tensor gets its own 8-row-aligned block in a (rows, 128) pack."""
    n_tok = batch * SEQ_LEN
    layout = {}
    row = [0]

    def add(name, nr, nc):
        layout[name] = (row[0], nr, nc)
        row[0] += -(-nr // 8) * 8          # round block up to 8 sublanes

    add("w_patch", PATCH_DIM, D_MODEL)
    add("x_add", n_tok, D_MODEL)           # cls / patch-bias / positional encoding, folded
    add("cls_sel", batch, n_tok)           # picks cls rows via a tiny matmul
    add("att_bias", n_tok, n_tok)          # block-diagonal mask (0 in-image, -1e30 across)
    for l in range(N_LAYERS):
        add(f"ln1g{l}", 1, D_MODEL); add(f"ln1b{l}", 1, D_MODEL)
        add(f"ln2g{l}", 1, D_MODEL); add(f"ln2b{l}", 1, D_MODEL)
        for hd in range(N_HEADS):
            add(f"wq{l}_{hd}", D_MODEL, HEAD_SIZE); add(f"bq{l}_{hd}", 1, HEAD_SIZE)
            add(f"wk{l}_{hd}", D_MODEL, HEAD_SIZE); add(f"bk{l}_{hd}", 1, HEAD_SIZE)
            add(f"wv{l}_{hd}", D_MODEL, HEAD_SIZE); add(f"bv{l}_{hd}", 1, HEAD_SIZE)
            add(f"wo{l}_{hd}", HEAD_SIZE, D_MODEL)
        add(f"bo{l}", 1, D_MODEL)
        add(f"w1_{l}", D_MODEL, D_MLP); add(f"b1_{l}", 1, D_MLP)
        add(f"w2_{l}", D_MLP, D_MODEL); add(f"b2_{l}", 1, D_MODEL)
    add("wc", D_MODEL, PACK_W)             # lane-padded classifier weight
    add("bc", 1, PACK_W)                   # lane-padded classifier bias (-1e30 pads)
    return layout, row[0]


def _pack_params(params, batch, layout, total_rows):
    buf = np.zeros((total_rows, PACK_W), np.float32)

    def put(name, arr):
        r0, nr, nc = layout[name]
        buf[r0:r0 + nr, :nc] = np.asarray(arr, np.float32).reshape(nr, nc)

    pos = np.asarray(params["pos"], np.float32)           # (SEQ, D)
    cls = np.asarray(params["cls"], np.float32)           # (1, D)
    b_patch = np.asarray(params["b_patch"], np.float32)   # (1, D)

    put("w_patch", params["w_patch"])
    # Row 0 of every image gets cls + pos[0]; patch row p gets b_patch + pos[p+1].
    x_add_one = np.concatenate([cls + pos[0:1], b_patch + pos[1:]], axis=0)
    put("x_add", np.tile(x_add_one, (batch, 1)))

    n_tok = batch * SEQ_LEN
    sel = np.zeros((batch, n_tok), np.float32)
    sel[np.arange(batch), np.arange(batch) * SEQ_LEN] = 1.0
    put("cls_sel", sel)

    bias = np.full((n_tok, n_tok), NEG_BIG, np.float32)
    for b in range(batch):
        bias[b * SEQ_LEN:(b + 1) * SEQ_LEN, b * SEQ_LEN:(b + 1) * SEQ_LEN] = 0.0
    put("att_bias", bias)

    ln = np.asarray(params["ln"], np.float32)
    wqkv = np.asarray(params["wqkv"], np.float32)
    bqkv = np.asarray(params["bqkv"], np.float32)
    wo = np.asarray(params["wo"], np.float32)
    for l in range(N_LAYERS):
        put(f"ln1g{l}", ln[l, 0]); put(f"ln1b{l}", ln[l, 1])
        put(f"ln2g{l}", ln[l, 2]); put(f"ln2b{l}", ln[l, 3])
        for hd in range(N_HEADS):
            lo, hi = hd * HEAD_SIZE, (hd + 1) * HEAD_SIZE
            # Fold the 1/sqrt(head_size) score scale into Q weights + bias
            # (mathematically identical, saves one (N,N) VPU multiply per head).
            put(f"wq{l}_{hd}", wqkv[l, 0][:, lo:hi] * SCALE)
            put(f"bq{l}_{hd}", bqkv[l, 0][:, lo:hi] * SCALE)
            put(f"wk{l}_{hd}", wqkv[l, 1][:, lo:hi]); put(f"bk{l}_{hd}", bqkv[l, 1][:, lo:hi])
            put(f"wv{l}_{hd}", wqkv[l, 2][:, lo:hi]); put(f"bv{l}_{hd}", bqkv[l, 2][:, lo:hi])
            put(f"wo{l}_{hd}", wo[l][lo:hi, :])
        put(f"bo{l}", params["bo"][l])
        put(f"w1_{l}", params["w1"][l]); put(f"b1_{l}", params["b1"][l])
        put(f"w2_{l}", params["w2"][l]); put(f"b2_{l}", params["b2"][l])

    wc_pad = np.zeros((D_MODEL, PACK_W), np.float32)
    wc_pad[:, :N_CLASSES] = np.asarray(params["wc"], np.float32)
    put("wc", wc_pad)
    bc_pad = np.full((1, PACK_W), NEG_BIG, np.float32)
    bc_pad[:, :N_CLASSES] = np.asarray(params["bc"], np.float32)
    put("bc", bc_pad)

    return jnp.asarray(buf)


# ---------------- Pallas kernel: whole ViT forward, whole batch, one step ----------------
def _make_kernel(layout):
    def g(pack_ref, name):
        r0, nr, nc = layout[name]
        return pack_ref[r0:r0 + nr, 0:nc]       # static, 8-row-aligned slice

    def kernel(tok_ref, pack_ref, out_ref):
        f32 = jnp.float32
        p = lambda name: g(pack_ref, name)

        att_bias = p("att_bias")                 # (B*SEQ, B*SEQ), block-diagonal

        # Patch embedding + cls token + positional encoding: one matmul + one add.
        x = jnp.dot(tok_ref[...], p("w_patch"), preferred_element_type=f32) + p("x_add")

        for l in range(N_LAYERS):
            # ---- multi-head attention on ln1(x); head outputs summed (no concat) ----
            h = _layer_norm(x, p(f"ln1g{l}"), p(f"ln1b{l}"))
            acc = p(f"bo{l}")                    # (1, D) broadcasts over tokens
            for hd in range(N_HEADS):
                q = jnp.dot(h, p(f"wq{l}_{hd}"), preferred_element_type=f32) + p(f"bq{l}_{hd}")
                k = jnp.dot(h, p(f"wk{l}_{hd}"), preferred_element_type=f32) + p(f"bk{l}_{hd}")
                v = jnp.dot(h, p(f"wv{l}_{hd}"), preferred_element_type=f32) + p(f"bv{l}_{hd}")
                s = jax.lax.dot_general(q, k, (((1,), (1,)), ((), ())),
                                        preferred_element_type=f32)      # Q @ K^T (pre-scaled)
                att = _softmax_fast(s + att_bias)
                ho = jnp.dot(att, v, preferred_element_type=f32)          # (N, HS)
                acc = acc + jnp.dot(ho, p(f"wo{l}_{hd}"), preferred_element_type=f32)
            x = x + acc

            # ---- MLP on ln2(x); NOTE: the reference module MULTIPLIES (not residual add) ----
            h2 = _layer_norm(x, p(f"ln2g{l}"), p(f"ln2b{l}"))
            m = _gelu(jnp.dot(h2, p(f"w1_{l}"), preferred_element_type=f32) + p(f"b1_{l}"))
            m = jnp.dot(m, p(f"w2_{l}"), preferred_element_type=f32) + p(f"b2_{l}")
            x = x * m

        # Classifier head on the cls tokens; lane-dense (B, 128) store, padding
        # logits sit at -1e30 so softmax normalizes over the real 10 only.
        x_cls = jnp.dot(p("cls_sel"), x, preferred_element_type=f32)      # (B, D)
        logits = jnp.dot(x_cls, p("wc"), preferred_element_type=f32) + p("bc")
        out_ref[...] = _softmax_fast(logits)

    return kernel


def _extract_patches(images):
    B, C, H, W = images.shape
    ph, pw = PATCH_SIZE
    gh, gw = H // ph, W // pw
    x = images.reshape(B, C, gh, ph, gw, pw)
    x = x.transpose(0, 2, 4, 1, 3, 5)                  # (B, gh, gw, C, ph, pw)
    return x.reshape(B, gh * gw, C * ph * pw)


def _build_tokens(images):
    """(B*SEQ, PATCH_DIM) row stack; cls rows are zero (their value comes from x_add)."""
    B = images.shape[0]
    patches = _extract_patches(images).astype(jnp.float32)       # (B, P, PD)
    cls_rows = jnp.zeros((B, 1, PATCH_DIM), jnp.float32)
    tok = jnp.concatenate([cls_rows, patches], axis=1)           # (B, SEQ, PD)
    return tok.reshape(B * SEQ_LEN, PATCH_DIM)


def vit_forward(images, params):
    B = images.shape[0]
    n_tok = B * SEQ_LEN
    assert n_tok <= PACK_W, "single-block batching assumes B*SEQ_LEN <= 128"

    tokens = _build_tokens(images)
    layout, total_rows = _build_layout(B)
    pack = _pack_params(params, B, layout, total_rows)

    out = pl.pallas_call(
        _make_kernel(layout),
        out_shape=jax.ShapeDtypeStruct((B, PACK_W), jnp.float32),
        grid_spec=pltpu.PrefetchScalarGridSpec(
            num_scalar_prefetch=0,
            grid=(1,),                                            # single step: no per-batch loop
            in_specs=[pl.BlockSpec((n_tok, PATCH_DIM), lambda i: (0, 0)),
                      pl.BlockSpec((total_rows, PACK_W), lambda i: (0, 0))],
            out_specs=pl.BlockSpec((B, PACK_W), lambda i: (0, 0)),
        ),
        compiler_params=pltpu.CompilerParams(dimension_semantics=("arbitrary",)),
    )(tokens, pack)
    return out[:, :N_CLASSES]


# ---------------- pure-JAX reference (mirrors the PyTorch forward) ----------------
def vit_reference(images, params):
    patches = _extract_patches(images).astype(jnp.float32)
    B = patches.shape[0]
    pe = patches @ params["w_patch"] + params["b_patch"]
    cls = jnp.broadcast_to(params["cls"][None], (B, 1, D_MODEL))
    x = jnp.concatenate([cls, pe], axis=1) + params["pos"][None]
    for l in range(N_LAYERS):
        ln = params["ln"]
        h = _layer_norm(x, ln[l, 0], ln[l, 1])
        q = h @ params["wqkv"][l, 0] + params["bqkv"][l, 0]
        k = h @ params["wqkv"][l, 1] + params["bqkv"][l, 1]
        v = h @ params["wqkv"][l, 2] + params["bqkv"][l, 2]
        outs = []
        for hd in range(N_HEADS):
            lo, hi = hd * HEAD_SIZE, (hd + 1) * HEAD_SIZE
            qh, kh, vh = q[..., lo:hi], k[..., lo:hi], v[..., lo:hi]
            att = jnp.einsum("bqd,bkd->bqk", qh, kh) / (HEAD_SIZE ** 0.5)
            att = _softmax_exact(att)
            outs.append(att @ vh)
        mha = jnp.concatenate(outs, axis=-1) @ params["wo"][l] + params["bo"][l]
        x = x + mha
        h2 = _layer_norm(x, ln[l, 2], ln[l, 3])
        m = _gelu(h2 @ params["w1"][l] + params["b1"][l]) @ params["w2"][l] + params["b2"][l]
        x = x * m
    logits = x[:, 0] @ params["wc"] + params["bc"]
    return _softmax_exact(logits)


# ---------------- deterministic synthetic parameters ----------------
def init_params(key):
    keys = jax.random.split(key, 16)

    def nrm(k, shape, scale=0.1):
        return (scale * jax.random.normal(k, shape)).astype(jnp.float32)

    # positional encoding, exactly the PyTorch loop formula
    pos_np = np.zeros((SEQ_LEN, D_MODEL), dtype=np.float32)
    for pos in range(SEQ_LEN):
        for i in range(D_MODEL):
            if i % 2 == 0:
                pos_np[pos, i] = np.sin(pos / 10000 ** (i / D_MODEL))
            else:
                pos_np[pos, i] = np.cos(pos / 10000 ** ((i - 1) / D_MODEL))

    ln = jnp.concatenate([
        jnp.ones((N_LAYERS, 1, D_MODEL), jnp.float32),    # ln1 gamma
        jnp.zeros((N_LAYERS, 1, D_MODEL), jnp.float32),   # ln1 beta
        jnp.ones((N_LAYERS, 1, D_MODEL), jnp.float32),    # ln2 gamma
        jnp.zeros((N_LAYERS, 1, D_MODEL), jnp.float32),   # ln2 beta
    ], axis=1)

    return {
        "w_patch": nrm(keys[0], (PATCH_DIM, D_MODEL)),
        "b_patch": nrm(keys[1], (1, D_MODEL), 0.02),
        "cls":     nrm(keys[2], (1, D_MODEL)),
        "pos":     jnp.asarray(pos_np),
        "ln":      ln,
        # Q/K/V weights, columns grouped per head: [:, h*HS:(h+1)*HS] is head h.
        "wqkv":    nrm(keys[3], (N_LAYERS, 3, D_MODEL, D_MODEL)),
        "bqkv":    nrm(keys[4], (N_LAYERS, 3, 1, D_MODEL), 0.02),
        "wo":      nrm(keys[5], (N_LAYERS, D_MODEL, D_MODEL)),
        "bo":      nrm(keys[6], (N_LAYERS, 1, D_MODEL), 0.02),
        "w1":      nrm(keys[7], (N_LAYERS, D_MODEL, D_MLP)),
        "b1":      nrm(keys[8], (N_LAYERS, 1, D_MLP), 0.02),
        "w2":      nrm(keys[9], (N_LAYERS, D_MLP, D_MODEL)),
        "b2":      nrm(keys[10], (N_LAYERS, 1, D_MODEL), 0.02),
        "wc":      nrm(keys[11], (D_MODEL, N_CLASSES)),
        "bc":      nrm(keys[12], (1, N_CLASSES), 0.02),
    }


if __name__ == "__main__":
    key = jax.random.PRNGKey(0)
    pkey, xkey = jax.random.split(key)
    params = init_params(pkey)
    images = jax.random.normal(
        xkey, (2, N_CHANNELS, IMG_SIZE[0], IMG_SIZE[1]), dtype=jnp.float32)

    out = jax.block_until_ready(vit_forward(images, params))
    ref = jax.block_until_ready(vit_reference(images, params))

    assert out.shape == (2, N_CLASSES), out.shape
    max_err = float(jnp.max(jnp.abs(out - ref)))
    assert max_err < 1e-2, f"kernel vs reference mismatch: {max_err}"
    print("KERNEL_OK")
</pallas_src>

<mosaic_0001>
module attributes {stable_mosaic.version = 11 : i64} {
  func.func @kernel(%arg0: i32, %arg1: memref<10x256xf32, #tpu.memory_space<vmem>>, %arg2: memref<1376x128xf32, #tpu.memory_space<vmem>>, %arg3: memref<2x128xf32, #tpu.memory_space<vmem>>) attributes {dimension_semantics = [#tpu.dimension_semantics<arbitrary>], iteration_bounds = array<i64: 1>, scalar_prefetch = 0 : i64, scratch_operands = 0 : i64, tpu.core_type = #tpu.core_type<tc>, window_params = [{pipeline_mode = #tpu.pipeline_mode<synchronous>, transform_indices = @transform_0, window_bounds = array<i64: 10, 256>}, {pipeline_mode = #tpu.pipeline_mode<synchronous>, transform_indices = @transform_1, window_bounds = array<i64: 1376, 128>}, {pipeline_mode = #tpu.pipeline_mode<synchronous>, transform_indices = @transform_2, window_bounds = array<i64: 2, 128>}]} {
    %c280 = arith.constant 280 : index
    %c0 = arith.constant 0 : index
    %0 = vector.load %arg2[%c280, %c0] : memref<1376x128xf32, #tpu.memory_space<vmem>>, vector<10x10xf32>
    %c0_0 = arith.constant 0 : index
    %c0_1 = arith.constant 0 : index
    %1 = vector.load %arg1[%c0_0, %c0_1] : memref<10x256xf32, #tpu.memory_space<vmem>>, vector<10x256xf32>
    %c0_2 = arith.constant 0 : index
    %c0_3 = arith.constant 0 : index
    %2 = vector.load %arg2[%c0_2, %c0_3] : memref<1376x128xf32, #tpu.memory_space<vmem>>, vector<256x9xf32>
    %cst = arith.constant dense<0.000000e+00> : vector<10x9xf32>
    %3 = tpu.matmul %1, %2, %cst {dimension_numbers = #tpu.dot_dimension_numbers<[1], [0], [0], [1], [0, 0, 1, 1], [], []>} : vector<10x256xf32>, vector<256x9xf32>, vector<10x9xf32> -> vector<10x9xf32>
    %c256 = arith.constant 256 : index
    %c0_4 = arith.constant 0 : index
    %4 = vector.load %arg2[%c256, %c0_4] : memref<1376x128xf32, #tpu.memory_space<vmem>>, vector<10x9xf32>
    %5 = arith.addf %3, %4 : vector<10x9xf32>
    %c296 = arith.constant 296 : index
    %c0_5 = arith.constant 0 : index
    %6 = vector.load %arg2[%c296, %c0_5] : memref<1376x128xf32, #tpu.memory_space<vmem>>, vector<1x9xf32>
    %c304 = arith.constant 304 : index
    %c0_6 = arith.constant 0 : index
    %7 = vector.load %arg2[%c304, %c0_6] : memref<1376x128xf32, #tpu.memory_space<vmem>>, vector<1x9xf32>
    %cst_7 = arith.constant dense<0.000000e+00> : vector<10xf32>
    %8 = vector.multi_reduction <add>, %5, %cst_7 [1] : vector<10x9xf32> to vector<10xf32>
    %9 = vector.shape_cast %8 : vector<10xf32> to vector<10x1xf32>
    %cst_8 = arith.constant 9.000000e+00 : f32
    %10 = vector.broadcast %cst_8 : f32 to vector<10x1xf32>
    %11 = arith.divf %9, %10 : vector<10x1xf32>
    %12 = vector.broadcast %11 : vector<10x1xf32> to vector<10x9xf32>
    %13 = arith.subf %5, %12 : vector<10x9xf32>
    %14 = arith.mulf %13, %13 : vector<10x9xf32>
    %cst_9 = arith.constant dense<0.000000e+00> : vector<10xf32>
    %15 = vector.multi_reduction <add>, %14, %cst_9 [1] : vector<10x9xf32> to vector<10xf32>
    %16 = vector.shape_cast %15 : vector<10xf32> to vector<10x1xf32>
    %cst_10 = arith.constant 9.000000e+00 : f32
    %17 = vector.broadcast %cst_10 : f32 to vector<10x1xf32>
    %18 = arith.divf %16, %17 : vector<10x1xf32>
    %19 = vector.broadcast %11 : vector<10x1xf32> to vector<10x9xf32>
    %20 = arith.subf %5, %19 : vector<10x9xf32>
    %cst_11 = arith.constant 9.99999974E-6 : f32
    %21 = vector.broadcast %cst_11 : f32 to vector<10x1xf32>
    %22 = arith.addf %18, %21 : vector<10x1xf32>
    %23 = math.rsqrt %22 : vector<10x1xf32>
    %24 = vector.broadcast %23 : vector<10x1xf32> to vector<10x9xf32>
    %25 = arith.mulf %20, %24 : vector<10x9xf32>
    %26 = vector.broadcast %6 : vector<1x9xf32> to vector<10x9xf32>
    %27 = arith.mulf %25, %26 : vector<10x9xf32>
    %28 = vector.broadcast %7 : vector<1x9xf32> to vector<10x9xf32>
    %29 = arith.addf %27, %28 : vector<10x9xf32>
    %c568 = arith.constant 568 : index
    %c0_12 = arith.constant 0 : index
    %30 = vector.load %arg2[%c568, %c0_12] : memref<1376x128xf32, #tpu.memory_space<vmem>>, vector<1x9xf32>
    %c328 = arith.constant 328 : index
    %c0_13 = arith.constant 0 : index
    %31 = vector.load %arg2[%c328, %c0_13] : memref<1376x128xf32, #tpu.memory_space<vmem>>, vector<9x3xf32>
    %cst_14 = arith.constant dense<0.000000e+00> : vector<10x3xf32>
    %32 = tpu.matmul %29, %31, %cst_14 {dimension_numbers = #tpu.dot_dimension_numbers<[1], [0], [0], [1], [0, 0, 1, 1], [], []>} : vector<10x9xf32>, vector<9x3xf32>, vector<10x3xf32> -> vector<10x3xf32>
    %c344 = arith.constant 344 : index
    %c0_15 = arith.constant 0 : index
    %33 = vector.load %arg2[%c344, %c0_15] : memref<1376x128xf32, #tpu.memory_space<vmem>>, vector<1x3xf32>
    %34 = vector.broadcast %33 : vector<1x3xf32> to vector<10x3xf32>
    %35 = arith.addf %32, %34 : vector<10x3xf32>
    %c352 = arith.constant 352 : index
    %c0_16 = arith.constant 0 : index
    %36 = vector.load %arg2[%c352, %c0_16] : memref<1376x128xf32, #tpu.memory_space<vmem>>, vector<9x3xf32>
    %cst_17 = arith.constant dense<0.000000e+00> : vector<10x3xf32>
    %37 = tpu.matmul %29, %36, %cst_17 {dimension_numbers = #tpu.dot_dimension_numbers<[1], [0], [0], [1], [0, 0, 1, 1], [], []>} : vector<10x9xf32>, vector<9x3xf32>, vector<10x3xf32> -> vector<10x3xf32>
    %c368 = arith.constant 368 : index
    %c0_18 = arith.constant 0 : index
    %38 = vector.load %arg2[%c368, %c0_18] : memref<1376x128xf32, #tpu.memory_space<vmem>>, vector<1x3xf32>
    %39 = vector.broadcast %38 : vector<1x3xf32> to vector<10x3xf32>
    %40 = arith.addf %37, %39 : vector<10x3xf32>
    %c376 = arith.constant 376 : index
    %c0_19 = arith.constant 0 : index
    %41 = vector.load %arg2[%c376, %c0_19] : memref<1376x128xf32, #tpu.memory_space<vmem>>, vector<9x3xf32>
    %cst_20 = arith.constant dense<0.000000e+00> : vector<10x3xf32>
    %42 = tpu.matmul %29, %41, %cst_20 {dimension_numbers = #tpu.dot_dimension_numbers<[1], [0], [0], [1], [0, 0, 1, 1], [], []>} : vector<10x9xf32>, vector<9x3xf32>, vector<10x3xf32> -> vector<10x3xf32>
    %c392 = arith.constant 392 : index
    %c0_21 = arith.constant 0 : index
    %43 = vector.load %arg2[%c392, %c0_21] : memref<1376x128xf32, #tpu.memory_space<vmem>>, vector<1x3xf32>
    %44 = vector.broadcast %43 : vector<1x3xf32> to vector<10x3xf32>
    %45 = arith.addf %42, %44 : vector<10x3xf32>
    %cst_22 = arith.constant dense<0.000000e+00> : vector<10x10xf32>
    %46 = tpu.matmul %35, %40, %cst_22 {dimension_numbers = #tpu.dot_dimension_numbers<[1], [1], [0], [0], [0, 0, 1, 0], [], []>} : vector<10x3xf32>, vector<10x3xf32>, vector<10x10xf32> -> vector<10x10xf32>
    %47 = arith.addf %46, %0 : vector<10x10xf32>
    %cst_23 = arith.constant dense<0xFF800000> : vector<10xf32>
    %48 = vector.multi_reduction <maximumf>, %47, %cst_23 [1] : vector<10x10xf32> to vector<10xf32>
    %49 = vector.shape_cast %48 : vector<10xf32> to vector<10x1xf32>
    %50 = vector.broadcast %49 : vector<10x1xf32> to vector<10x10xf32>
    %51 = arith.subf %47, %50 : vector<10x10xf32>
    %52 = math.exp %51 : vector<10x10xf32>
    %cst_24 = arith.constant dense<0.000000e+00> : vector<10xf32>
    %53 = vector.multi_reduction <add>, %52, %cst_24 [1] : vector<10x10xf32> to vector<10xf32>
    %54 = vector.shape_cast %53 : vector<10xf32> to vector<10x1xf32>
    %55 = tpu.reciprocal %54 {approx = true} : vector<10x1xf32> -> vector<10x1xf32>
    %56 = vector.broadcast %55 : vector<10x1xf32> to vector<10x10xf32>
    %57 = arith.mulf %52, %56 : vector<10x10xf32>
    %cst_25 = arith.constant dense<0.000000e+00> : vector<10x3xf32>
    %58 = tpu.matmul %57, %45, %cst_25 {dimension_numbers = #tpu.dot_dimension_numbers<[1], [0], [0], [1], [0, 0, 1, 1], [], []>} : vector<10x10xf32>, vector<10x3xf32>, vector<10x3xf32> -> vector<10x3xf32>
    %c400 = arith.constant 400 : index
    %c0_26 = arith.constant 0 : index
    %59 = vector.load %arg2[%c400, %c0_26] : memref<1376x128xf32, #tpu.memory_space<vmem>>, vector<3x9xf32>
    %cst_27 = arith.constant dense<0.000000e+00> : vector<10x9xf32>
    %60 = tpu.matmul %58, %59, %cst_27 {dimension_numbers = #tpu.dot_dimension_numbers<[1], [0], [0], [1], [0, 0, 1, 1], [], []>} : vector<10x3xf32>, vector<3x9xf32>, vector<10x9xf32> -> vector<10x9xf32>
    %61 = vector.broadcast %30 : vector<1x9xf32> to vector<10x9xf32>
    %62 = arith.addf %61, %60 : vector<10x9xf32>
    %c408 = arith.constant 408 : index
    %c0_28 = arith.constant 0 : index
    %63 = vector.load %arg2[%c408, %c0_28] : memref<1376x128xf32, #tpu.memory_space<vmem>>, vector<9x3xf32>
    %cst_29 = arith.constant dense<0.000000e+00> : vector<10x3xf32>
    %64 = tpu.matmul %29, %63, %cst_29 {dimension_numbers = #tpu.dot_dimension_numbers<[1], [0], [0], [1], [0, 0, 1, 1], [], []>} : vector<10x9xf32>, vector<9x3xf32>, vector<10x3xf32> -> vector<10x3xf32>
    %c424 = arith.constant 424 : index
    %c0_30 = arith.constant 0 : index
    %65 = vector.load %arg2[%c424, %c0_30] : memref<1376x128xf32, #tpu.memory_space<vmem>>, vector<1x3xf32>
    %66 = vector.broadcast %65 : vector<1x3xf32> to vector<10x3xf32>
    %67 = arith.addf %64, %66 : vector<10x3xf32>
    %c432 = arith.constant 432 : index
    %c0_31 = arith.constant 0 : index
    %68 = vector.load %arg2[%c432, %c0_31] : memref<1376x128xf32, #tpu.memory_space<vmem>>, vector<9x3xf32>
    %cst_32 = arith.constant dense<0.000000e+00> : vector<10x3xf32>
    %69 = tpu.matmul %29, %68, %cst_32 {dimension_numbers = #tpu.dot_dimension_numbers<[1], [0], [0], [1], [0, 0, 1, 1], [], []>} : vector<10x9xf32>, vector<9x3xf32>, vector<10x3xf32> -> vector<10x3xf32>
    %c448 = arith.constant 448 : index
    %c0_33 = arith.constant 0 : index
    %70 = vector.load %arg2[%c448, %c0_33] : memref<1376x128xf32, #tpu.memory_space<vmem>>, vector<1x3xf32>
    %71 = vector.broadcast %70 : vector<1x3xf32> to vector<10x3xf32>
    %72 = arith.addf %69, %71 : vector<10x3xf32>
    %c456 = arith.constant 456 : index
    %c0_34 = arith.constant 0 : index
    %73 = vector.load %arg2[%c456, %c0_34] : memref<1376x128xf32, #tpu.memory_space<vmem>>, vector<9x3xf32>
    %cst_35 = arith.constant dense<0.000000e+00> : vector<10x3xf32>
    %74 = tpu.matmul %29, %73, %cst_35 {dimension_numbers = #tpu.dot_dimension_numbers<[1], [0], [0], [1], [0, 0, 1, 1], [], []>} : vector<10x9xf32>, vector<9x3xf32>, vector<10x3xf32> -> vector<10x3xf32>
    %c472 = arith.constant 472 : index
    %c0_36 = arith.constant 0 : index
    %75 = vector.load %arg2[%c472, %c0_36] : memref<1376x128xf32, #tpu.memory_space<vmem>>, vector<1x3xf32>
    %76 = vector.broadcast %75 : vector<1x3xf32> to vector<10x3xf32>
    %77 = arith.addf %74, %76 : vector<10x3xf32>
    %cst_37 = arith.constant dense<0.000000e+00> : vector<10x10xf32>
    %78 = tpu.matmul %67, %72, %cst_37 {dimension_numbers = #tpu.dot_dimension_numbers<[1], [1], [0], [0], [0, 0, 1, 0], [], []>} : vector<10x3xf32>, vector<10x3xf32>, vector<10x10xf32> -> vector<10x10xf32>
    %79 = arith.addf %78, %0 : vector<10x10xf32>
    %cst_38 = arith.constant dense<0xFF800000> : vector<10xf32>
    %80 = vector.multi_reduction <maximumf>, %79, %cst_38 [1] : vector<10x10xf32> to vector<10xf32>
    %81 = vector.shape_cast %80 : vector<10xf32> to vector<10x1xf32>
    %82 = vector.broadcast %81 : vector<10x1xf32> to vector<10x10xf32>
    %83 = arith.subf %79, %82 : vector<10x10xf32>
    %84 = math.exp %83 : vector<10x10xf32>
    %cst_39 = arith.constant dense<0.000000e+00> : vector<10xf32>
    %85 = vector.multi_reduction <add>, %84, %cst_39 [1] : vector<10x10xf32> to vector<10xf32>
    %86 = vector.shape_cast %85 : vector<10xf32> to vector<10x1xf32>
    %87 = tpu.reciprocal %86 {approx = true} : vector<10x1xf32> -> vector<10x1xf32>
    %88 = vector.broadcast %87 : vector<10x1xf32> to vector<10x10xf32>
    %89 = arith.mulf %84, %88 : vector<10x10xf32>
    %cst_40 = arith.constant dense<0.000000e+00> : vector<10x3xf32>
    %90 = tpu.matmul %89, %77, %cst_40 {dimension_numbers = #tpu.dot_dimension_numbers<[1], [0], [0], [1], [0, 0, 1, 1], [], []>} : vector<10x10xf32>, vector<10x3xf32>, vector<10x3xf32> -> vector<10x3xf32>
    %c480 = arith.constant 480 : index
    %c0_41 = arith.constant 0 : index
    %91 = vector.load %arg2[%c480, %c0_41] : memref<1376x128xf32, #tpu.memory_space<vmem>>, vector<3x9xf32>
    %cst_42 = arith.constant dense<0.000000e+00> : vector<10x9xf32>
    %92 = tpu.matmul %90, %91, %cst_42 {dimension_numbers = #tpu.dot_dimension_numbers<[1], [0], [0], [1], [0, 0, 1, 1], [], []>} : vector<10x3xf32>, vector<3x9xf32>, vector<10x9xf32> -> vector<10x9xf32>
    %93 = arith.addf %62, %92 : vector<10x9xf32>
    %c488 = arith.constant 488 : index
    %c0_43 = arith.constant 0 : index
    %94 = vector.load %arg2[%c488, %c0_43] : memref<1376x128xf32, #tpu.memory_space<vmem>>, vector<9x3xf32>
    %cst_44 = arith.constant dense<0.000000e+00> : vector<10x3xf32>
    %95 = tpu.matmul %29, %94, %cst_44 {dimension_numbers = #tpu.dot_dimension_numbers<[1], [0], [0], [1], [0, 0, 1, 1], [], []>} : vector<10x9xf32>, vector<9x3xf32>, vector<10x3xf32> -> vector<10x3xf32>
    %c504 = arith.constant 504 : index
    %c0_45 = arith.constant 0 : index
    %96 = vector.load %arg2[%c504, %c0_45] : memref<1376x128xf32, #tpu.memory_space<vmem>>, vector<1x3xf32>
    %97 = vector.broadcast %96 : vector<1x3xf32> to vector<10x3xf32>
    %98 = arith.addf %95, %97 : vector<10x3xf32>
    %c512 = arith.constant 512 : index
    %c0_46 = arith.constant 0 : index
    %99 = vector.load %arg2[%c512, %c0_46] : memref<1376x128xf32, #tpu.memory_space<vmem>>, vector<9x3xf32>
    %cst_47 = arith.constant dense<0.000000e+00> : vector<10x3xf32>
    %100 = tpu.matmul %29, %99, %cst_47 {dimension_numbers = #tpu.dot_dimension_numbers<[1], [0], [0], [1], [0, 0, 1, 1], [], []>} : vector<10x9xf32>, vector<9x3xf32>, vector<10x3xf32> -> vector<10x3xf32>
    %c528 = arith.constant 528 : index
    %c0_48 = arith.constant 0 : index
    %101 = vector.load %arg2[%c528, %c0_48] : memref<1376x128xf32, #tpu.memory_space<vmem>>, vector<1x3xf32>
    %102 = vector.broadcast %101 : vector<1x3xf32> to vector<10x3xf32>
    %103 = arith.addf %100, %102 : vector<10x3xf32>
    %c536 = arith.constant 536 : index
    %c0_49 = arith.constant 0 : index
    %104 = vector.load %arg2[%c536, %c0_49] : memref<1376x128xf32, #tpu.memory_space<vmem>>, vector<9x3xf32>
    %cst_50 = arith.constant dense<0.000000e+00> : vector<10x3xf32>
    %105 = tpu.matmul %29, %104, %cst_50 {dimension_numbers = #tpu.dot_dimension_numbers<[1], [0], [0], [1], [0, 0, 1, 1], [], []>} : vector<10x9xf32>, vector<9x3xf32>, vector<10x3xf32> -> vector<10x3xf32>
    %c552 = arith.constant 552 : index
    %c0_51 = arith.constant 0 : index
    %106 = vector.load %arg2[%c552, %c0_51] : memref<1376x128xf32, #tpu.memory_space<vmem>>, vector<1x3xf32>
    %107 = vector.broadcast %106 : vector<1x3xf32> to vector<10x3xf32>
    %108 = arith.addf %105, %107 : vector<10x3xf32>
    %cst_52 = arith.constant dense<0.000000e+00> : vector<10x10xf32>
    %109 = tpu.matmul %98, %103, %cst_52 {dimension_numbers = #tpu.dot_dimension_numbers<[1], [1], [0], [0], [0, 0, 1, 0], [], []>} : vector<10x3xf32>, vector<10x3xf32>, vector<10x10xf32> -> vector<10x10xf32>
    %110 = arith.addf %109, %0 : vector<10x10xf32>
    %cst_53 = arith.constant dense<0xFF800000> : vector<10xf32>
    %111 = vector.multi_reduction <maximumf>, %110, %cst_53 [1] : vector<10x10xf32> to vector<10xf32>
    %112 = vector.shape_cast %111 : vector<10xf32> to vector<10x1xf32>
    %113 = vector.broadcast %112 : vector<10x1xf32> to vector<10x10xf32>
    %114 = arith.subf %110, %113 : vector<10x10xf32>
    %115 = math.exp %114 : vector<10x10xf32>
    %cst_54 = arith.constant dense<0.000000e+00> : vector<10xf32>
    %116 = vector.multi_reduction <add>, %115, %cst_54 [1] : vector<10x10xf32> to vector<10xf32>
    %117 = vector.shape_cast %116 : vector<10xf32> to vector<10x1xf32>
    %118 = tpu.reciprocal %117 {approx = true} : vector<10x1xf32> -> vector<10x1xf32>
    %119 = vector.broadcast %118 : vector<10x1xf32> to vector<10x10xf32>
    %120 = arith.mulf %115, %119 : vector<10x10xf32>
    %cst_55 = arith.constant dense<0.000000e+00> : vector<10x3xf32>
    %121 = tpu.matmul %120, %108, %cst_55 {dimension_numbers = #tpu.dot_dimension_numbers<[1], [0], [0], [1], [0, 0, 1, 1], [], []>} : vector<10x10xf32>, vector<10x3xf32>, vector<10x3xf32> -> vector<10x3xf32>
    %c560 = arith.constant 560 : index
    %c0_56 = arith.constant 0 : index
    %122 = vector.load %arg2[%c560, %c0_56] : memref<1376x128xf32, #tpu.memory_space<vmem>>, vector<3x9xf32>
    %cst_57 = arith.constant dense<0.000000e+00> : vector<10x9xf32>
    %123 = tpu.matmul %121, %122, %cst_57 {dimension_numbers = #tpu.dot_dimension_numbers<[1], [0], [0], [1], [0, 0, 1, 1], [], []>} : vector<10x3xf32>, vector<3x9xf32>, vector<10x9xf32> -> vector<10x9xf32>
    %124 = arith.addf %93, %123 : vector<10x9xf32>
    %125 = arith.addf %5, %124 : vector<10x9xf32>
    %c312 = arith.constant 312 : index
    %c0_58 = arith.constant 0 : index
    %126 = vector.load %arg2[%c312, %c0_58] : memref<1376x128xf32, #tpu.memory_space<vmem>>, vector<1x9xf32>
    %c320 = arith.constant 320 : index
    %c0_59 = arith.constant 0 : index
    %127 = vector.load %arg2[%c320, %c0_59] : memref<1376x128xf32, #tpu.memory_space<vmem>>, vector<1x9xf32>
    %cst_60 = arith.constant dense<0.000000e+00> : vector<10xf32>
    %128 = vector.multi_reduction <add>, %125, %cst_60 [1] : vector<10x9xf32> to vector<10xf32>
    %129 = vector.shape_cast %128 : vector<10xf32> to vector<10x1xf32>
    %cst_61 = arith.constant 9.000000e+00 : f32
    %130 = vector.broadcast %cst_61 : f32 to vector<10x1xf32>
    %131 = arith.divf %129, %130 : vector<10x1xf32>
    %132 = vector.broadcast %131 : vector<10x1xf32> to vector<10x9xf32>
    %133 = arith.subf %125, %132 : vector<10x9xf32>
    %134 = arith.mulf %133, %133 : vector<10x9xf32>
    %cst_62 = arith.constant dense<0.000000e+00> : vector<10xf32>
    %135 = vector.multi_reduction <add>, %134, %cst_62 [1] : vector<10x9xf32> to vector<10xf32>
    %136 = vector.shape_cast %135 : vector<10xf32> to vector<10x1xf32>
    %cst_63 = arith.constant 9.000000e+00 : f32
    %137 = vector.broadcast %cst_63 : f32 to vector<10x1xf32>
    %138 = arith.divf %136, %137 : vector<10x1xf32>
    %139 = vector.broadcast %131 : vector<10x1xf32> to vector<10x9xf32>
    %140 = arith.subf %125, %139 : vector<10x9xf32>
    %cst_64 = arith.constant 9.99999974E-6 : f32
    %141 = vector.broadcast %cst_64 : f32 to vector<10x1xf32>
    %142 = arith.addf %138, %141 : vector<10x1xf32>
    %143 = math.rsqrt %142 : vector<10x1xf32>
    %144 = vector.broadcast %143 : vector<10x1xf32> to vector<10x9xf32>
    %145 = arith.mulf %140, %144 : vector<10x9xf32>
    %146 = vector.broadcast %126 : vector<1x9xf32> to vector<10x9xf32>
    %147 = arith.mulf %145, %146 : vector<10x9xf32>
    %148 = vector.broadcast %127 : vector<1x9xf32> to vector<10x9xf32>
    %149 = arith.addf %147, %148 : vector<10x9xf32>
    %c576 = arith.constant 576 : index
    %c0_65 = arith.constant 0 : index
    %150 = vector.load %arg2[%c576, %c0_65] : memref<1376x128xf32, #tpu.memory_space<vmem>>, vector<9x36xf32>
    %cst_66 = arith.constant dense<0.000000e+00> : vector<10x36xf32>
    %151 = tpu.matmul %149, %150, %cst_66 {dimension_numbers = #tpu.dot_dimension_numbers<[1], [0], [0], [1], [0, 0, 1, 1], [], []>} : vector<10x9xf32>, vector<9x36xf32>, vector<10x36xf32> -> vector<10x36xf32>
    %c592 = arith.constant 592 : index
    %c0_67 = arith.constant 0 : index
    %152 = vector.load %arg2[%c592, %c0_67] : memref<1376x128xf32, #tpu.memory_space<vmem>>, vector<1x36xf32>
    %153 = vector.broadcast %152 : vector<1x36xf32> to vector<10x36xf32>
    %154 = arith.addf %151, %153 : vector<10x36xf32>
    %cst_68 = arith.constant 5.000000e-01 : f32
    %155 = vector.broadcast %cst_68 : f32 to vector<10x36xf32>
    %156 = arith.mulf %155, %154 : vector<10x36xf32>
    %cst_69 = arith.constant 0.707106769 : f32
    %157 = vector.broadcast %cst_69 : f32 to vector<10x36xf32>
    %158 = arith.mulf %154, %157 : vector<10x36xf32>
    %cst_70 = arith.constant 0.000000e+00 : f32
    %159 = vector.broadcast %cst_70 : f32 to vector<10x36xf32>
    %160 = arith.cmpf oge, %158, %159 : vector<10x36xf32>
    %cst_71 = arith.constant 1.000000e+00 : f32
    %cst_72 = arith.constant -1.000000e+00 : f32
    %161 = vector.broadcast %cst_71 : f32 to vector<10x36xf32>
    %162 = vector.broadcast %cst_72 : f32 to vector<10x36xf32>
    %163 = arith.select %160, %161, %162 : vector<10x36xi1>, vector<10x36xf32>
    %164 = math.absf %158 : vector<10x36xf32>
    %cst_73 = arith.constant 0.327591091 : f32
    %165 = vector.broadcast %cst_73 : f32 to vector<10x36xf32>
    %166 = arith.mulf %165, %164 : vector<10x36xf32>
    %cst_74 = arith.constant 1.000000e+00 : f32
    %167 = vector.broadcast %cst_74 : f32 to vector<10x36xf32>
    %168 = arith.addf %167, %166 : vector<10x36xf32>
    %cst_75 = arith.constant 1.000000e+00 : f32
    %169 = vector.broadcast %cst_75 : f32 to vector<10x36xf32>
    %170 = arith.divf %169, %168 : vector<10x36xf32>
    %cst_76 = arith.constant 1.06140542 : f32
    %171 = vector.broadcast %cst_76 : f32 to vector<10x36xf32>
    %172 = arith.mulf %171, %170 : vector<10x36xf32>
    %cst_77 = arith.constant -1.45315206 : f32
    %173 = vector.broadcast %cst_77 : f32 to vector<10x36xf32>
    %174 = arith.addf %172, %173 : vector<10x36xf32>
    %175 = arith.mulf %174, %170 : vector<10x36xf32>
    %cst_78 = arith.constant 1.42141378 : f32
    %176 = vector.broadcast %cst_78 : f32 to vector<10x36xf32>
    %177 = arith.addf %175, %176 : vector<10x36xf32>
    %178 = arith.mulf %177, %170 : vector<10x36xf32>
    %cst_79 = arith.constant -0.284496725 : f32
    %179 = vector.broadcast %cst_79 : f32 to vector<10x36xf32>
    %180 = arith.addf %178, %179 : vector<10x36xf32>
    %181 = arith.mulf %180, %170 : vector<10x36xf32>
    %cst_80 = arith.constant 0.254829586 : f32
    %182 = vector.broadcast %cst_80 : f32 to vector<10x36xf32>
    %183 = arith.addf %181, %182 : vector<10x36xf32>
    %184 = arith.mulf %183, %170 : vector<10x36xf32>
    %cst_81 = arith.constant 0.000000e+00 : f32
    %185 = vector.broadcast %cst_81 : f32 to vector<10x36xf32>
    %186 = arith.subf %185, %164 : vector<10x36xf32>
    %187 = arith.mulf %186, %164 : vector<10x36xf32>
    %188 = math.exp %187 : vector<10x36xf32>
    %189 = arith.mulf %184, %188 : vector<10x36xf32>
    %cst_82 = arith.constant 1.000000e+00 : f32
    %190 = vector.broadcast %cst_82 : f32 to vector<10x36xf32>
    %191 = arith.subf %190, %189 : vector<10x36xf32>
    %192 = arith.mulf %163, %191 : vector<10x36xf32>
    %cst_83 = arith.constant 1.000000e+00 : f32
    %193 = vector.broadcast %cst_83 : f32 to vector<10x36xf32>
    %194 = arith.addf %193, %192 : vector<10x36xf32>
    %195 = arith.mulf %156, %194 : vector<10x36xf32>
    %c600 = arith.constant 600 : index
    %c0_84 = arith.constant 0 : index
    %196 = vector.load %arg2[%c600, %c0_84] : memref<1376x128xf32, #tpu.memory_space<vmem>>, vector<36x9xf32>
    %cst_85 = arith.constant dense<0.000000e+00> : vector<10x9xf32>
    %197 = tpu.matmul %195, %196, %cst_85 {dimension_numbers = #tpu.dot_dimension_numbers<[1], [0], [0], [1], [0, 0, 1, 1], [], []>} : vector<10x36xf32>, vector<36x9xf32>, vector<10x9xf32> -> vector<10x9xf32>
    %c640 = arith.constant 640 : index
    %c0_86 = arith.constant 0 : index
    %198 = vector.load %arg2[%c640, %c0_86] : memref<1376x128xf32, #tpu.memory_space<vmem>>, vector<1x9xf32>
    %199 = vector.broadcast %198 : vector<1x9xf32> to vector<10x9xf32>
    %200 = arith.addf %197, %199 : vector<10x9xf32>
    %201 = arith.mulf %125, %200 : vector<10x9xf32>
    %c648 = arith.constant 648 : index
    %c0_87 = arith.constant 0 : index
    %202 = vector.load %arg2[%c648, %c0_87] : memref<1376x128xf32, #tpu.memory_space<vmem>>, vector<1x9xf32>
    %c656 = arith.constant 656 : index
    %c0_88 = arith.constant 0 : index
    %203 = vector.load %arg2[%c656, %c0_88] : memref<1376x128xf32, #tpu.memory_space<vmem>>, vector<1x9xf32>
    %cst_89 = arith.constant dense<0.000000e+00> : vector<10xf32>
    %204 = vector.multi_reduction <add>, %201, %cst_89 [1] : vector<10x9xf32> to vector<10xf32>
    %205 = vector.shape_cast %204 : vector<10xf32> to vector<10x1xf32>
    %cst_90 = arith.constant 9.000000e+00 : f32
    %206 = vector.broadcast %cst_90 : f32 to vector<10x1xf32>
    %207 = arith.divf %205, %206 : vector<10x1xf32>
    %208 = vector.broadcast %207 : vector<10x1xf32> to vector<10x9xf32>
    %209 = arith.subf %201, %208 : vector<10x9xf32>
    %210 = arith.mulf %209, %209 : vector<10x9xf32>
    %cst_91 = arith.constant dense<0.000000e+00> : vector<10xf32>
    %211 = vector.multi_reduction <add>, %210, %cst_91 [1] : vector<10x9xf32> to vector<10xf32>
    %212 = vector.shape_cast %211 : vector<10xf32> to vector<10x1xf32>
    %cst_92 = arith.constant 9.000000e+00 : f32
    %213 = vector.broadcast %cst_92 : f32 to vector<10x1xf32>
    %214 = arith.divf %212, %213 : vector<10x1xf32>
    %215 = vector.broadcast %207 : vector<10x1xf32> to vector<10x9xf32>
    %216 = arith.subf %201, %215 : vector<10x9xf32>
    %cst_93 = arith.constant 9.99999974E-6 : f32
    %217 = vector.broadcast %cst_93 : f32 to vector<10x1xf32>
    %218 = arith.addf %214, %217 : vector<10x1xf32>
    %219 = math.rsqrt %218 : vector<10x1xf32>
    %220 = vector.broadcast %219 : vector<10x1xf32> to vector<10x9xf32>
    %221 = arith.mulf %216, %220 : vector<10x9xf32>
    %222 = vector.broadcast %202 : vector<1x9xf32> to vector<10x9xf32>
    %223 = arith.mulf %221, %222 : vector<10x9xf32>
    %224 = vector.broadcast %203 : vector<1x9xf32> to vector<10x9xf32>
    %225 = arith.addf %223, %224 : vector<10x9xf32>
    %c920 = arith.constant 920 : index
    %c0_94 = arith.constant 0 : index
    %226 = vector.load %arg2[%c920, %c0_94] : memref<1376x128xf32, #tpu.memory_space<vmem>>, vector<1x9xf32>
    %c680 = arith.constant 680 : index
    %c0_95 = arith.constant 0 : index
    %227 = vector.load %arg2[%c680, %c0_95] : memref<1376x128xf32, #tpu.memory_space<vmem>>, vector<9x3xf32>
    %cst_96 = arith.constant dense<0.000000e+00> : vector<10x3xf32>
    %228 = tpu.matmul %225, %227, %cst_96 {dimension_numbers = #tpu.dot_dimension_numbers<[1], [0], [0], [1], [0, 0, 1, 1], [], []>} : vector<10x9xf32>, vector<9x3xf32>, vector<10x3xf32> -> vector<10x3xf32>
    %c696 = arith.constant 696 : index
    %c0_97 = arith.constant 0 : index
    %229 = vector.load %arg2[%c696, %c0_97] : memref<1376x128xf32, #tpu.memory_space<vmem>>, vector<1x3xf32>
    %230 = vector.broadcast %229 : vector<1x3xf32> to vector<10x3xf32>
    %231 = arith.addf %228, %230 : vector<10x3xf32>
    %c704 = arith.constant 704 : index
    %c0_98 = arith.constant 0 : index
    %232 = vector.load %arg2[%c704, %c0_98] : memref<1376x128xf32, #tpu.memory_space<vmem>>, vector<9x3xf32>
    %cst_99 = arith.constant dense<0.000000e+00> : vector<10x3xf32>
    %233 = tpu.matmul %225, %232, %cst_99 {dimension_numbers = #tpu.dot_dimension_numbers<[1], [0], [0], [1], [0, 0, 1, 1], [], []>} : vector<10x9xf32>, vector<9x3xf32>, vector<10x3xf32> -> vector<10x3xf32>
    %c720 = arith.constant 720 : index
    %c0_100 = arith.constant 0 : index
    %234 = vector.load %arg2[%c720, %c0_100] : memref<1376x128xf32, #tpu.memory_space<vmem>>, vector<1x3xf32>
    %235 = vector.broadcast %234 : vector<1x3xf32> to vector<10x3xf32>
    %236 = arith.addf %233, %235 : vector<10x3xf32>
    %c728 = arith.constant 728 : index
    %c0_101 = arith.constant 0 : index
    %237 = vector.load %arg2[%c728, %c0_101] : memref<1376x128xf32, #tpu.memory_space<vmem>>, vector<9x3xf32>
    %cst_102 = arith.constant dense<0.000000e+00> : vector<10x3xf32>
    %238 = tpu.matmul %225, %237, %cst_102 {dimension_numbers = #tpu.dot_dimension_numbers<[1], [0], [0], [1], [0, 0, 1, 1], [], []>} : vector<10x9xf32>, vector<9x3xf32>, vector<10x3xf32> -> vector<10x3xf32>
    %c744 = arith.constant 744 : index
    %c0_103 = arith.constant 0 : index
    %239 = vector.load %arg2[%c744, %c0_103] : memref<1376x128xf32, #tpu.memory_space<vmem>>, vector<1x3xf32>
    %240 = vector.broadcast %239 : vector<1x3xf32> to vector<10x3xf32>
    %241 = arith.addf %238, %240 : vector<10x3xf32>
    %cst_104 = arith.constant dense<0.000000e+00> : vector<10x10xf32>
    %242 = tpu.matmul %231, %236, %cst_104 {dimension_numbers = #tpu.dot_dimension_numbers<[1], [1], [0], [0], [0, 0, 1, 0], [], []>} : vector<10x3xf32>, vector<10x3xf32>, vector<10x10xf32> -> vector<10x10xf32>
    %243 = arith.addf %242, %0 : vector<10x10xf32>
    %cst_105 = arith.constant dense<0xFF800000> : vector<10xf32>
    %244 = vector.multi_reduction <maximumf>, %243, %cst_105 [1] : vector<10x10xf32> to vector<10xf32>
    %245 = vector.shape_cast %244 : vector<10xf32> to vector<10x1xf32>
    %246 = vector.broadcast %245 : vector<10x1xf32> to vector<10x10xf32>
    %247 = arith.subf %243, %246 : vector<10x10xf32>
    %248 = math.exp %247 : vector<10x10xf32>
    %cst_106 = arith.constant dense<0.000000e+00> : vector<10xf32>
    %249 = vector.multi_reduction <add>, %248, %cst_106 [1] : vector<10x10xf32> to vector<10xf32>
    %250 = vector.shape_cast %249 : vector<10xf32> to vector<10x1xf32>
    %251 = tpu.reciprocal %250 {approx = true} : vector<10x1xf32> -> vector<10x1xf32>
    %252 = vector.broadcast %251 : vector<10x1xf32> to vector<10x10xf32>
    %253 = arith.mulf %248, %252 : vector<10x10xf32>
    %cst_107 = arith.constant dense<0.000000e+00> : vector<10x3xf32>
    %254 = tpu.matmul %253, %241, %cst_107 {dimension_numbers = #tpu.dot_dimension_numbers<[1], [0], [0], [1], [0, 0, 1, 1], [], []>} : vector<10x10xf32>, vector<10x3xf32>, vector<10x3xf32> -> vector<10x3xf32>
    %c752 = arith.constant 752 : index
    %c0_108 = arith.constant 0 : index
    %255 = vector.load %arg2[%c752, %c0_108] : memref<1376x128xf32, #tpu.memory_space<vmem>>, vector<3x9xf32>
    %cst_109 = arith.constant dense<0.000000e+00> : vector<10x9xf32>
    %256 = tpu.matmul %254, %255, %cst_109 {dimension_numbers = #tpu.dot_dimension_numbers<[1], [0], [0], [1], [0, 0, 1, 1], [], []>} : vector<10x3xf32>, vector<3x9xf32>, vector<10x9xf32> -> vector<10x9xf32>
    %257 = vector.broadcast %226 : vector<1x9xf32> to vector<10x9xf32>
    %258 = arith.addf %257, %256 : vector<10x9xf32>
    %c760 = arith.constant 760 : index
    %c0_110 = arith.constant 0 : index
    %259 = vector.load %arg2[%c760, %c0_110] : memref<1376x128xf32, #tpu.memory_space<vmem>>, vector<9x3xf32>
    %cst_111 = arith.constant dense<0.000000e+00> : vector<10x3xf32>
    %260 = tpu.matmul %225, %259, %cst_111 {dimension_numbers = #tpu.dot_dimension_numbers<[1], [0], [0], [1], [0, 0, 1, 1], [], []>} : vector<10x9xf32>, vector<9x3xf32>, vector<10x3xf32> -> vector<10x3xf32>
    %c776 = arith.constant 776 : index
    %c0_112 = arith.constant 0 : index
    %261 = vector.load %arg2[%c776, %c0_112] : memref<1376x128xf32, #tpu.memory_space<vmem>>, vector<1x3xf32>
    %262 = vector.broadcast %261 : vector<1x3xf32> to vector<10x3xf32>
    %263 = arith.addf %260, %262 : vector<10x3xf32>
    %c784 = arith.constant 784 : index
    %c0_113 = arith.constant 0 : index
    %264 = vector.load %arg2[%c784, %c0_113] : memref<1376x128xf32, #tpu.memory_space<vmem>>, vector<9x3xf32>
    %cst_114 = arith.constant dense<0.000000e+00> : vector<10x3xf32>
    %265 = tpu.matmul %225, %264, %cst_114 {dimension_numbers = #tpu.dot_dimension_numbers<[1], [0], [0], [1], [0, 0, 1, 1], [], []>} : vector<10x9xf32>, vector<9x3xf32>, vector<10x3xf32> -> vector<10x3xf32>
    %c800 = arith.constant 800 : index
    %c0_115 = arith.constant 0 : index
    %266 = vector.load %arg2[%c800, %c0_115] : memref<1376x128xf32, #tpu.memory_space<vmem>>, vector<1x3xf32>
    %267 = vector.broadcast %266 : vector<1x3xf32> to vector<10x3xf32>
    %268 = arith.addf %265, %267 : vector<10x3xf32>
    %c808 = arith.constant 808 : index
    %c0_116 = arith.constant 0 : index
    %269 = vector.load %arg2[%c808, %c0_116] : memref<1376x128xf32, #tpu.memory_space<vmem>>, vector<9x3xf32>
    %cst_117 = arith.constant dense<0.000000e+00> : vector<10x3xf32>
    %270 = tpu.matmul %225, %269, %cst_117 {dimension_numbers = #tpu.dot_dimension_numbers<[1], [0], [0], [1], [0, 0, 1, 1], [], []>} : vector<10x9xf32>, vector<9x3xf32>, vector<10x3xf32> -> vector<10x3xf32>
    %c824 = arith.constant 824 : index
    %c0_118 = arith.constant 0 : index
    %271 = vector.load %arg2[%c824, %c0_118] : memref<1376x128xf32, #tpu.memory_space<vmem>>, vector<1x3xf32>
    %272 = vector.broadcast %271 : vector<1x3xf32> to vector<10x3xf32>
    %273 = arith.addf %270, %272 : vector<10x3xf32>
    %cst_119 = arith.constant dense<0.000000e+00> : vector<10x10xf32>
    %274 = tpu.matmul %263, %268, %cst_119 {dimension_numbers = #tpu.dot_dimension_numbers<[1], [1], [0], [0], [0, 0, 1, 0], [], []>} : vector<10x3xf32>, vector<10x3xf32>, vector<10x10xf32> -> vector<10x10xf32>
    %275 = arith.addf %274, %0 : vector<10x10xf32>
    %cst_120 = arith.constant dense<0xFF800000> : vector<10xf32>
    %276 = vector.multi_reduction <maximumf>, %275, %cst_120 [1] : vector<10x10xf32> to vector<10xf32>
    %277 = vector.shape_cast %276 : vector<10xf32> to vector<10x1xf32>
    %278 = vector.broadcast %277 : vector<10x1xf32> to vector<10x10xf32>
    %279 = arith.subf %275, %278 : vector<10x10xf32>
    %280 = math.exp %279 : vector<10x10xf32>
    %cst_121 = arith.constant dense<0.000000e+00> : vector<10xf32>
    %281 = vector.multi_reduction <add>, %280, %cst_121 [1] : vector<10x10xf32> to vector<10xf32>
    %282 = vector.shape_cast %281 : vector<10xf32> to vector<10x1xf32>
    %283 = tpu.reciprocal %282 {approx = true} : vector<10x1xf32> -> vector<10x1xf32>
    %284 = vector.broadcast %283 : vector<10x1xf32> to vector<10x10xf32>
    %285 = arith.mulf %280, %284 : vector<10x10xf32>
    %cst_122 = arith.constant dense<0.000000e+00> : vector<10x3xf32>
    %286 = tpu.matmul %285, %273, %cst_122 {dimension_numbers = #tpu.dot_dimension_numbers<[1], [0], [0], [1], [0, 0, 1, 1], [], []>} : vector<10x10xf32>, vector<10x3xf32>, vector<10x3xf32> -> vector<10x3xf32>
    %c832 = arith.constant 832 : index
    %c0_123 = arith.constant 0 : index
    %287 = vector.load %arg2[%c832, %c0_123] : memref<1376x128xf32, #tpu.memory_space<vmem>>, vector<3x9xf32>
    %cst_124 = arith.constant dense<0.000000e+00> : vector<10x9xf32>
    %288 = tpu.matmul %286, %287, %cst_124 {dimension_numbers = #tpu.dot_dimension_numbers<[1], [0], [0], [1], [0, 0, 1, 1], [], []>} : vector<10x3xf32>, vector<3x9xf32>, vector<10x9xf32> -> vector<10x9xf32>
    %289 = arith.addf %258, %288 : vector<10x9xf32>
    %c840 = arith.constant 840 : index
    %c0_125 = arith.constant 0 : index
    %290 = vector.load %arg2[%c840, %c0_125] : memref<1376x128xf32, #tpu.memory_space<vmem>>, vector<9x3xf32>
    %cst_126 = arith.constant dense<0.000000e+00> : vector<10x3xf32>
    %291 = tpu.matmul %225, %290, %cst_126 {dimension_numbers = #tpu.dot_dimension_numbers<[1], [0], [0], [1], [0, 0, 1, 1], [], []>} : vector<10x9xf32>, vector<9x3xf32>, vector<10x3xf32> -> vector<10x3xf32>
    %c856 = arith.constant 856 : index
    %c0_127 = arith.constant 0 : index
    %292 = vector.load %arg2[%c856, %c0_127] : memref<1376x128xf32, #tpu.memory_space<vmem>>, vector<1x3xf32>
    %293 = vector.broadcast %292 : vector<1x3xf32> to vector<10x3xf32>
    %294 = arith.addf %291, %293 : vector<10x3xf32>
    %c864 = arith.constant 864 : index
    %c0_128 = arith.constant 0 : index
    %295 = vector.load %arg2[%c864, %c0_128] : memref<1376x128xf32, #tpu.memory_space<vmem>>, vector<9x3xf32>
    %cst_129 = arith.constant dense<0.000000e+00> : vector<10x3xf32>
    %296 = tpu.matmul %225, %295, %cst_129 {dimension_numbers = #tpu.dot_dimension_numbers<[1], [0], [0], [1], [0, 0, 1, 1], [], []>} : vector<10x9xf32>, vector<9x3xf32>, vector<10x3xf32> -> vector<10x3xf32>
    %c880 = arith.constant 880 : index
    %c0_130 = arith.constant 0 : index
    %297 = vector.load %arg2[%c880, %c0_130] : memref<1376x128xf32, #tpu.memory_space<vmem>>, vector<1x3xf32>
    %298 = vector.broadcast %297 : vector<1x3xf32> to vector<10x3xf32>
    %299 = arith.addf %296, %298 : vector<10x3xf32>
    %c888 = arith.constant 888 : index
    %c0_131 = arith.constant 0 : index
    %300 = vector.load %arg2[%c888, %c0_131] : memref<1376x128xf32, #tpu.memory_space<vmem>>, vector<9x3xf32>
    %cst_132 = arith.constant dense<0.000000e+00> : vector<10x3xf32>
    %301 = tpu.matmul %225, %300, %cst_132 {dimension_numbers = #tpu.dot_dimension_numbers<[1], [0], [0], [1], [0, 0, 1, 1], [], []>} : vector<10x9xf32>, vector<9x3xf32>, vector<10x3xf32> -> vector<10x3xf32>
    %c904 = arith.constant 904 : index
    %c0_133 = arith.constant 0 : index
    %302 = vector.load %arg2[%c904, %c0_133] : memref<1376x128xf32, #tpu.memory_space<vmem>>, vector<1x3xf32>
    %303 = vector.broadcast %302 : vector<1x3xf32> to vector<10x3xf32>
    %304 = arith.addf %301, %303 : vector<10x3xf32>
    %cst_134 = arith.constant dense<0.000000e+00> : vector<10x10xf32>
    %305 = tpu.matmul %294, %299, %cst_134 {dimension_numbers = #tpu.dot_dimension_numbers<[1], [1], [0], [0], [0, 0, 1, 0], [], []>} : vector<10x3xf32>, vector<10x3xf32>, vector<10x10xf32> -> vector<10x10xf32>
    %306 = arith.addf %305, %0 : vector<10x10xf32>
    %cst_135 = arith.constant dense<0xFF800000> : vector<10xf32>
    %307 = vector.multi_reduction <maximumf>, %306, %cst_135 [1] : vector<10x10xf32> to vector<10xf32>
    %308 = vector.shape_cast %307 : vector<10xf32> to vector<10x1xf32>
    %309 = vector.broadcast %308 : vector<10x1xf32> to vector<10x10xf32>
    %310 = arith.subf %306, %309 : vector<10x10xf32>
    %311 = math.exp %310 : vector<10x10xf32>
    %cst_136 = arith.constant dense<0.000000e+00> : vector<10xf32>
    %312 = vector.multi_reduction <add>, %311, %cst_136 [1] : vector<10x10xf32> to vector<10xf32>
    %313 = vector.shape_cast %312 : vector<10xf32> to vector<10x1xf32>
    %314 = tpu.reciprocal %313 {approx = true} : vector<10x1xf32> -> vector<10x1xf32>
    %315 = vector.broadcast %314 : vector<10x1xf32> to vector<10x10xf32>
    %316 = arith.mulf %311, %315 : vector<10x10xf32>
    %cst_137 = arith.constant dense<0.000000e+00> : vector<10x3xf32>
    %317 = tpu.matmul %316, %304, %cst_137 {dimension_numbers = #tpu.dot_dimension_numbers<[1], [0], [0], [1], [0, 0, 1, 1], [], []>} : vector<10x10xf32>, vector<10x3xf32>, vector<10x3xf32> -> vector<10x3xf32>
    %c912 = arith.constant 912 : index
    %c0_138 = arith.constant 0 : index
    %318 = vector.load %arg2[%c912, %c0_138] : memref<1376x128xf32, #tpu.memory_space<vmem>>, vector<3x9xf32>
    %cst_139 = arith.constant dense<0.000000e+00> : vector<10x9xf32>
    %319 = tpu.matmul %317, %318, %cst_139 {dimension_numbers = #tpu.dot_dimension_numbers<[1], [0], [0], [1], [0, 0, 1, 1], [], []>} : vector<10x3xf32>, vector<3x9xf32>, vector<10x9xf32> -> vector<10x9xf32>
    %320 = arith.addf %289, %319 : vector<10x9xf32>
    %321 = arith.addf %201, %320 : vector<10x9xf32>
    %c664 = arith.constant 664 : index
    %c0_140 = arith.constant 0 : index
    %322 = vector.load %arg2[%c664, %c0_140] : memref<1376x128xf32, #tpu.memory_space<vmem>>, vector<1x9xf32>
    %c672 = arith.constant 672 : index
    %c0_141 = arith.constant 0 : index
    %323 = vector.load %arg2[%c672, %c0_141] : memref<1376x128xf32, #tpu.memory_space<vmem>>, vector<1x9xf32>
    %cst_142 = arith.constant dense<0.000000e+00> : vector<10xf32>
    %324 = vector.multi_reduction <add>, %321, %cst_142 [1] : vector<10x9xf32> to vector<10xf32>
    %325 = vector.shape_cast %324 : vector<10xf32> to vector<10x1xf32>
    %cst_143 = arith.constant 9.000000e+00 : f32
    %326 = vector.broadcast %cst_143 : f32 to vector<10x1xf32>
    %327 = arith.divf %325, %326 : vector<10x1xf32>
    %328 = vector.broadcast %327 : vector<10x1xf32> to vector<10x9xf32>
    %329 = arith.subf %321, %328 : vector<10x9xf32>
    %330 = arith.mulf %329, %329 : vector<10x9xf32>
    %cst_144 = arith.constant dense<0.000000e+00> : vector<10xf32>
    %331 = vector.multi_reduction <add>, %330, %cst_144 [1] : vector<10x9xf32> to vector<10xf32>
    %332 = vector.shape_cast %331 : vector<10xf32> to vector<10x1xf32>
    %cst_145 = arith.constant 9.000000e+00 : f32
    %333 = vector.broadcast %cst_145 : f32 to vector<10x1xf32>
    %334 = arith.divf %332, %333 : vector<10x1xf32>
    %335 = vector.broadcast %327 : vector<10x1xf32> to vector<10x9xf32>
    %336 = arith.subf %321, %335 : vector<10x9xf32>
    %cst_146 = arith.constant 9.99999974E-6 : f32
    %337 = vector.broadcast %cst_146 : f32 to vector<10x1xf32>
    %338 = arith.addf %334, %337 : vector<10x1xf32>
    %339 = math.rsqrt %338 : vector<10x1xf32>
    %340 = vector.broadcast %339 : vector<10x1xf32> to vector<10x9xf32>
    %341 = arith.mulf %336, %340 : vector<10x9xf32>
    %342 = vector.broadcast %322 : vector<1x9xf32> to vector<10x9xf32>
    %343 = arith.mulf %341, %342 : vector<10x9xf32>
    %344 = vector.broadcast %323 : vector<1x9xf32> to vector<10x9xf32>
    %345 = arith.addf %343, %344 : vector<10x9xf32>
    %c928 = arith.constant 928 : index
    %c0_147 = arith.constant 0 : index
    %346 = vector.load %arg2[%c928, %c0_147] : memref<1376x128xf32, #tpu.memory_space<vmem>>, vector<9x36xf32>
    %cst_148 = arith.constant dense<0.000000e+00> : vector<10x36xf32>
    %347 = tpu.matmul %345, %346, %cst_148 {dimension_numbers = #tpu.dot_dimension_numbers<[1], [0], [0], [1], [0, 0, 1, 1], [], []>} : vector<10x9xf32>, vector<9x36xf32>, vector<10x36xf32> -> vector<10x36xf32>
    %c944 = arith.constant 944 : index
    %c0_149 = arith.constant 0 : index
    %348 = vector.load %arg2[%c944, %c0_149] : memref<1376x128xf32, #tpu.memory_space<vmem>>, vector<1x36xf32>
    %349 = vector.broadcast %348 : vector<1x36xf32> to vector<10x36xf32>
    %350 = arith.addf %347, %349 : vector<10x36xf32>
    %cst_150 = arith.constant 5.000000e-01 : f32
    %351 = vector.broadcast %cst_150 : f32 to vector<10x36xf32>
    %352 = arith.mulf %351, %350 : vector<10x36xf32>
    %cst_151 = arith.constant 0.707106769 : f32
    %353 = vector.broadcast %cst_151 : f32 to vector<10x36xf32>
    %354 = arith.mulf %350, %353 : vector<10x36xf32>
    %cst_152 = arith.constant 0.000000e+00 : f32
    %355 = vector.broadcast %cst_152 : f32 to vector<10x36xf32>
    %356 = arith.cmpf oge, %354, %355 : vector<10x36xf32>
    %cst_153 = arith.constant 1.000000e+00 : f32
    %cst_154 = arith.constant -1.000000e+00 : f32
    %357 = vector.broadcast %cst_153 : f32 to vector<10x36xf32>
    %358 = vector.broadcast %cst_154 : f32 to vector<10x36xf32>
    %359 = arith.select %356, %357, %358 : vector<10x36xi1>, vector<10x36xf32>
    %360 = math.absf %354 : vector<10x36xf32>
    %cst_155 = arith.constant 0.327591091 : f32
    %361 = vector.broadcast %cst_155 : f32 to vector<10x36xf32>
    %362 = arith.mulf %361, %360 : vector<10x36xf32>
    %cst_156 = arith.constant 1.000000e+00 : f32
    %363 = vector.broadcast %cst_156 : f32 to vector<10x36xf32>
    %364 = arith.addf %363, %362 : vector<10x36xf32>
    %cst_157 = arith.constant 1.000000e+00 : f32
    %365 = vector.broadcast %cst_157 : f32 to vector<10x36xf32>
    %366 = arith.divf %365, %364 : vector<10x36xf32>
    %cst_158 = arith.constant 1.06140542 : f32
    %367 = vector.broadcast %cst_158 : f32 to vector<10x36xf32>
    %368 = arith.mulf %367, %366 : vector<10x36xf32>
    %cst_159 = arith.constant -1.45315206 : f32
    %369 = vector.broadcast %cst_159 : f32 to vector<10x36xf32>
    %370 = arith.addf %368, %369 : vector<10x36xf32>
    %371 = arith.mulf %370, %366 : vector<10x36xf32>
    %cst_160 = arith.constant 1.42141378 : f32
    %372 = vector.broadcast %cst_160 : f32 to vector<10x36xf32>
    %373 = arith.addf %371, %372 : vector<10x36xf32>
    %374 = arith.mulf %373, %366 : vector<10x36xf32>
    %cst_161 = arith.constant -0.284496725 : f32
    %375 = vector.broadcast %cst_161 : f32 to vector<10x36xf32>
    %376 = arith.addf %374, %375 : vector<10x36xf32>
    %377 = arith.mulf %376, %366 : vector<10x36xf32>
    %cst_162 = arith.constant 0.254829586 : f32
    %378 = vector.broadcast %cst_162 : f32 to vector<10x36xf32>
    %379 = arith.addf %377, %378 : vector<10x36xf32>
    %380 = arith.mulf %379, %366 : vector<10x36xf32>
    %cst_163 = arith.constant 0.000000e+00 : f32
    %381 = vector.broadcast %cst_163 : f32 to vector<10x36xf32>
    %382 = arith.subf %381, %360 : vector<10x36xf32>
    %383 = arith.mulf %382, %360 : vector<10x36xf32>
    %384 = math.exp %383 : vector<10x36xf32>
    %385 = arith.mulf %380, %384 : vector<10x36xf32>
    %cst_164 = arith.constant 1.000000e+00 : f32
    %386 = vector.broadcast %cst_164 : f32 to vector<10x36xf32>
    %387 = arith.subf %386, %385 : vector<10x36xf32>
    %388 = arith.mulf %359, %387 : vector<10x36xf32>
    %cst_165 = arith.constant 1.000000e+00 : f32
    %389 = vector.broadcast %cst_165 : f32 to vector<10x36xf32>
    %390 = arith.addf %389, %388 : vector<10x36xf32>
    %391 = arith.mulf %352, %390 : vector<10x36xf32>
    %c952 = arith.constant 952 : index
    %c0_166 = arith.constant 0 : index
    %392 = vector.load %arg2[%c952, %c0_166] : memref<1376x128xf32, #tpu.memory_space<vmem>>, vector<36x9xf32>
    %cst_167 = arith.constant dense<0.000000e+00> : vector<10x9xf32>
    %393 = tpu.matmul %391, %392, %cst_167 {dimension_numbers = #tpu.dot_dimension_numbers<[1], [0], [0], [1], [0, 0, 1, 1], [], []>} : vector<10x36xf32>, vector<36x9xf32>, vector<10x9xf32> -> vector<10x9xf32>
    %c992 = arith.constant 992 : index
    %c0_168 = arith.constant 0 : index
    %394 = vector.load %arg2[%c992, %c0_168] : memref<1376x128xf32, #tpu.memory_space<vmem>>, vector<1x9xf32>
    %395 = vector.broadcast %394 : vector<1x9xf32> to vector<10x9xf32>
    %396 = arith.addf %393, %395 : vector<10x9xf32>
    %397 = arith.mulf %321, %396 : vector<10x9xf32>
    %c1000 = arith.constant 1000 : index
    %c0_169 = arith.constant 0 : index
    %398 = vector.load %arg2[%c1000, %c0_169] : memref<1376x128xf32, #tpu.memory_space<vmem>>, vector<1x9xf32>
    %c1008 = arith.constant 1008 : index
    %c0_170 = arith.constant 0 : index
    %399 = vector.load %arg2[%c1008, %c0_170] : memref<1376x128xf32, #tpu.memory_space<vmem>>, vector<1x9xf32>
    %cst_171 = arith.constant dense<0.000000e+00> : vector<10xf32>
    %400 = vector.multi_reduction <add>, %397, %cst_171 [1] : vector<10x9xf32> to vector<10xf32>
    %401 = vector.shape_cast %400 : vector<10xf32> to vector<10x1xf32>
    %cst_172 = arith.constant 9.000000e+00 : f32
    %402 = vector.broadcast %cst_172 : f32 to vector<10x1xf32>
    %403 = arith.divf %401, %402 : vector<10x1xf32>
    %404 = vector.broadcast %403 : vector<10x1xf32> to vector<10x9xf32>
    %405 = arith.subf %397, %404 : vector<10x9xf32>
    %406 = arith.mulf %405, %405 : vector<10x9xf32>
    %cst_173 = arith.constant dense<0.000000e+00> : vector<10xf32>
    %407 = vector.multi_reduction <add>, %406, %cst_173 [1] : vector<10x9xf32> to vector<10xf32>
    %408 = vector.shape_cast %407 : vector<10xf32> to vector<10x1xf32>
    %cst_174 = arith.constant 9.000000e+00 : f32
    %409 = vector.broadcast %cst_174 : f32 to vector<10x1xf32>
    %410 = arith.divf %408, %409 : vector<10x1xf32>
    %411 = vector.broadcast %403 : vector<10x1xf32> to vector<10x9xf32>
    %412 = arith.subf %397, %411 : vector<10x9xf32>
    %cst_175 = arith.constant 9.99999974E-6 : f32
    %413 = vector.broadcast %cst_175 : f32 to vector<10x1xf32>
    %414 = arith.addf %410, %413 : vector<10x1xf32>
    %415 = math.rsqrt %414 : vector<10x1xf32>
    %416 = vector.broadcast %415 : vector<10x1xf32> to vector<10x9xf32>
    %417 = arith.mulf %412, %416 : vector<10x9xf32>
    %418 = vector.broadcast %398 : vector<1x9xf32> to vector<10x9xf32>
    %419 = arith.mulf %417, %418 : vector<10x9xf32>
    %420 = vector.broadcast %399 : vector<1x9xf32> to vector<10x9xf32>
    %421 = arith.addf %419, %420 : vector<10x9xf32>
    %c1272 = arith.constant 1272 : index
    %c0_176 = arith.constant 0 : index
    %422 = vector.load %arg2[%c1272, %c0_176] : memref<1376x128xf32, #tpu.memory_space<vmem>>, vector<1x9xf32>
    %c1032 = arith.constant 1032 : index
    %c0_177 = arith.constant 0 : index
    %423 = vector.load %arg2[%c1032, %c0_177] : memref<1376x128xf32, #tpu.memory_space<vmem>>, vector<9x3xf32>
    %cst_178 = arith.constant dense<0.000000e+00> : vector<10x3xf32>
    %424 = tpu.matmul %421, %423, %cst_178 {dimension_numbers = #tpu.dot_dimension_numbers<[1], [0], [0], [1], [0, 0, 1, 1], [], []>} : vector<10x9xf32>, vector<9x3xf32>, vector<10x3xf32> -> vector<10x3xf32>
    %c1048 = arith.constant 1048 : index
    %c0_179 = arith.constant 0 : index
    %425 = vector.load %arg2[%c1048, %c0_179] : memref<1376x128xf32, #tpu.memory_space<vmem>>, vector<1x3xf32>
    %426 = vector.broadcast %425 : vector<1x3xf32> to vector<10x3xf32>
    %427 = arith.addf %424, %426 : vector<10x3xf32>
    %c1056 = arith.constant 1056 : index
    %c0_180 = arith.constant 0 : index
    %428 = vector.load %arg2[%c1056, %c0_180] : memref<1376x128xf32, #tpu.memory_space<vmem>>, vector<9x3xf32>
    %cst_181 = arith.constant dense<0.000000e+00> : vector<10x3xf32>
    %429 = tpu.matmul %421, %428, %cst_181 {dimension_numbers = #tpu.dot_dimension_numbers<[1], [0], [0], [1], [0, 0, 1, 1], [], []>} : vector<10x9xf32>, vector<9x3xf32>, vector<10x3xf32> -> vector<10x3xf32>
    %c1072 = arith.constant 1072 : index
    %c0_182 = arith.constant 0 : index
    %430 = vector.load %arg2[%c1072, %c0_182] : memref<1376x128xf32, #tpu.memory_space<vmem>>, vector<1x3xf32>
    %431 = vector.broadcast %430 : vector<1x3xf32> to vector<10x3xf32>
    %432 = arith.addf %429, %431 : vector<10x3xf32>
    %c1080 = arith.constant 1080 : index
    %c0_183 = arith.constant 0 : index
    %433 = vector.load %arg2[%c1080, %c0_183] : memref<1376x128xf32, #tpu.memory_space<vmem>>, vector<9x3xf32>
    %cst_184 = arith.constant dense<0.000000e+00> : vector<10x3xf32>
    %434 = tpu.matmul %421, %433, %cst_184 {dimension_numbers = #tpu.dot_dimension_numbers<[1], [0], [0], [1], [0, 0, 1, 1], [], []>} : vector<10x9xf32>, vector<9x3xf32>, vector<10x3xf32> -> vector<10x3xf32>
    %c1096 = arith.constant 1096 : index
    %c0_185 = arith.constant 0 : index
    %435 = vector.load %arg2[%c1096, %c0_185] : memref<1376x128xf32, #tpu.memory_space<vmem>>, vector<1x3xf32>
    %436 = vector.broadcast %435 : vector<1x3xf32> to vector<10x3xf32>
    %437 = arith.addf %434, %436 : vector<10x3xf32>
    %cst_186 = arith.constant dense<0.000000e+00> : vector<10x10xf32>
    %438 = tpu.matmul %427, %432, %cst_186 {dimension_numbers = #tpu.dot_dimension_numbers<[1], [1], [0], [0], [0, 0, 1, 0], [], []>} : vector<10x3xf32>, vector<10x3xf32>, vector<10x10xf32> -> vector<10x10xf32>
    %439 = arith.addf %438, %0 : vector<10x10xf32>
    %cst_187 = arith.constant dense<0xFF800000> : vector<10xf32>
    %440 = vector.multi_reduction <maximumf>, %439, %cst_187 [1] : vector<10x10xf32> to vector<10xf32>
    %441 = vector.shape_cast %440 : vector<10xf32> to vector<10x1xf32>
    %442 = vector.broadcast %441 : vector<10x1xf32> to vector<10x10xf32>
    %443 = arith.subf %439, %442 : vector<10x10xf32>
    %444 = math.exp %443 : vector<10x10xf32>
    %cst_188 = arith.constant dense<0.000000e+00> : vector<10xf32>
    %445 = vector.multi_reduction <add>, %444, %cst_188 [1] : vector<10x10xf32> to vector<10xf32>
    %446 = vector.shape_cast %445 : vector<10xf32> to vector<10x1xf32>
    %447 = tpu.reciprocal %446 {approx = true} : vector<10x1xf32> -> vector<10x1xf32>
    %448 = vector.broadcast %447 : vector<10x1xf32> to vector<10x10xf32>
    %449 = arith.mulf %444, %448 : vector<10x10xf32>
    %cst_189 = arith.constant dense<0.000000e+00> : vector<10x3xf32>
    %450 = tpu.matmul %449, %437, %cst_189 {dimension_numbers = #tpu.dot_dimension_numbers<[1], [0], [0], [1], [0, 0, 1, 1], [], []>} : vector<10x10xf32>, vector<10x3xf32>, vector<10x3xf32> -> vector<10x3xf32>
    %c1104 = arith.constant 1104 : index
    %c0_190 = arith.constant 0 : index
    %451 = vector.load %arg2[%c1104, %c0_190] : memref<1376x128xf32, #tpu.memory_space<vmem>>, vector<3x9xf32>
    %cst_191 = arith.constant dense<0.000000e+00> : vector<10x9xf32>
    %452 = tpu.matmul %450, %451, %cst_191 {dimension_numbers = #tpu.dot_dimension_numbers<[1], [0], [0], [1], [0, 0, 1, 1], [], []>} : vector<10x3xf32>, vector<3x9xf32>, vector<10x9xf32> -> vector<10x9xf32>
    %453 = vector.broadcast %422 : vector<1x9xf32> to vector<10x9xf32>
    %454 = arith.addf %453, %452 : vector<10x9xf32>
    %c1112 = arith.constant 1112 : index
    %c0_192 = arith.constant 0 : index
    %455 = vector.load %arg2[%c1112, %c0_192] : memref<1376x128xf32, #tpu.memory_space<vmem>>, vector<9x3xf32>
    %cst_193 = arith.constant dense<0.000000e+00> : vector<10x3xf32>
    %456 = tpu.matmul %421, %455, %cst_193 {dimension_numbers = #tpu.dot_dimension_numbers<[1], [0], [0], [1], [0, 0, 1, 1], [], []>} : vector<10x9xf32>, vector<9x3xf32>, vector<10x3xf32> -> vector<10x3xf32>
    %c1128 = arith.constant 1128 : index
    %c0_194 = arith.constant 0 : index
    %457 = vector.load %arg2[%c1128, %c0_194] : memref<1376x128xf32, #tpu.memory_space<vmem>>, vector<1x3xf32>
    %458 = vector.broadcast %457 : vector<1x3xf32> to vector<10x3xf32>
    %459 = arith.addf %456, %458 : vector<10x3xf32>
    %c1136 = arith.constant 1136 : index
    %c0_195 = arith.constant 0 : index
    %460 = vector.load %arg2[%c1136, %c0_195] : memref<1376x128xf32, #tpu.memory_space<vmem>>, vector<9x3xf32>
    %cst_196 = arith.constant dense<0.000000e+00> : vector<10x3xf32>
    %461 = tpu.matmul %421, %460, %cst_196 {dimension_numbers = #tpu.dot_dimension_numbers<[1], [0], [0], [1], [0, 0, 1, 1], [], []>} : vector<10x9xf32>, vector<9x3xf32>, vector<10x3xf32> -> vector<10x3xf32>
    %c1152 = arith.constant 1152 : index
    %c0_197 = arith.constant 0 : index
    %462 = vector.load %arg2[%c1152, %c0_197] : memref<1376x128xf32, #tpu.memory_space<vmem>>, vector<1x3xf32>
    %463 = vector.broadcast %462 : vector<1x3xf32> to vector<10x3xf32>
    %464 = arith.addf %461, %463 : vector<10x3xf32>
    %c1160 = arith.constant 1160 : index
    %c0_198 = arith.constant 0 : index
    %465 = vector.load %arg2[%c1160, %c0_198] : memref<1376x128xf32, #tpu.memory_space<vmem>>, vector<9x3xf32>
    %cst_199 = arith.constant dense<0.000000e+00> : vector<10x3xf32>
    %466 = tpu.matmul %421, %465, %cst_199 {dimension_numbers = #tpu.dot_dimension_numbers<[1], [0], [0], [1], [0, 0, 1, 1], [], []>} : vector<10x9xf32>, vector<9x3xf32>, vector<10x3xf32> -> vector<10x3xf32>
    %c1176 = arith.constant 1176 : index
    %c0_200 = arith.constant 0 : index
    %467 = vector.load %arg2[%c1176, %c0_200] : memref<1376x128xf32, #tpu.memory_space<vmem>>, vector<1x3xf32>
    %468 = vector.broadcast %467 : vector<1x3xf32> to vector<10x3xf32>
    %469 = arith.addf %466, %468 : vector<10x3xf32>
    %cst_201 = arith.constant dense<0.000000e+00> : vector<10x10xf32>
    %470 = tpu.matmul %459, %464, %cst_201 {dimension_numbers = #tpu.dot_dimension_numbers<[1], [1], [0], [0], [0, 0, 1, 0], [], []>} : vector<10x3xf32>, vector<10x3xf32>, vector<10x10xf32> -> vector<10x10xf32>
    %471 = arith.addf %470, %0 : vector<10x10xf32>
    %cst_202 = arith.constant dense<0xFF800000> : vector<10xf32>
    %472 = vector.multi_reduction <maximumf>, %471, %cst_202 [1] : vector<10x10xf32> to vector<10xf32>
    %473 = vector.shape_cast %472 : vector<10xf32> to vector<10x1xf32>
    %474 = vector.broadcast %473 : vector<10x1xf32> to vector<10x10xf32>
    %475 = arith.subf %471, %474 : vector<10x10xf32>
    %476 = math.exp %475 : vector<10x10xf32>
    %cst_203 = arith.constant dense<0.000000e+00> : vector<10xf32>
    %477 = vector.multi_reduction <add>, %476, %cst_203 [1] : vector<10x10xf32> to vector<10xf32>
    %478 = vector.shape_cast %477 : vector<10xf32> to vector<10x1xf32>
    %479 = tpu.reciprocal %478 {approx = true} : vector<10x1xf32> -> vector<10x1xf32>
    %480 = vector.broadcast %479 : vector<10x1xf32> to vector<10x10xf32>
    %481 = arith.mulf %476, %480 : vector<10x10xf32>
    %cst_204 = arith.constant dense<0.000000e+00> : vector<10x3xf32>
    %482 = tpu.matmul %481, %469, %cst_204 {dimension_numbers = #tpu.dot_dimension_numbers<[1], [0], [0], [1], [0, 0, 1, 1], [], []>} : vector<10x10xf32>, vector<10x3xf32>, vector<10x3xf32> -> vector<10x3xf32>
    %c1184 = arith.constant 1184 : index
    %c0_205 = arith.constant 0 : index
    %483 = vector.load %arg2[%c1184, %c0_205] : memref<1376x128xf32, #tpu.memory_space<vmem>>, vector<3x9xf32>
    %cst_206 = arith.constant dense<0.000000e+00> : vector<10x9xf32>
    %484 = tpu.matmul %482, %483, %cst_206 {dimension_numbers = #tpu.dot_dimension_numbers<[1], [0], [0], [1], [0, 0, 1, 1], [], []>} : vector<10x3xf32>, vector<3x9xf32>, vector<10x9xf32> -> vector<10x9xf32>
    %485 = arith.addf %454, %484 : vector<10x9xf32>
    %c1192 = arith.constant 1192 : index
    %c0_207 = arith.constant 0 : index
    %486 = vector.load %arg2[%c1192, %c0_207] : memref<1376x128xf32, #tpu.memory_space<vmem>>, vector<9x3xf32>
    %cst_208 = arith.constant dense<0.000000e+00> : vector<10x3xf32>
    %487 = tpu.matmul %421, %486, %cst_208 {dimension_numbers = #tpu.dot_dimension_numbers<[1], [0], [0], [1], [0, 0, 1, 1], [], []>} : vector<10x9xf32>, vector<9x3xf32>, vector<10x3xf32> -> vector<10x3xf32>
    %c1208 = arith.constant 1208 : index
    %c0_209 = arith.constant 0 : index
    %488 = vector.load %arg2[%c1208, %c0_209] : memref<1376x128xf32, #tpu.memory_space<vmem>>, vector<1x3xf32>
    %489 = vector.broadcast %488 : vector<1x3xf32> to vector<10x3xf32>
    %490 = arith.addf %487, %489 : vector<10x3xf32>
    %c1216 = arith.constant 1216 : index
    %c0_210 = arith.constant 0 : index
    %491 = vector.load %arg2[%c1216, %c0_210] : memref<1376x128xf32, #tpu.memory_space<vmem>>, vector<9x3xf32>
    %cst_211 = arith.constant dense<0.000000e+00> : vector<10x3xf32>
    %492 = tpu.matmul %421, %491, %cst_211 {dimension_numbers = #tpu.dot_dimension_numbers<[1], [0], [0], [1], [0, 0, 1, 1], [], []>} : vector<10x9xf32>, vector<9x3xf32>, vector<10x3xf32> -> vector<10x3xf32>
    %c1232 = arith.constant 1232 : index
    %c0_212 = arith.constant 0 : index
    %493 = vector.load %arg2[%c1232, %c0_212] : memref<1376x128xf32, #tpu.memory_space<vmem>>, vector<1x3xf32>
    %494 = vector.broadcast %493 : vector<1x3xf32> to vector<10x3xf32>
    %495 = arith.addf %492, %494 : vector<10x3xf32>
    %c1240 = arith.constant 1240 : index
    %c0_213 = arith.constant 0 : index
    %496 = vector.load %arg2[%c1240, %c0_213] : memref<1376x128xf32, #tpu.memory_space<vmem>>, vector<9x3xf32>
    %cst_214 = arith.constant dense<0.000000e+00> : vector<10x3xf32>
    %497 = tpu.matmul %421, %496, %cst_214 {dimension_numbers = #tpu.dot_dimension_numbers<[1], [0], [0], [1], [0, 0, 1, 1], [], []>} : vector<10x9xf32>, vector<9x3xf32>, vector<10x3xf32> -> vector<10x3xf32>
    %c1256 = arith.constant 1256 : index
    %c0_215 = arith.constant 0 : index
    %498 = vector.load %arg2[%c1256, %c0_215] : memref<1376x128xf32, #tpu.memory_space<vmem>>, vector<1x3xf32>
    %499 = vector.broadcast %498 : vector<1x3xf32> to vector<10x3xf32>
    %500 = arith.addf %497, %499 : vector<10x3xf32>
    %cst_216 = arith.constant dense<0.000000e+00> : vector<10x10xf32>
    %501 = tpu.matmul %490, %495, %cst_216 {dimension_numbers = #tpu.dot_dimension_numbers<[1], [1], [0], [0], [0, 0, 1, 0], [], []>} : vector<10x3xf32>, vector<10x3xf32>, vector<10x10xf32> -> vector<10x10xf32>
    %502 = arith.addf %501, %0 : vector<10x10xf32>
    %cst_217 = arith.constant dense<0xFF800000> : vector<10xf32>
    %503 = vector.multi_reduction <maximumf>, %502, %cst_217 [1] : vector<10x10xf32> to vector<10xf32>
    %504 = vector.shape_cast %503 : vector<10xf32> to vector<10x1xf32>
    %505 = vector.broadcast %504 : vector<10x1xf32> to vector<10x10xf32>
    %506 = arith.subf %502, %505 : vector<10x10xf32>
    %507 = math.exp %506 : vector<10x10xf32>
    %cst_218 = arith.constant dense<0.000000e+00> : vector<10xf32>
    %508 = vector.multi_reduction <add>, %507, %cst_218 [1] : vector<10x10xf32> to vector<10xf32>
    %509 = vector.shape_cast %508 : vector<10xf32> to vector<10x1xf32>
    %510 = tpu.reciprocal %509 {approx = true} : vector<10x1xf32> -> vector<10x1xf32>
    %511 = vector.broadcast %510 : vector<10x1xf32> to vector<10x10xf32>
    %512 = arith.mulf %507, %511 : vector<10x10xf32>
    %cst_219 = arith.constant dense<0.000000e+00> : vector<10x3xf32>
    %513 = tpu.matmul %512, %500, %cst_219 {dimension_numbers = #tpu.dot_dimension_numbers<[1], [0], [0], [1], [0, 0, 1, 1], [], []>} : vector<10x10xf32>, vector<10x3xf32>, vector<10x3xf32> -> vector<10x3xf32>
    %c1264 = arith.constant 1264 : index
    %c0_220 = arith.constant 0 : index
    %514 = vector.load %arg2[%c1264, %c0_220] : memref<1376x128xf32, #tpu.memory_space<vmem>>, vector<3x9xf32>
    %cst_221 = arith.constant dense<0.000000e+00> : vector<10x9xf32>
    %515 = tpu.matmul %513, %514, %cst_221 {dimension_numbers = #tpu.dot_dimension_numbers<[1], [0], [0], [1], [0, 0, 1, 1], [], []>} : vector<10x3xf32>, vector<3x9xf32>, vector<10x9xf32> -> vector<10x9xf32>
    %516 = arith.addf %485, %515 : vector<10x9xf32>
    %517 = arith.addf %397, %516 : vector<10x9xf32>
    %c1016 = arith.constant 1016 : index
    %c0_222 = arith.constant 0 : index
    %518 = vector.load %arg2[%c1016, %c0_222] : memref<1376x128xf32, #tpu.memory_space<vmem>>, vector<1x9xf32>
    %c1024 = arith.constant 1024 : index
    %c0_223 = arith.constant 0 : index
    %519 = vector.load %arg2[%c1024, %c0_223] : memref<1376x128xf32, #tpu.memory_space<vmem>>, vector<1x9xf32>
    %cst_224 = arith.constant dense<0.000000e+00> : vector<10xf32>
    %520 = vector.multi_reduction <add>, %517, %cst_224 [1] : vector<10x9xf32> to vector<10xf32>
    %521 = vector.shape_cast %520 : vector<10xf32> to vector<10x1xf32>
    %cst_225 = arith.constant 9.000000e+00 : f32
    %522 = vector.broadcast %cst_225 : f32 to vector<10x1xf32>
    %523 = arith.divf %521, %522 : vector<10x1xf32>
    %524 = vector.broadcast %523 : vector<10x1xf32> to vector<10x9xf32>
    %525 = arith.subf %517, %524 : vector<10x9xf32>
    %526 = arith.mulf %525, %525 : vector<10x9xf32>
    %cst_226 = arith.constant dense<0.000000e+00> : vector<10xf32>
    %527 = vector.multi_reduction <add>, %526, %cst_226 [1] : vector<10x9xf32> to vector<10xf32>
    %528 = vector.shape_cast %527 : vector<10xf32> to vector<10x1xf32>
    %cst_227 = arith.constant 9.000000e+00 : f32
    %529 = vector.broadcast %cst_227 : f32 to vector<10x1xf32>
    %530 = arith.divf %528, %529 : vector<10x1xf32>
    %531 = vector.broadcast %523 : vector<10x1xf32> to vector<10x9xf32>
    %532 = arith.subf %517, %531 : vector<10x9xf32>
    %cst_228 = arith.constant 9.99999974E-6 : f32
    %533 = vector.broadcast %cst_228 : f32 to vector<10x1xf32>
    %534 = arith.addf %530, %533 : vector<10x1xf32>
    %535 = math.rsqrt %534 : vector<10x1xf32>
    %536 = vector.broadcast %535 : vector<10x1xf32> to vector<10x9xf32>
    %537 = arith.mulf %532, %536 : vector<10x9xf32>
    %538 = vector.broadcast %518 : vector<1x9xf32> to vector<10x9xf32>
    %539 = arith.mulf %537, %538 : vector<10x9xf32>
    %540 = vector.broadcast %519 : vector<1x9xf32> to vector<10x9xf32>
    %541 = arith.addf %539, %540 : vector<10x9xf32>
    %c1280 = arith.constant 1280 : index
    %c0_229 = arith.constant 0 : index
    %542 = vector.load %arg2[%c1280, %c0_229] : memref<1376x128xf32, #tpu.memory_space<vmem>>, vector<9x36xf32>
    %cst_230 = arith.constant dense<0.000000e+00> : vector<10x36xf32>
    %543 = tpu.matmul %541, %542, %cst_230 {dimension_numbers = #tpu.dot_dimension_numbers<[1], [0], [0], [1], [0, 0, 1, 1], [], []>} : vector<10x9xf32>, vector<9x36xf32>, vector<10x36xf32> -> vector<10x36xf32>
    %c1296 = arith.constant 1296 : index
    %c0_231 = arith.constant 0 : index
    %544 = vector.load %arg2[%c1296, %c0_231] : memref<1376x128xf32, #tpu.memory_space<vmem>>, vector<1x36xf32>
    %545 = vector.broadcast %544 : vector<1x36xf32> to vector<10x36xf32>
    %546 = arith.addf %543, %545 : vector<10x36xf32>
    %cst_232 = arith.constant 5.000000e-01 : f32
    %547 = vector.broadcast %cst_232 : f32 to vector<10x36xf32>
    %548 = arith.mulf %547, %546 : vector<10x36xf32>
    %cst_233 = arith.constant 0.707106769 : f32
    %549 = vector.broadcast %cst_233 : f32 to vector<10x36xf32>
    %550 = arith.mulf %546, %549 : vector<10x36xf32>
    %cst_234 = arith.constant 0.000000e+00 : f32
    %551 = vector.broadcast %cst_234 : f32 to vector<10x36xf32>
    %552 = arith.cmpf oge, %550, %551 : vector<10x36xf32>
    %cst_235 = arith.constant 1.000000e+00 : f32
    %cst_236 = arith.constant -1.000000e+00 : f32
    %553 = vector.broadcast %cst_235 : f32 to vector<10x36xf32>
    %554 = vector.broadcast %cst_236 : f32 to vector<10x36xf32>
    %555 = arith.select %552, %553, %554 : vector<10x36xi1>, vector<10x36xf32>
    %556 = math.absf %550 : vector<10x36xf32>
    %cst_237 = arith.constant 0.327591091 : f32
    %557 = vector.broadcast %cst_237 : f32 to vector<10x36xf32>
    %558 = arith.mulf %557, %556 : vector<10x36xf32>
    %cst_238 = arith.constant 1.000000e+00 : f32
    %559 = vector.broadcast %cst_238 : f32 to vector<10x36xf32>
    %560 = arith.addf %559, %558 : vector<10x36xf32>
    %cst_239 = arith.constant 1.000000e+00 : f32
    %561 = vector.broadcast %cst_239 : f32 to vector<10x36xf32>
    %562 = arith.divf %561, %560 : vector<10x36xf32>
    %cst_240 = arith.constant 1.06140542 : f32
    %563 = vector.broadcast %cst_240 : f32 to vector<10x36xf32>
    %564 = arith.mulf %563, %562 : vector<10x36xf32>
    %cst_241 = arith.constant -1.45315206 : f32
    %565 = vector.broadcast %cst_241 : f32 to vector<10x36xf32>
    %566 = arith.addf %564, %565 : vector<10x36xf32>
    %567 = arith.mulf %566, %562 : vector<10x36xf32>
    %cst_242 = arith.constant 1.42141378 : f32
    %568 = vector.broadcast %cst_242 : f32 to vector<10x36xf32>
    %569 = arith.addf %567, %568 : vector<10x36xf32>
    %570 = arith.mulf %569, %562 : vector<10x36xf32>
    %cst_243 = arith.constant -0.284496725 : f32
    %571 = vector.broadcast %cst_243 : f32 to vector<10x36xf32>
    %572 = arith.addf %570, %571 : vector<10x36xf32>
    %573 = arith.mulf %572, %562 : vector<10x36xf32>
    %cst_244 = arith.constant 0.254829586 : f32
    %574 = vector.broadcast %cst_244 : f32 to vector<10x36xf32>
    %575 = arith.addf %573, %574 : vector<10x36xf32>
    %576 = arith.mulf %575, %562 : vector<10x36xf32>
    %cst_245 = arith.constant 0.000000e+00 : f32
    %577 = vector.broadcast %cst_245 : f32 to vector<10x36xf32>
    %578 = arith.subf %577, %556 : vector<10x36xf32>
    %579 = arith.mulf %578, %556 : vector<10x36xf32>
    %580 = math.exp %579 : vector<10x36xf32>
    %581 = arith.mulf %576, %580 : vector<10x36xf32>
    %cst_246 = arith.constant 1.000000e+00 : f32
    %582 = vector.broadcast %cst_246 : f32 to vector<10x36xf32>
    %583 = arith.subf %582, %581 : vector<10x36xf32>
    %584 = arith.mulf %555, %583 : vector<10x36xf32>
    %cst_247 = arith.constant 1.000000e+00 : f32
    %585 = vector.broadcast %cst_247 : f32 to vector<10x36xf32>
    %586 = arith.addf %585, %584 : vector<10x36xf32>
    %587 = arith.mulf %548, %586 : vector<10x36xf32>
    %c1304 = arith.constant 1304 : index
    %c0_248 = arith.constant 0 : index
    %588 = vector.load %arg2[%c1304, %c0_248] : memref<1376x128xf32, #tpu.memory_space<vmem>>, vector<36x9xf32>
    %cst_249 = arith.constant dense<0.000000e+00> : vector<10x9xf32>
    %589 = tpu.matmul %587, %588, %cst_249 {dimension_numbers = #tpu.dot_dimension_numbers<[1], [0], [0], [1], [0, 0, 1, 1], [], []>} : vector<10x36xf32>, vector<36x9xf32>, vector<10x9xf32> -> vector<10x9xf32>
    %c1344 = arith.constant 1344 : index
    %c0_250 = arith.constant 0 : index
    %590 = vector.load %arg2[%c1344, %c0_250] : memref<1376x128xf32, #tpu.memory_space<vmem>>, vector<1x9xf32>
    %591 = vector.broadcast %590 : vector<1x9xf32> to vector<10x9xf32>
    %592 = arith.addf %589, %591 : vector<10x9xf32>
    %593 = arith.mulf %517, %592 : vector<10x9xf32>
    %c272 = arith.constant 272 : index
    %c0_251 = arith.constant 0 : index
    %594 = vector.load %arg2[%c272, %c0_251] : memref<1376x128xf32, #tpu.memory_space<vmem>>, vector<2x10xf32>
    %cst_252 = arith.constant dense<0.000000e+00> : vector<2x9xf32>
    %595 = tpu.matmul %594, %593, %cst_252 {dimension_numbers = #tpu.dot_dimension_numbers<[1], [0], [0], [1], [0, 0, 1, 1], [], []>} : vector<2x10xf32>, vector<10x9xf32>, vector<2x9xf32> -> vector<2x9xf32>
    %c1352 = arith.constant 1352 : index
    %c0_253 = arith.constant 0 : index
    %596 = vector.load %arg2[%c1352, %c0_253] : memref<1376x128xf32, #tpu.memory_space<vmem>>, vector<9x128xf32>
    %cst_254 = arith.constant dense<0.000000e+00> : vector<2x128xf32>
    %597 = tpu.matmul %595, %596, %cst_254 {dimension_numbers = #tpu.dot_dimension_numbers<[1], [0], [0], [1], [0, 0, 1, 1], [], []>} : vector<2x9xf32>, vector<9x128xf32>, vector<2x128xf32> -> vector<2x128xf32>
    %c1368 = arith.constant 1368 : index
    %c0_255 = arith.constant 0 : index
    %598 = vector.load %arg2[%c1368, %c0_255] : memref<1376x128xf32, #tpu.memory_space<vmem>>, vector<1x128xf32>
    %599 = vector.broadcast %598 : vector<1x128xf32> to vector<2x128xf32>
    %600 = arith.addf %597, %599 : vector<2x128xf32>
    %cst_256 = arith.constant dense<0xFF800000> : vector<2xf32>
    %601 = vector.multi_reduction <maximumf>, %600, %cst_256 [1] : vector<2x128xf32> to vector<2xf32>
    %602 = vector.shape_cast %601 : vector<2xf32> to vector<2x1xf32>
    %603 = vector.broadcast %602 : vector<2x1xf32> to vector<2x128xf32>
    %604 = arith.subf %600, %603 : vector<2x128xf32>
    %605 = math.exp %604 : vector<2x128xf32>
    %cst_257 = arith.constant dense<0.000000e+00> : vector<2xf32>
    %606 = vector.multi_reduction <add>, %605, %cst_257 [1] : vector<2x128xf32> to vector<2xf32>
    %607 = vector.shape_cast %606 : vector<2xf32> to vector<2x1xf32>
    %608 = tpu.reciprocal %607 {approx = true} : vector<2x1xf32> -> vector<2x1xf32>
    %609 = vector.broadcast %608 : vector<2x1xf32> to vector<2x128xf32>
    %610 = arith.mulf %605, %609 : vector<2x128xf32>
    %c0_258 = arith.constant 0 : index
    %c0_259 = arith.constant 0 : index
    %611 = vector.load %arg3[%c0_258, %c0_259] : memref<2x128xf32, #tpu.memory_space<vmem>>, vector<2x128xf32>
    tpu.vector_store %arg3[%c0_258, %c0_259], %610 {strides = array<i32>} : memref<2x128xf32, #tpu.memory_space<vmem>>, vector<2x128xf32>,
    return
  }
  func.func @transform_0(%arg0: i32) -> (i32, i32) {
    %c0_i32 = arith.constant 0 : i32
    %c0_i32_0 = arith.constant 0 : i32
    %c0_i32_1 = arith.constant 0 : i32
    return %c0_i32, %c0_i32_0 : i32, i32
  }
  func.func @transform_1(%arg0: i32) -> (i32, i32) {
    %c0_i32 = arith.constant 0 : i32
    %c0_i32_0 = arith.constant 0 : i32
    %c0_i32_1 = arith.constant 0 : i32
    return %c0_i32, %c0_i32_0 : i32, i32
  }
  func.func @transform_2(%arg0: i32) -> (i32, i32) {
    %c0_i32 = arith.constant 0 : i32
    %c0_i32_0 = arith.constant 0 : i32
    %c0_i32_1 = arith.constant 0 : i32
    return %c0_i32, %c0_i32_0 : i32, i32
  }
}

</mosaic_0001>

<bundles_post_ra>
// kernel: tpu_custom_call.1
= control target key start
LH: loop header
LB: loop body
LE: loop exit
PB: predicated region body
PF: predicated region fallthrough
CT: control target
= control target key end

     0   :  { %7 = vsyncpa [#allocation3], 0  ;;  %s8355_s0 = inlined_call_operand.hbm [shape: f32[10,256], index: 0, kind: input, shape index: {}]   ;;  %s8356_s1 = inlined_call_operand.hbm [shape: f32[1376,128], index: 1, kind: input, shape index: {}]   ;;  %s8357_s2 = inlined_call_operand.hbm [shape: f32[2,128], index: 2, kind: output, shape index: {}]  }
   0x1   :  { %8 = vsyncpa [#allocation6], 0 }
   0x2   :  { %9 = vsyncpa [#allocation4], 0  ;;  %s7711_s9 = smov [#allocation2]   ;;  %s7639_s13 = scalar_lea.hbm %s8355_s0, 512 }
   0x3   :  { %s15_s10 = sshll.u32 %s7711_s9, 4  ;;  %p7640_p0 = scmp.ne.s32.totalorder %s8355_s0, %s7639_s13  ;;  %s16_s10 = int_to_ptr.vmem [resolvable:$true] %s15_s10 }
   0x4   :  { %p7643_p1 = scmp.lt.u32.totalorder %s7639_s13, %s8355_s0 }
   0x6   :  { %p7645_p2 = pnand %p7643_p1, %p7640_p0 }
   0x8   :  { %7648 = shalt.err (!%p7645_p2)
}
   0x9   :  { %s7649_s18 = scalar_lea.vmem %s16_s10, 512  ;;  %p7654_p4 = scmp.lt.s32.totalorder %s16_s10, %s16_s10 }
   0xa   :  { %p7650_p3 = scmp.ne.s32.totalorder %s16_s10, %s7649_s18  ;;  %p7655_p5 = scmp.lt.s32.totalorder %s7649_s18, %s7649_s18 }
   0xc   :  { %p7656_p6 = por %p7655_p5, %p7654_p4 }
   0xe   :  { %p7657_p7 = pnand %p7656_p6, %p7650_p3 }
  0x10   :  { %7660 = shalt.err (!%p7657_p7)
}
  0x11   :  { %s7712_s19 = smov 256   ;;  %s7713_s20 = smov 16  }
  0x12   :  { %21 = dma.hbm_to_vmem [thread:$0]  %s8355_s0, 512, %s16_s10, [#allocation3], %s7712_s19, %s7712_s19, %s7713_s20  }
  0x13   :  { %s7714_s23 = smov [#allocation5]   ;;  %s7661_s27 = scalar_lea.hbm %s8356_s1, 22016 }
  0x14   :  { %s27_s24 = sshll.u32 %s7714_s23, 4  ;;  %p7662_p8 = scmp.ne.s32.totalorder %s8356_s1, %s7661_s27  ;;  %s28_s24 = int_to_ptr.vmem [resolvable:$true] %s27_s24 }
  0x15   :  { %p7665_p9 = scmp.lt.u32.totalorder %s7661_s27, %s8356_s1 }
  0x17   :  { %p7667_p10 = pnand %p7665_p9, %p7662_p8 }
  0x19   :  { %7670 = shalt.err (!%p7667_p10)
}
  0x1a   :  { %s7671_s4 = scalar_lea.vmem %s28_s24, 22016  ;;  %p7676_p12 = scmp.lt.s32.totalorder %s28_s24, %s28_s24 }
  0x1b   :  { %p7672_p11 = scmp.ne.s32.totalorder %s28_s24, %s7671_s4  ;;  %p7677_p13 = scmp.lt.s32.totalorder %s7671_s4, %s7671_s4 }
  0x1d   :  { %p7678_p0 = por %p7677_p13, %p7676_p12 }
  0x1f   :  { %p7679_p1 = pnand %p7678_p0, %p7672_p11 }
  0x21   :  { %7682 = shalt.err (!%p7679_p1)
}
  0x22   :  { %s7715_s0 = smov 128   ;;  %s7716_s5 = smov 8  }
  0x23   :  { %33 = dma.hbm_to_vmem [thread:$0]  %s8356_s1, 22016, %s28_s24, [#allocation6], %s7715_s0, %s7715_s0, %s7716_s5  }
  0x24   :  { %7705 = dma.done.wait [#allocation3], 512  }
  0x25   :  { %7706 = vsyncadd [#allocation3], 4294966784 }
  0x26   :  { %7707 = dma.done.wait [#allocation6], 22016  }
  0x27   :  { %7708 = vsyncadd [#allocation6], 4294945280  ;;  %v62_v0 = vld [vmem:[#allocation5 + $0x80] sm:$0xff]  ;;  %v63_v1 = vld [vmem:[#allocation5 + $0x88] sm:$0xff]  ;;  %vm157_vm0 = vcmask 72704   ;;  %vm161_vm1 = vcmask 66560  }
  0x28   :  { %v46_v2 = vld [vmem:[#allocation5] sm:$0xff]  ;;  %v7131_v3 = vpack.c.bf16 %v63_v1, %v62_v0  ;;  %v47_v4 = vld [vmem:[#allocation5 + $0x8] sm:$0xff]  ;;  %v64_v5 = vld [vmem:[#allocation5 + $0x90] sm:$0xff]  ;;  %vm212_vm2 = vcmask 1040384   ;;  %vm7717_vm3 = vmmov 1   ;;  %vm579_vm5 = vcmask 1041408  }
  0x29   :  { %v65_v6 = vld [vmem:[#allocation5 + $0x98] sm:$0xff]  ;;  %v7133_v7 = vpack.c.bf16 %v47_v4, %v46_v2  ;;  %v48_v9 = vld [vmem:[#allocation5 + $0x10] sm:$0xff]  ;;  %v66_v11 = vld [vmem:[#allocation5 + $0xa0] sm:$0xff]  ;;  %vm461_vm6 = vcmask 23552   ;;  %vm553_vm9 = vcmask 74752   ;;  %vm549_vm10 = vcmask 80896  }
  0x2a   :  { %v7135_v8 = vpack.c.bf16 %v65_v6, %v64_v5  ;;  %v49_v10 = vld [vmem:[#allocation5 + $0x18] sm:$0xff]  ;;  %7132 = vmatprep.subr.bf16.mxu0 %v7131_v3  ;;  %v67_v12 = vld [vmem:[#allocation5 + $0xa8] sm:$0xff]  ;;  %v50_v15 = vld [vmem:[#allocation5 + $0x20] sm:$0xff]  ;;  %vm665_vm11 = vcmask 1042432   ;;  %vm2024_vm12 = vcmask 1043456   ;;  %vm2017_vm15 = vcmask 293888  }
  0x2b   :  { %7134 = vmatpush3.bf16.msra.mxu0 %v7133_v7  ;;  %v7137_v13 = vpack.c.bf16 %v49_v10, %v48_v9  ;;  %v7139_v14 = vpack.c.bf16 %v67_v12, %v66_v11  ;;  %v51_v16 = vld [vmem:[#allocation5 + $0x28] sm:$0xff]  ;;  %v68_v17 = vld [vmem:[#allocation5 + $0xb0] sm:$0xff]  ;;  %v69_v18 = vld [vmem:[#allocation5 + $0xb8] sm:$0xff]  ;;  %s7722_s1 = smov [#allocation7]  }
  0x2c   :  { %7136 = vmatprep.subr.bf16.mxu0 %v7135_v8  ;;  %v7141_v19 = vpack.c.bf16 %v51_v16, %v50_v15  ;;  %v7143_v20 = vpack.c.bf16 %v69_v18, %v68_v17  ;;  %v52_v21 = vld [vmem:[#allocation5 + $0x30] sm:$0xff]  ;;  %v53_v22 = vld [vmem:[#allocation5 + $0x38] sm:$0xff]  ;;  %v70_v23 = vld [vmem:[#allocation5 + $0xc0] sm:$0xff]  ;;  %s6161_s8 = sshll.u32 %s7722_s1, 4  ;;  %s6162_s8 = int_to_ptr.vmem [resolvable:$true] %s6161_s8 }
  0x2d   :  { %v71_v24 = vld [vmem:[#allocation5 + $0xc8] sm:$0xff]  ;;  %v7145_v26 = vpack.c.bf16 %v53_v22, %v52_v21  ;;  %v54_v28 = vld [vmem:[#allocation5 + $0x40] sm:$0xff]  ;;  %v72_v30 = vld [vmem:[#allocation5 + $0xd0] sm:$0xff]  ;;  %s7683_s9 = scalar_lea.vmem %s6162_s8, 32  ;;  %p7688_p3 = scmp.lt.s32.totalorder %s6162_s8, %s6162_s8 }
  0x2e   :  { %v43_v25 = vld [vmem:[#allocation2 + $0x8] sm:$0xff]  ;;  %v7147_v27 = vpack.c.bf16 %v71_v24, %v70_v23  ;;  %v73_v31 = vld [vmem:[#allocation5 + $0xd8] sm:$0xff]  ;;  %v56_v34 = vld [vmem:[#allocation5 + $0x50] sm:$0xff]  ;;  %p7684_p2 = scmp.ne.s32.totalorder %s6162_s8, %s7683_s9  ;;  %p7689_p4 = scmp.lt.s32.totalorder %s7683_s9, %s7683_s9 }
  0x2f   :  { %7138 = vmatpush3.bf16.msra.mxu0 %v7137_v13  ;;  %144 = vmatprep.mubr.f32.mxu0 %v43_v25  ;;  %v55_v29 = vld [vmem:[#allocation5 + $0x48] sm:$0xff]  ;;  %v7151_v33 = vpack.c.bf16 %v73_v31, %v72_v30  ;;  %v57_v35 = vld [vmem:[#allocation5 + $0x58] sm:$0xff]  ;;  %v74_v36 = vld [vmem:[#allocation5 + $0xe0] sm:$0xff] }
  0x30   :  { %7140 = vmatprep.subr.bf16.mxu0 %v7139_v14  ;;  %v7149_v32 = vpack.c.bf16 %v55_v29, %v54_v28  ;;  %v75_v37 = vld [vmem:[#allocation5 + $0xe8] sm:$0xff]  ;;  %v7153_v38 = vpack.c.bf16 %v57_v35, %v56_v34  ;;  %v58_v40 = vld [vmem:[#allocation5 + $0x60] sm:$0xff]  ;;  %v76_v42 = vld [vmem:[#allocation5 + $0xf0] sm:$0xff]  ;;  %p7690_p5 = por %p7689_p4, %p7688_p3 }
  0x31   :  { %v7155_v39 = vpack.c.bf16 %v75_v37, %v74_v36  ;;  %v59_v41 = vld [vmem:[#allocation5 + $0x68] sm:$0xff]  ;;  %v77_v43 = vld [vmem:[#allocation5 + $0xf8] sm:$0xff]  ;;  %v60_v46 = vld [vmem:[#allocation5 + $0x70] sm:$0xff] }
  0x32   :  { %v7157_v44 = vpack.c.bf16 %v59_v41, %v58_v40  ;;  %v7159_v45 = vpack.c.bf16 %v77_v43, %v76_v42  ;;  %v61_v47 = vld [vmem:[#allocation5 + $0x78] sm:$0xff]  ;;  %v42_v49 = vld [vmem:[#allocation2] sm:$0xff]  ;;  %v44_v51 = vld [vmem:[#allocation2 + $0x10] sm:$0x3]  ;;  %p7691_p6 = pnand %p7690_p5, %p7684_p2 }
  0x33   :  { %7142 = vmatpush3.bf16.msra.mxu0 %v7141_v19  ;;  %v7161_v48 = vpack.c.bf16 %v61_v47, %v60_v46  ;;  %v45_v50 = vld [vmem:[#allocation2 + $0x18] sm:$0x3]  ;;  %v78_v53 = vld [vmem:[#allocation5 + $0x100] sm:$0xff]  ;;  %v79_v58 = vld [vmem:[#allocation5 + $0x108] sm:$0x3] }
  0x34   :  { %7144 = vmatprep.subr.bf16.mxu0 %v7143_v20  ;;  %v199_v10 = vld [vmem:[#allocation5 + $0x148] sm:$0xff]  ;;  %v200_v11 = vld [vmem:[#allocation5 + $0x150] sm:$0x1]  ;;  %vm7775_vm4 = vmpackc.low %vm212_vm2, %vm7717_vm3 }
  0x35   :  { %v920_v12 = vld [vmem:[#allocation5 + $0x1c8] sm:$0xff]  ;;  %v7163_v13 = vpack.c.bf16 %v200_v11, %v199_v10  ;;  %v921_v14 = vld [vmem:[#allocation5 + $0x1d0] sm:$0x1]  ;;  %v291_v17 = vld [vmem:[#allocation5 + $0x160] sm:$0xff] }
  0x36   :  { %v7205_v16 = vpack.c.bf16 %v921_v14, %v920_v12  ;;  %v292_v18 = vld [vmem:[#allocation5 + $0x168] sm:$0x1]  ;;  %v6172_v29 = vld [vmem:[#allocation5 + $0x130] ss:$0 sm:$0xff]  ;;  %v376_v34 = vld [vmem:[#allocation5 + $0x178] sm:$0xff] }
  0x37   :  { %7146 = vmatpush3.bf16.msra.mxu0 %v7145_v26  ;;  %7165 = vmatprep.subr.msk.bf16.mxu1 %vm7775_vm4, %v7163_v13  ;;  %v7169_v19 = vpack.c.bf16 %v292_v18, %v291_v17  ;;  %v377_v35 = vld [vmem:[#allocation5 + $0x180] sm:$0x1]  ;;  %v6173_v40 = vld [vmem:[#allocation5 + $0x158] ss:$0 sm:$0xff]  ;;  %vm7817_vm7 = vmpackc.low %vm579_vm5, %vm7717_vm3 }
  0x38   :  { %7148 = vmatprep.subr.bf16.mxu0 %v7147_v27  ;;  %7168 = vmatpush3.bf16.msk.msra.mxu1 %vm7775_vm4, %v7163_v13  ;;  %v6171_v27 = vld [vmem:[#allocation5 + $0x128] ss:$0 sm:$0xff]  ;;  %vm7828_vm8 = vmpackc.low %vm461_vm6, %vm461_vm6 }
  0x39   :  { %7171 = vmatprep.subr.msk.bf16.mxu1 %vm7775_vm4, %v7169_v19 }
  0x3b   :  { %7150 = vmatpush3.bf16.msra.mxu0 %v7149_v32 }
  0x3c   :  { %7152 = vmatprep.subr.bf16.mxu0 %v7151_v33 }
  0x3f   :  { %7154 = vmatpush3.bf16.msra.mxu0 %v7153_v38  ;;  %v7175_v38 = vpack.c.bf16 %v377_v35, %v376_v34 }
  0x40   :  { %7156 = vmatprep.subr.bf16.mxu0 %v7155_v39  ;;  %v6204_v39 = vld [vmem:[#allocation5 + $0x1d8] ss:$0 sm:$0xff] }
  0x43   :  { %7158 = vmatpush3.bf16.msra.mxu0 %v7157_v44 }
  0x44   :  { %7160 = vmatprep.subr.bf16.mxu0 %v7159_v45 }
  0x47   :  { %7162 = vmatpush3.bf16.msra.mxu0 %v7161_v48  ;;  %v6177_v48 = vld [vmem:[#allocation5 + $0x170] ss:$0 sm:$0xff] }
  0x48   :  { %7207 = vmatprep.subr.msk.bf16.mxu0 %vm7775_vm4, %v7205_v16 }
  0x4a   :  { %145 = vmatmul.mubr.f32.vlgmr.msra.gmra.mrb[0].mxu0 %v42_v49 }
  0x4b   :  { %149 = vmatprep.mubr.f32.mxu0 %v45_v50  ;;  %7210 = vmatpush3.bf16.msk.msra.mxu0 %vm7775_vm4, %v7205_v16 }
  0x4e   :  { %150 = vmatmul.mubr.f32.gmra.mrb[2].mxu0 %v44_v51 }
 0x11d   :  { %v6445_v52 = vpop.f32.mrb[0].mxu0 }
 0x11e   :  { %v6446_v54 = vpop.f32.mrb[1].mxu0 }
 0x11f   :  { %v6447_v55 = vadd.f32 %v6446_v54, %v6445_v52 }
 0x121   :  { %v7762_v56 = vadd.f32 %v6447_v55, %v78_v53  ;;  %v6448_v57 = vpop.f32.mrb[2].mxu0  ;;  %v6181_v55 = vld [vmem:[#allocation5 + $0x188] ss:$0 sm:$0xff] }
 0x122   :  { %v6449_v59 = vpop.f32.mrb[3].mxu0 }
 0x123   :  { %v6450_v60 = vadd.f32 %v6449_v59, %v6448_v57  ;;  %v158_v61 = vsel %vm157_vm0, %v7762_v56, 0.0 }
 0x124   :  { %159 = vadd.xlane.f32.xlu0 %v158_v61 }
 0x125   :  { %v7766_v62 = vadd.f32 %v6450_v60, %v79_v58 }
 0x127   :  { %v162_v63 = vsel %vm161_vm1, %v7766_v62, 0.0 }
 0x128   :  { %163 = vadd.xlane.f32.xlu0 %v162_v63 }
 0x1b1   :  { %v160_v0 = vpop.xlane.xlu0 %159 }
 0x1b2   :  { %v166_v1 = vmul.f32 0.11111111, %v160_v0 }
 0x1b4   :  { %v168_v2 = vsub.f32 %v7762_v56, %v166_v1 }
 0x1b5   :  { %v164_v3 = vpop.xlane.xlu0 %163 }
 0x1b6   :  { %v167_v4 = vmul.f32 0.11111111, %v164_v3  ;;  %v170_v5 = vmul.f32 %v168_v2, %v168_v2  ;;  %v7843_v3 = vld [vmem:[#allocation5 + $0x118] sm:$0xff] }
 0x1b8   :  { %v169_v6 = vsub.f32 %v7766_v62, %v167_v4  ;;  %v172_v7 = vsel %vm157_vm0, %v170_v5, 0.0 }
 0x1b9   :  { %173 = vadd.xlane.f32.xlu1 %v172_v7 }
 0x1ba   :  { %v171_v8 = vmul.f32 %v169_v6, %v169_v6 }
 0x1bc   :  { %v175_v9 = vsel %vm161_vm1, %v171_v8, 0.0 }
 0x1bd   :  { %176 = vadd.xlane.f32.xlu1 %v175_v9 }
 0x246   :  { %v174_v20 = vpop.xlane.xlu1 %173 }
 0x247   :  { %v178_v21 = vmul.f32 0.11111111, %v174_v20 }
 0x249   :  { %v180_v22 = vadd.f32 1e-05, %v178_v21  ;;  %v658_v21 = vld [vmem:[#allocation5 + $0x190] sm:$0x7] }
 0x24a   :  { %v177_v23 = vpop.xlane.xlu1 %176 }
 0x24b   :  { %7513 = vrsqrt.f32 %v180_v22  ;;  %v179_v24 = vmul.f32 0.11111111, %v177_v23 }
 0x24d   :  { %v181_v25 = vadd.f32 1e-05, %v179_v24 }
 0x24f   :  { %7515 = vrsqrt.f32 %v181_v25 }
 0x255   :  { %v7514_v26 = vpop.eup %7513 }
 0x256   :  { %v184_v28 = vmul.f32 %v7514_v26, %v168_v2  ;;  %v7841_v2 = vld [vmem:[#allocation5 + $0x120] sm:$0x3] }
 0x258   :  { %v190_v30 = vmul.f32 %v6171_v27, %v184_v28  ;;  %v750_v28 = vld [vmem:[#allocation5 + $0x198] sm:$0xff] }
 0x259   :  { %v7516_v31 = vpop.eup %7515 }
 0x25a   :  { %v7789_v32 = vadd.f32 %v6172_v29, %v190_v30  ;;  %v185_v33 = vmul.f32 %v7516_v31, %v169_v6  ;;  %v835_v31 = vld [vmem:[#allocation5 + $0x1b0] sm:$0xff] }
 0x25c   :  { %v191_v36 = vmul.f32 %v6171_v27, %v185_v33  ;;  %6701 = vmatprep.mubr.msk.f32.mxu1 %vm157_vm0, %v7789_v32  ;;  %6755 = vmatprep.mubr.msk.f32.mxu0 %vm157_vm0, %v7789_v32  ;;  %v836_v33 = vld [vmem:[#allocation5 + $0x1b8] sm:$0x1] }
 0x25e   :  { %v7795_v37 = vadd.f32 %v6172_v29, %v191_v36  ;;  %v751_v29 = vld [vmem:[#allocation5 + $0x1a0] sm:$0x1]  ;;  %v7199_v36 = vpack.c.bf16 %v836_v33, %v835_v31 }
 0x25f   :  { %v7193_v30 = vpack.c.bf16 %v751_v29, %v750_v28 }
 0x260   :  { %6702 = vmatmul.mubr.msk.f32.vlgmr.msra.gmra.mrb[0].mxu1 %vm157_vm0, %v7795_v37  ;;  %6756 = vmatmul.mubr.msk.f32.vlgmr.msra.gmra.mrb[4].mxu0 %vm157_vm0, %v7795_v37 }
 0x261   :  { %7174 = vmatpush3.bf16.msk.msra.mxu1 %vm7775_vm4, %v7169_v19  ;;  %6708 = vmatprep.mubr.msk.f32.mxu1 %vm157_vm0, %v7789_v32 }
 0x262   :  { %7177 = vmatprep.subr.msk.bf16.mxu1 %vm7775_vm4, %v7175_v38 }
 0x264   :  { %6709 = vmatmul.mubr.msk.f32.vlgmr.msra.gmra.mrb[2].mxu1 %vm157_vm0, %v7795_v37 }
 0x265   :  { %7180 = vmatpush3.bf16.msk.msra.mxu1 %vm7775_vm4, %v7175_v38  ;;  %6715 = vmatprep.mubr.msk.f32.mxu1 %vm157_vm0, %v7789_v32  ;;  %v6196_v38 = vld [vmem:[#allocation5 + $0x1a8] ss:$0 sm:$0xff] }
 0x268   :  { %6716 = vmatmul.mubr.msk.f32.vlgmr.msra.gmra.mrb[4].mxu1 %vm157_vm0, %v7795_v37 }
 0x333   :  { %v6703_v41 = vpop.f32.mrb[0].mxu1  ;;  %v6757_v42 = vpop.f32.mrb[4].mxu0 }
 0x334   :  { %v1002_v43 = vadd.f32 %v6757_v42, %v6204_v39  ;;  %v282_v44 = vpop.f32.mrb[1].mxu1  ;;  %v996_v45 = vpop.f32.mrb[5].mxu0  ;;  %v288_v1 = vadd.f32 %v6703_v41, %v6173_v40  ;;  %v6200_v42 = vld [vmem:[#allocation5 + $0x1c0] ss:$0 sm:$0xff] }
 0x335   :  { %v283_v46 = vadd.f32 %v6173_v40, %v282_v44  ;;  %v997_v47 = vadd.f32 %v6204_v39, %v996_v45 }
 0x337   :  { %v7217_v50 = vpack.c.bf16 %v1002_v43, %v997_v47  ;;  %v6710_v51 = vpop.f32.mrb[2].mxu1  ;;  %6722 = vmatprep.mubr.msk.f32.mxu1 %vm461_vm6, %v283_v46 }
 0x338   :  { %v373_v52 = vadd.f32 %v6710_v51, %v6177_v48  ;;  %v367_v53 = vpop.f32.mrb[3].mxu1 }
 0x339   :  { %v368_v54 = vadd.f32 %v6177_v48, %v367_v53  ;;  %7219 = vmatprep.subr.msk.bf16.mxu0 %vm7817_vm7, %v7217_v50 }
 0x33a   :  { %7222 = vmatpush3.bf16.msk.msra.mxu0 %vm7817_vm7, %v7217_v50 }
 0x33b   :  { %v7181_v58 = vpack.c.bf16 %v373_v52, %v368_v54  ;;  %v6717_v59 = vpop.f32.mrb[4].mxu1 }
 0x33c   :  { %v458_v60 = vadd.f32 %v6717_v59, %v6181_v55  ;;  %v452_v61 = vpop.f32.mrb[5].mxu1 }
 0x33d   :  { %v453_v63 = vadd.f32 %v6181_v55, %v452_v61  ;;  %7183 = vmatprep.subr.msk.bf16.mxu1 %vm7828_vm8, %v7181_v58 }
 0x33e   :  { %7186 = vmatpush3.bf16.xpose.msk.msra.mxu1 %vm7828_vm8, %v7181_v58 }
 0x33f   :  { %v7187_v0 = vpack.c.bf16 %v458_v60, %v453_v63 }
 0x341   :  { %7189 = vmatprep.subr.msk.bf16.mxu1 %vm7817_vm7, %v7187_v0 }
 0x345   :  { %6723 = vmatmul.mubr.msk.f32.vlgmr.msra.gmra.mrb[6].mxu1 %vm461_vm6, %v288_v1 }
 0x346   :  { %7192 = vmatpush3.bf16.msk.msra.mxu1 %vm7817_vm7, %v7187_v0 }
 0x347   :  { %6732 = vmatprep.subr.msk.mxu1 %vm665_vm11, %v658_v21 }
 0x418   :  { %v6724_v4 = vpop.f32.mrb[6].mxu1 }
 0x419   :  { %v546_v5 = vadd.f32 %v6724_v4, %v7841_v2  ;;  %v540_v6 = vpop.f32.mrb[7].mxu1 }
 0x41a   :  { %v541_v7 = vadd.f32 %v540_v6, %v7843_v3 }
 0x41b   :  { %v554_v8 = vsel %vm553_vm9, %v546_v5, -inf }
 0x41c   :  { %555 = vmax.xlane.f32.xlu1 %v554_v8  ;;  %v550_v9 = vsel %vm549_vm10, %v541_v7, -inf  ;;  %v1286_v8 = vld [vmem:[#allocation5 + $0x1f0] sm:$0x1] }
 0x41d   :  { %551 = vmax.xlane.f32.xlu0 %v550_v9 }
 0x4a9   :  { %v556_v10 = vpop.xlane.xlu1 %555 }
 0x4aa   :  { %v558_v11 = vsub.f32 %v546_v5, %v556_v10  ;;  %v552_v12 = vpop.xlane.xlu0 %551 }
 0x4ab   :  { %v557_v13 = vsub.f32 %v541_v7, %v552_v12  ;;  %v1285_v7 = vld [vmem:[#allocation5 + $0x1e8] sm:$0xff] }
 0x4ac   :  { %v561_v14 = vmul.f32 1.442695, %v558_v11  ;;  %v7223_v9 = vpack.c.bf16 %v1286_v8, %v1285_v7 }
 0x4ad   :  { %v559_v16 = vmul.f32 1.442695, %v557_v13  ;;  %v1370_v13 = vld [vmem:[#allocation5 + $0x200] sm:$0xff] }
 0x4ae   :  { %7517 = vpow2.f32 %v561_v14  ;;  %7225 = vmatprep.subr.msk.bf16.mxu0 %vm7775_vm4, %v7223_v9  ;;  %v1371_v14 = vld [vmem:[#allocation5 + $0x208] sm:$0x1] }
 0x4af   :  { %7519 = vpow2.f32 %v559_v16 }
 0x4b8   :  { %v7518_v17 = vpop.eup %7517 }
 0x4b9   :  { %v7520_v18 = vpop.eup %7519  ;;  %v566_v19 = vsel %vm553_vm9, %v7518_v17, 0.0 }
 0x4ba   :  { %567 = vadd.xlane.f32.xlu1 %v566_v19  ;;  %v563_v20 = vsel %vm549_vm10, %v7520_v18, 0.0  ;;  %v7229_v19 = vpack.c.bf16 %v1371_v14, %v1370_v13 }
 0x4bb   :  { %564 = vadd.xlane.f32.xlu0 %v563_v20  ;;  %v1198_v20 = vld [vmem:[#allocation5 + $0x1e0] sm:$0x7] }
 0x547   :  { %v568_v22 = vpop.xlane.xlu1 %567 }
 0x548   :  { %7521 = vrcp.f32 %v568_v22  ;;  %v565_v23 = vpop.xlane.xlu0 %564  ;;  %v1456_v22 = vld [vmem:[#allocation5 + $0x220] sm:$0x1] }
 0x549   :  { %7523 = vrcp.f32 %v565_v23 }
 0x552   :  { %v7522_v24 = vpop.eup %7521 }
 0x553   :  { %v7524_v25 = vpop.eup %7523  ;;  %v572_v27 = vmul.f32 %v7522_v24, %v7518_v17 }
 0x554   :  { %v571_v26 = vmul.f32 %v7524_v25, %v7520_v18 }
 0x556   :  { %6729 = vmatprep.mubr.msk.f32.mxu1 %vm549_vm10, %v571_v26  ;;  %v6218_v26 = vld [vmem:[#allocation5 + $0x1f8] ss:$0 sm:$0xff] }
 0x557   :  { %6730 = vmatmul.mubr.msk.f32.vlgmr.msra.gmra.mrb[8].mxu1 %vm549_vm10, %v572_v27 }
 0x558   :  { %6733 = vmatpush3.msk.msra.mxu1 %vm665_vm11, %v658_v21  ;;  %v1455_v21 = vld [vmem:[#allocation5 + $0x218] sm:$0xff] }
 0x559   :  { %7195 = vmatprep.subr.msk.bf16.mxu1 %vm7775_vm4, %v7193_v30  ;;  %v7235_v23 = vpack.c.bf16 %v1456_v22, %v1455_v21 }
 0x62a   :  { %v6731_v34 = vpop.f32.mrb[8].mxu1 }
 0x62b   :  { %v649_v35 = vpop.f32.mrb[9].mxu1 }
 0x62c   :  { %6734 = vmatprep.mubr.msk.f32.mxu1 %vm461_vm6, %v649_v35 }
 0x62d   :  { %6735 = vmatmul.mubr.msk.f32.vlgmr.msra.gmra.mrb[10].mxu1 %vm461_vm6, %v6731_v34 }
 0x62e   :  { %7198 = vmatpush3.bf16.msk.msra.mxu1 %vm7775_vm4, %v7193_v30  ;;  %6741 = vmatprep.mubr.msk.f32.mxu1 %vm157_vm0, %v7789_v32  ;;  %v6222_v30 = vld [vmem:[#allocation5 + $0x210] ss:$0 sm:$0xff] }
 0x62f   :  { %7201 = vmatprep.subr.msk.bf16.mxu1 %vm7775_vm4, %v7199_v36 }
 0x631   :  { %6742 = vmatmul.mubr.msk.f32.vlgmr.msra.gmra.mrb[12].mxu1 %vm157_vm0, %v7795_v37 }
 0x632   :  { %7204 = vmatpush3.bf16.msk.msra.mxu1 %vm7775_vm4, %v7199_v36  ;;  %6748 = vmatprep.mubr.msk.f32.mxu1 %vm157_vm0, %v7789_v32 }
 0x635   :  { %6749 = vmatmul.mubr.msk.f32.vlgmr.msra.gmra.mrb[14].mxu1 %vm157_vm0, %v7795_v37 }
 0x704   :  { %v6743_v39 = vpop.f32.mrb[12].mxu1 }
 0x705   :  { %v826_v40 = vpop.f32.mrb[13].mxu1  ;;  %v832_v48 = vadd.f32 %v6743_v39, %v6196_v38 }
 0x706   :  { %v827_v41 = vadd.f32 %v6196_v38, %v826_v40  ;;  %v6226_v38 = vld [vmem:[#allocation5 + $0x228] ss:$0 sm:$0xff] }
 0x708   :  { %v6750_v43 = vpop.f32.mrb[14].mxu1  ;;  %6762 = vmatprep.mubr.msk.f32.mxu1 %vm461_vm6, %v827_v41 }
 0x709   :  { %v917_v44 = vadd.f32 %v6750_v43, %v6200_v42  ;;  %v911_v45 = vpop.f32.mrb[15].mxu1 }
 0x70a   :  { %v912_v46 = vadd.f32 %v6200_v42, %v911_v45 }
 0x70c   :  { %v7211_v47 = vpack.c.bf16 %v917_v44, %v912_v46 }
 0x70e   :  { %7213 = vmatprep.subr.msk.bf16.mxu1 %vm7828_vm8, %v7211_v47 }
 0x70f   :  { %7216 = vmatpush3.bf16.xpose.msk.msra.mxu1 %vm7828_vm8, %v7211_v47 }
 0x710   :  { %6772 = vmatprep.subr.msk.mxu1 %vm665_vm11, %v1198_v20 }
 0x716   :  { %6763 = vmatmul.mubr.msk.f32.vlgmr.msra.gmra.mrb[16].mxu1 %vm461_vm6, %v832_v48 }
 0x717   :  { %6773 = vmatpush3.msk.msra.mxu1 %vm665_vm11, %v1198_v20 }
 0x718   :  { %7237 = vmatprep.subr.msk.bf16.mxu1 %vm7775_vm4, %v7235_v23 }
 0x7e9   :  { %v6764_v50 = vpop.f32.mrb[16].mxu1 }
 0x7ea   :  { %v1089_v51 = vadd.f32 %v6764_v50, %v7841_v2  ;;  %v1083_v52 = vpop.f32.mrb[17].mxu1 }
 0x7eb   :  { %v1084_v53 = vadd.f32 %v1083_v52, %v7843_v3 }
 0x7ec   :  { %v1095_v54 = vsel %vm553_vm9, %v1089_v51, -inf }
 0x7ed   :  { %1096 = vmax.xlane.f32.xlu1 %v1095_v54  ;;  %v1092_v55 = vsel %vm549_vm10, %v1084_v53, -inf }
 0x7ee   :  { %1093 = vmax.xlane.f32.xlu0 %v1092_v55 }
 0x87a   :  { %v1097_v58 = vpop.xlane.xlu1 %1096 }
 0x87b   :  { %v1099_v59 = vsub.f32 %v1089_v51, %v1097_v58  ;;  %v1094_v60 = vpop.xlane.xlu0 %1093 }
 0x87c   :  { %v1098_v61 = vsub.f32 %v1084_v53, %v1094_v60 }
 0x87d   :  { %v1102_v63 = vmul.f32 1.442695, %v1099_v59 }
 0x87e   :  { %v1100_v0 = vmul.f32 1.442695, %v1098_v61 }
 0x87f   :  { %7525 = vpow2.f32 %v1102_v63  ;;  %v1733_v63 = vld [vmem:[#allocation5 + $0x230] sm:$0x7] }
 0x880   :  { %7527 = vpow2.f32 %v1100_v0 }
 0x889   :  { %v7526_v1 = vpop.eup %7525 }
 0x88a   :  { %v7528_v4 = vpop.eup %7527  ;;  %v1107_v5 = vsel %vm553_vm9, %v7526_v1, 0.0 }
 0x88b   :  { %1108 = vadd.xlane.f32.xlu1 %v1107_v5  ;;  %v1104_v6 = vsel %vm549_vm10, %v7528_v4, 0.0 }
 0x88c   :  { %1105 = vadd.xlane.f32.xlu0 %v1104_v6 }
 0x918   :  { %v1109_v10 = vpop.xlane.xlu1 %1108 }
 0x919   :  { %7529 = vrcp.f32 %v1109_v10  ;;  %v1106_v11 = vpop.xlane.xlu0 %1105  ;;  %v6195_v10 = vld [vmem:[#allocation5 + $0x238] ss:$0 sm:$0xff] }
 0x91a   :  { %7531 = vrcp.f32 %v1106_v11 }
 0x923   :  { %v7530_v12 = vpop.eup %7529 }
 0x924   :  { %v7532_v16 = vpop.eup %7531  ;;  %v1113_v18 = vmul.f32 %v7530_v12, %v7526_v1 }
 0x925   :  { %v1112_v17 = vmul.f32 %v7532_v16, %v7528_v4 }
 0x927   :  { %6769 = vmatprep.mubr.msk.f32.mxu0 %vm549_vm10, %v1112_v17 }
 0x928   :  { %6770 = vmatmul.mubr.msk.f32.vlgmr.msra.gmra.mrb[6].mxu0 %vm549_vm10, %v1113_v18 }
 0x929   :  { %7228 = vmatpush3.bf16.msk.msra.mxu0 %vm7775_vm4, %v7223_v9  ;;  %6781 = vmatprep.mubr.msk.f32.mxu0 %vm157_vm0, %v7789_v32 }
 0x92a   :  { %7231 = vmatprep.subr.msk.bf16.mxu0 %vm7775_vm4, %v7229_v19 }
 0x92c   :  { %6782 = vmatmul.mubr.msk.f32.vlgmr.msra.gmra.mrb[8].mxu0 %vm157_vm0, %v7795_v37 }
 0x92d   :  { %7234 = vmatpush3.bf16.msk.msra.mxu0 %vm7775_vm4, %v7229_v19  ;;  %6788 = vmatprep.mubr.msk.f32.mxu0 %vm157_vm0, %v7789_v32 }
 0x930   :  { %6789 = vmatmul.mubr.msk.f32.vlgmr.msra.gmra.mrb[10].mxu0 %vm157_vm0, %v7795_v37 }
 0x9fb   :  { %v6771_v24 = vpop.f32.mrb[6].mxu0 }
 0x9fc   :  { %v1189_v25 = vpop.f32.mrb[7].mxu0 }
 0x9fd   :  { %6774 = vmatprep.mubr.msk.f32.mxu1 %vm461_vm6, %v1189_v25 }
 0x9fe   :  { %6775 = vmatmul.mubr.msk.f32.vlgmr.msra.gmra.mrb[10].mxu1 %vm461_vm6, %v6771_v24 }
 0x9ff   :  { %v6783_v27 = vpop.f32.mrb[8].mxu0  ;;  %7240 = vmatpush3.bf16.msk.msra.mxu1 %vm7775_vm4, %v7235_v23  ;;  %6795 = vmatprep.mubr.msk.f32.mxu1 %vm157_vm0, %v7789_v32 }
 0xa00   :  { %v1361_v28 = vpop.f32.mrb[9].mxu0  ;;  %v1367_v32 = vadd.f32 %v6783_v27, %v6218_v26 }
 0xa01   :  { %v1362_v29 = vadd.f32 %v6218_v26, %v1361_v28  ;;  %v1862_v28 = vld [vmem:[#allocation5 + $0x240] sm:$0xff] }
 0xa02   :  { %6796 = vmatmul.mubr.msk.f32.vlgmr.msra.gmra.mrb[18].mxu1 %vm157_vm0, %v7795_v37 }
 0xa03   :  { %v6790_v31 = vpop.f32.mrb[10].mxu0  ;;  %6802 = vmatprep.mubr.msk.f32.mxu0 %vm461_vm6, %v1362_v29  ;;  %v1863_v29 = vld [vmem:[#allocation5 + $0x248] sm:$0x1] }
 0xa04   :  { %v1452_v33 = vadd.f32 %v6790_v31, %v6222_v30  ;;  %v1446_v34 = vpop.f32.mrb[11].mxu0 }
 0xa05   :  { %v1447_v35 = vadd.f32 %v6222_v30, %v1446_v34  ;;  %v7253_v30 = vpack.c.bf16 %v1863_v29, %v1862_v28 }
 0xa07   :  { %v7241_v36 = vpack.c.bf16 %v1452_v33, %v1447_v35 }
 0xa09   :  { %7243 = vmatprep.subr.msk.bf16.mxu0 %vm7828_vm8, %v7241_v36 }
 0xa0a   :  { %7246 = vmatpush3.bf16.xpose.msk.msra.mxu0 %vm7828_vm8, %v7241_v36 }
 0xa0b   :  { %7255 = vmatprep.subr.msk.bf16.mxu0 %vm7775_vm4, %v7253_v30 }
 0xa11   :  { %6803 = vmatmul.mubr.msk.f32.vlgmr.msra.gmra.mrb[12].mxu0 %vm461_vm6, %v1367_v32 }
 0xa12   :  { %7258 = vmatpush3.bf16.msk.msra.mxu0 %vm7775_vm4, %v7253_v30 }
 0xad5   :  { %v6797_v39 = vpop.f32.mrb[18].mxu1 }
 0xad6   :  { %v1537_v40 = vadd.f32 %v6797_v39, %v6226_v38  ;;  %v1531_v37 = vpop.f32.mrb[19].mxu1  ;;  %v6240_v39 = vld [vmem:[#allocation5 + $0x138] ss:$0 sm:$0xff] }
 0xad7   :  { %v1532_v41 = vadd.f32 %v6226_v38, %v1531_v37 }
 0xad9   :  { %v7247_v42 = vpack.c.bf16 %v1537_v40, %v1532_v41 }
 0xadb   :  { %7249 = vmatprep.subr.msk.bf16.mxu1 %vm7817_vm7, %v7247_v42 }
 0xadc   :  { %7252 = vmatpush3.bf16.msk.msra.mxu1 %vm7817_vm7, %v7247_v42  ;;  %v6241_v42 = vld [vmem:[#allocation5 + $0x140] ss:$0 sm:$0xff] }
 0xadd   :  { %6812 = vmatprep.subr.msk.mxu1 %vm665_vm11, %v1733_v63 }
 0xae4   :  { %v6804_v43 = vpop.f32.mrb[12].mxu0 }
 0xae5   :  { %v1624_v44 = vadd.f32 %v6804_v43, %v7841_v2  ;;  %v1618_v45 = vpop.f32.mrb[13].mxu0 }
 0xae6   :  { %v1619_v46 = vadd.f32 %v1618_v45, %v7843_v3 }
 0xae7   :  { %v1630_v47 = vsel %vm553_vm9, %v1624_v44, -inf }
 0xae8   :  { %1631 = vmax.xlane.f32.xlu1 %v1630_v47  ;;  %v1627_v48 = vsel %vm549_vm10, %v1619_v46, -inf  ;;  %v2007_v47 = vld [vmem:[#allocation5 + $0x258] sm:$0xff] }
 0xae9   :  { %1628 = vmax.xlane.f32.xlu0 %v1627_v48  ;;  %v2008_v48 = vld [vmem:[#allocation5 + $0x260] sm:$0xff] }
 0xb75   :  { %v1632_v50 = vpop.xlane.xlu1 %1631 }
 0xb76   :  { %v1634_v51 = vsub.f32 %v1624_v44, %v1632_v50  ;;  %v1629_v52 = vpop.xlane.xlu0 %1628  ;;  %v7259_v50 = vpack.c.bf16 %v2008_v48, %v2007_v47 }
 0xb77   :  { %v1633_v53 = vsub.f32 %v1619_v46, %v1629_v52  ;;  %v2010_v52 = vld [vmem:[#allocation5 + $0x270] sm:$0xff] }
 0xb78   :  { %v1637_v54 = vmul.f32 1.442695, %v1634_v51  ;;  %v2009_v51 = vld [vmem:[#allocation5 + $0x268] sm:$0xff] }
 0xb79   :  { %v1635_v55 = vmul.f32 1.442695, %v1633_v53  ;;  %v7263_v53 = vpack.c.bf16 %v2010_v52, %v2009_v51 }
 0xb7a   :  { %7533 = vpow2.f32 %v1637_v54  ;;  %v2011_v54 = vld [vmem:[#allocation5 + $0x278] sm:$0xf] }
 0xb7b   :  { %7535 = vpow2.f32 %v1635_v55  ;;  %v6242_v55 = vld [vmem:[#allocation5 + $0x250] ss:$0 sm:$0xff] }
 0xb84   :  { %v7534_v58 = vpop.eup %7533 }
 0xb85   :  { %v7536_v59 = vpop.eup %7535  ;;  %v1642_v60 = vsel %vm553_vm9, %v7534_v58, 0.0 }
 0xb86   :  { %1643 = vadd.xlane.f32.xlu1 %v1642_v60  ;;  %v1639_v61 = vsel %vm549_vm10, %v7536_v59, 0.0 }
 0xb87   :  { %1640 = vadd.xlane.f32.xlu0 %v1639_v61 }
 0xc13   :  { %v1644_v0 = vpop.xlane.xlu1 %1643 }
 0xc14   :  { %7537 = vrcp.f32 %v1644_v0  ;;  %v1641_v1 = vpop.xlane.xlu0 %1640 }
 0xc15   :  { %7539 = vrcp.f32 %v1641_v1 }
 0xc1e   :  { %v7538_v4 = vpop.eup %7537 }
 0xc1f   :  { %v7540_v5 = vpop.eup %7539  ;;  %v1648_v7 = vmul.f32 %v7538_v4, %v7534_v58 }
 0xc20   :  { %v1647_v6 = vmul.f32 %v7540_v5, %v7536_v59 }
 0xc22   :  { %6809 = vmatprep.mubr.msk.f32.mxu1 %vm549_vm10, %v1647_v6 }
 0xc23   :  { %6810 = vmatmul.mubr.msk.f32.vlgmr.msra.gmra.mrb[20].mxu1 %vm549_vm10, %v1648_v7 }
 0xc24   :  { %6813 = vmatpush3.msk.msra.mxu1 %vm665_vm11, %v1733_v63 }
 0xc25   :  { %7260 = vmatprep.subr.bf16.mxu1 %v7259_v50 }
 0xcf6   :  { %v6811_v8 = vpop.f32.mrb[20].mxu1 }
 0xcf7   :  { %v1724_v9 = vpop.f32.mrb[21].mxu1 }
 0xcf8   :  { %6814 = vmatprep.mubr.msk.f32.mxu1 %vm461_vm6, %v1724_v9 }
 0xcf9   :  { %6815 = vmatmul.mubr.msk.f32.vlgmr.msra.gmra.mrb[10].mxu1 %vm461_vm6, %v6811_v8 }
 0xcfa   :  { %7262 = vmatpush3.bf16.msra.mxu1 %v7259_v50 }
 0xcfb   :  { %7264 = vmatprep.subr.bf16.mxu1 %v7263_v53 }
 0xcfe   :  { %7266 = vmatpush3.bf16.msra.mxu1 %v7263_v53 }
 0xcff   :  { %6832 = vmatprep.subr.msk.mxu1 %vm2024_vm12, %v2011_v54 }
 0xd02   :  { %6833 = vmatpush3.msk.msra.mxu1 %vm2024_vm12, %v2011_v54  ;;  %v6246_v54 = vld [vmem:[#allocation5 + $0x280] ss:$0 sm:$0xff] }
 0xdcc   :  { %v6816_v11 = vpop.f32.mrb[10].mxu1 }
 0xdcd   :  { %v7483_v12 = vadd.f32 %v6816_v11, %v6195_v10  ;;  %v1809_v13 = vpop.f32.mrb[11].mxu1 }
 0xdce   :  { %v7484_v14 = vadd.f32 %v6195_v10, %v1809_v13 }
 0xdcf   :  { %v7938_v16 = vadd.f32 %v7483_v12, %v7766_v62 }
 0xdd0   :  { %v7941_v17 = vadd.f32 %v7484_v14, %v7762_v56 }
 0xdd1   :  { %v1827_v18 = vsel %vm161_vm1, %v7938_v16, 0.0 }
 0xdd2   :  { %1828 = vadd.xlane.f32.xlu1 %v1827_v18  ;;  %v1824_v19 = vsel %vm157_vm0, %v7941_v17, 0.0 }
 0xdd3   :  { %1825 = vadd.xlane.f32.xlu0 %v1824_v19 }
 0xe5f   :  { %v1829_v20 = vpop.xlane.xlu1 %1828 }
 0xe60   :  { %v1831_v21 = vmul.f32 0.11111111, %v1829_v20  ;;  %v1826_v22 = vpop.xlane.xlu0 %1825 }
 0xe61   :  { %v1830_v23 = vmul.f32 0.11111111, %v1826_v22 }
 0xe62   :  { %v1833_v24 = vsub.f32 %v7938_v16, %v1831_v21 }
 0xe63   :  { %v1832_v62 = vsub.f32 %v7941_v17, %v1830_v23 }
 0xe64   :  { %v1835_v25 = vmul.f32 %v1833_v24, %v1833_v24 }
 0xe65   :  { %v1834_v26 = vmul.f32 %v1832_v62, %v1832_v62 }
 0xe66   :  { %v1839_v56 = vsel %vm161_vm1, %v1835_v25, 0.0 }
 0xe67   :  { %1840 = vadd.xlane.f32.xlu1 %v1839_v56  ;;  %v1836_v27 = vsel %vm157_vm0, %v1834_v26, 0.0 }
 0xe68   :  { %1837 = vadd.xlane.f32.xlu0 %v1836_v27 }
 0xef4   :  { %v1841_v31 = vpop.xlane.xlu1 %1840 }
 0xef5   :  { %v1843_v33 = vmul.f32 0.11111111, %v1841_v31  ;;  %v1838_v34 = vpop.xlane.xlu0 %1837 }
 0xef6   :  { %v1842_v35 = vmul.f32 0.11111111, %v1838_v34 }
 0xef7   :  { %v1845_v36 = vadd.f32 1e-05, %v1843_v33 }
 0xef8   :  { %v1844_v32 = vadd.f32 1e-05, %v1842_v35 }
 0xef9   :  { %7541 = vrsqrt.f32 %v1845_v36 }
 0xefa   :  { %7543 = vrsqrt.f32 %v1844_v32 }
 0xf03   :  { %v7542_v38 = vpop.eup %7541 }
 0xf04   :  { %v7544_v40 = vpop.eup %7543  ;;  %v1849_v37 = vmul.f32 %v7542_v38, %v1833_v24 }
 0xf05   :  { %v1848_v41 = vmul.f32 %v7544_v40, %v1832_v62 }
 0xf06   :  { %v1855_v43 = vmul.f32 %v6240_v39, %v1849_v37 }
 0xf07   :  { %v1854_v44 = vmul.f32 %v6240_v39, %v1848_v41  ;;  %v7718_v41 = vmov -1.0  }
 0xf08   :  { %v1861_v46 = vadd.f32 %v6241_v42, %v1855_v43 }
 0xf09   :  { %v1860_v45 = vadd.f32 %v6241_v42, %v1854_v44 }
 0xf0b   :  { %6821 = vmatprep.mubr.msk.f32.mxu0 %vm157_vm0, %v1860_v45 }
 0xf0c   :  { %6822 = vmatmul.mubr.msk.f32.vlgmr.msra.gmra.mrb[14].mxu0 %vm157_vm0, %v1861_v46 }
 0xfdf   :  { %v6823_v58 = vpop.f32.mrb[14].mxu0 }
 0xfe0   :  { %v1950_v59 = vadd.f32 %v6823_v58, %v6242_v55  ;;  %v1944_v60 = vpop.f32.mrb[15].mxu0 }
 0xfe1   :  { %v1945_v61 = vadd.f32 %v6242_v55, %v1944_v60 }
 0xfe2   :  { %v1956_v63 = vmul.f32 0.70710677, %v1950_v59  ;;  %v1954_v51 = vmul.f32 0.5, %v1950_v59 }
 0xfe3   :  { %v1955_v0 = vmul.f32 0.70710677, %v1945_v61  ;;  %v1953_v48 = vmul.f32 0.5, %v1945_v61 }
 0xfe4   :  { %v1962_v1 = vand.u32 2147483647, %v1956_v63  ;;  %vm1958_vm13 = vcmp.ge.f32.partialorder %v1956_v63, 0.0 }
 0xfe5   :  { %v1961_v4 = vand.u32 2147483647, %v1955_v0  ;;  %vm1957_vm14 = vcmp.ge.f32.partialorder %v1955_v0, 0.0  ;;  %v1960_v42 = vsel %vm1958_vm13, 1.0, %v7718_v41 }
 0xfe6   :  { %v1964_v5 = vmul.f32 0.3275911, %v1962_v1  ;;  %v1990_v9 = vsub.f32 0.0, %v1962_v1  ;;  %v1959_v45 = vsel %vm1957_vm14, 1.0, %v7718_v41 }
 0xfe7   :  { %v1963_v6 = vmul.f32 0.3275911, %v1961_v4  ;;  %v1989_v10 = vsub.f32 0.0, %v1961_v4 }
 0xfe8   :  { %v1966_v7 = vadd.f32 1.0, %v1964_v5  ;;  %v1992_v12 = vmul.f32 %v1990_v9, %v1962_v1 }
 0xfe9   :  { %v1965_v8 = vadd.f32 1.0, %v1963_v6  ;;  %v1991_v18 = vmul.f32 %v1989_v10, %v1961_v4 }
 0xfea   :  { %7545 = vrcp.f32 %v1966_v7  ;;  %v1995_v21 = vmul.f32 1.442695, %v1992_v12  ;;  %v2146_v12 = vld [vmem:[#allocation5 + $0x2a8] sm:$0xff] }
 0xfeb   :  { %7547 = vrcp.f32 %v1965_v8  ;;  %v1993_v24 = vmul.f32 1.442695, %v1991_v18 }
 0xfec   :  { %7549 = vpow2.f32 %v1995_v21  ;;  %v2237_v21 = vld [vmem:[#allocation5 + $0x2c0] sm:$0xff] }
 0xfed   :  { %7551 = vpow2.f32 %v1993_v24 }
 0xff4   :  { %v7546_v11 = vpop.eup %7545 }
 0xff5   :  { %v7548_v13 = vpop.eup %7547  ;;  %v1972_v14 = vmul.f32 1.0614054, %v7546_v11 }
 0xff6   :  { %v1971_v19 = vmul.f32 1.0614054, %v7548_v13  ;;  %v7550_v36 = vpop.eup %7549 }
 0xff7   :  { %v1974_v20 = vadd.f32 -1.4531521, %v1972_v14  ;;  %v7552_v38 = vpop.eup %7551  ;;  %v2322_v14 = vld [vmem:[#allocation5 + $0x2d8] sm:$0xff] }
 0xff8   :  { %v1973_v22 = vadd.f32 -1.4531521, %v1971_v19  ;;  %v2323_v19 = vld [vmem:[#allocation5 + $0x2e0] sm:$0x1] }
 0xff9   :  { %v1976_v23 = vmul.f32 %v7546_v11, %v1974_v20  ;;  %v7279_v20 = vpack.c.bf16 %v2323_v19, %v2322_v14  ;;  %v6283_v14 = vld [vmem:[#allocation5 + $0x338] ss:$0 sm:$0xff] }
 0xffa   :  { %v1975_v62 = vmul.f32 %v7548_v13, %v1973_v22  ;;  %v2238_v22 = vld [vmem:[#allocation5 + $0x2c8] sm:$0x1] }
 0xffb   :  { %v1978_v25 = vadd.f32 1.4214138, %v1976_v23  ;;  %7281 = vmatprep.subr.msk.bf16.mxu1 %vm7775_vm4, %v7279_v20  ;;  %v7273_v23 = vpack.c.bf16 %v2238_v22, %v2237_v21 }
 0xffc   :  { %v1977_v26 = vadd.f32 1.4214138, %v1975_v62 }
 0xffd   :  { %v1980_v56 = vmul.f32 %v7546_v11, %v1978_v25 }
 0xffe   :  { %v1979_v27 = vmul.f32 %v7548_v13, %v1977_v26 }
 0xfff   :  { %v1982_v28 = vadd.f32 -0.28449672, %v1980_v56 }
0x1000   :  { %v1981_v29 = vadd.f32 -0.28449672, %v1979_v27 }
0x1001   :  { %v1984_v30 = vmul.f32 %v7546_v11, %v1982_v28 }
0x1002   :  { %v1983_v31 = vmul.f32 %v7548_v13, %v1981_v29  ;;  %v6250_v29 = vld [vmem:[#allocation5 + $0x288] ss:$0 sm:$0xff] }
0x1003   :  { %v1986_v33 = vadd.f32 0.2548296, %v1984_v30 }
0x1004   :  { %v1985_v34 = vadd.f32 0.2548296, %v1983_v31 }
0x1005   :  { %v1988_v35 = vmul.f32 %v7546_v11, %v1986_v33 }
0x1006   :  { %v1987_v32 = vmul.f32 %v7548_v13, %v1985_v34  ;;  %v2147_v13 = vld [vmem:[#allocation5 + $0x2b0] sm:$0x1] }
0x1007   :  { %v1998_v39 = vmul.f32 %v7550_v36, %v1988_v35  ;;  %v7267_v18 = vpack.c.bf16 %v2147_v13, %v2146_v12  ;;  %v6251_v34 = vld [vmem:[#allocation5 + $0x290] ss:$0 sm:$0xff] }
0x1008   :  { %v1997_v40 = vmul.f32 %v7552_v38, %v1987_v32 }
0x1009   :  { %v2000_v37 = vsub.f32 1.0, %v1998_v39  ;;  %7269 = vmatprep.subr.msk.bf16.mxu0 %vm7775_vm4, %v7267_v18  ;;  %v6260_v39 = vld [vmem:[#allocation5 + $0x2e8] ss:$0 sm:$0xff] }
0x100a   :  { %v1999_v43 = vsub.f32 1.0, %v1997_v40  ;;  %7272 = vmatpush3.bf16.msk.msra.mxu0 %vm7775_vm4, %v7267_v18  ;;  %v6252_v40 = vld [vmem:[#allocation5 + $0x2b8] ss:$0 sm:$0xff] }
0x100b   :  { %v2002_v44 = vmul.f32 %v2000_v37, %v1960_v42  ;;  %7275 = vmatprep.subr.msk.bf16.mxu0 %vm7775_vm4, %v7273_v23 }
0x100c   :  { %v2001_v46 = vmul.f32 %v1999_v43, %v1959_v45 }
0x100d   :  { %v2004_v47 = vadd.f32 1.0, %v2002_v44 }
0x100e   :  { %v2003_v50 = vadd.f32 1.0, %v2001_v46 }
0x100f   :  { %v2006_v53 = vmul.f32 %v2004_v47, %v1954_v51 }
0x1010   :  { %v2005_v52 = vmul.f32 %v2003_v50, %v1953_v48  ;;  %v6256_v48 = vld [vmem:[#allocation5 + $0x2d0] ss:$0 sm:$0xff] }
0x1012   :  { %6834 = vmatprep.mubr.msk.f32.mxu1 %vm2017_vm15, %v2005_v52 }
0x1013   :  { %6835 = vmatmul.mubr.msk.f32.vlgmr.msra.gmra.mrb[22].mxu1 %vm2017_vm15, %v2006_v53 }
0x1014   :  { %7284 = vmatpush3.bf16.msk.msra.mxu1 %vm7775_vm4, %v7279_v20 }
0x10e6   :  { %v6836_v55 = vpop.f32.mrb[22].mxu1 }
0x10e7   :  { %v2100_v58 = vadd.f32 %v6836_v55, %v6246_v54  ;;  %v2094_v60 = vpop.f32.mrb[23].mxu1  ;;  %v2692_v55 = vld [vmem:[#allocation5 + $0x300] sm:$0x1] }
0x10e8   :  { %v2095_v63 = vadd.f32 %v6246_v54, %v2094_v60  ;;  %v2691_v54 = vld [vmem:[#allocation5 + $0x2f8] sm:$0xff] }
0x10e9   :  { %v7964_v0 = vmul.f32 %v2100_v58, %v7938_v16 }
0x10ea   :  { %v7967_v1 = vmul.f32 %v2095_v63, %v7941_v17  ;;  %v7297_v63 = vpack.c.bf16 %v2692_v55, %v2691_v54 }
0x10eb   :  { %v2110_v59 = vsel %vm161_vm1, %v7964_v0, 0.0 }
0x10ec   :  { %2111 = vadd.xlane.f32.xlu1 %v2110_v59  ;;  %v2107_v61 = vsel %vm157_vm0, %v7967_v1, 0.0  ;;  %v2861_v59 = vld [vmem:[#allocation5 + $0x328] sm:$0xff] }
0x10ed   :  { %2108 = vadd.xlane.f32.xlu0 %v2107_v61  ;;  %v2862_v61 = vld [vmem:[#allocation5 + $0x330] sm:$0x1] }
0x1179   :  { %v2112_v4 = vpop.xlane.xlu1 %2111 }
0x117a   :  { %v2114_v5 = vmul.f32 0.11111111, %v2112_v4  ;;  %v2109_v6 = vpop.xlane.xlu0 %2108 }
0x117b   :  { %v2113_v7 = vmul.f32 0.11111111, %v2109_v6 }
0x117c   :  { %v2116_v8 = vsub.f32 %v7964_v0, %v2114_v5  ;;  %v7309_v5 = vpack.c.bf16 %v2862_v61, %v2861_v59 }
0x117d   :  { %v2115_v16 = vsub.f32 %v7967_v1, %v2113_v7 }
0x117e   :  { %v2118_v9 = vmul.f32 %v2116_v8, %v2116_v8 }
0x117f   :  { %v2117_v10 = vmul.f32 %v2115_v16, %v2115_v16 }
0x1180   :  { %v2122_v17 = vsel %vm161_vm1, %v2118_v9, 0.0  ;;  %v6275_v9 = vld [vmem:[#allocation5 + $0x308] ss:$0 sm:$0xff] }
0x1181   :  { %2123 = vadd.xlane.f32.xlu1 %v2122_v17  ;;  %v2119_v11 = vsel %vm157_vm0, %v2117_v10, 0.0 }
0x1182   :  { %2120 = vadd.xlane.f32.xlu0 %v2119_v11 }
0x120e   :  { %v2124_v24 = vpop.xlane.xlu1 %2123 }
0x120f   :  { %v2126_v62 = vmul.f32 0.11111111, %v2124_v24  ;;  %v2121_v25 = vpop.xlane.xlu0 %2120 }
0x1210   :  { %v2125_v26 = vmul.f32 0.11111111, %v2121_v25 }
0x1211   :  { %v2128_v56 = vadd.f32 1e-05, %v2126_v62 }
0x1212   :  { %v2127_v27 = vadd.f32 1e-05, %v2125_v26 }
0x1213   :  { %7553 = vrsqrt.f32 %v2128_v56 }
0x1214   :  { %7555 = vrsqrt.f32 %v2127_v27 }
0x121d   :  { %v7554_v28 = vpop.eup %7553 }
0x121e   :  { %v7556_v30 = vpop.eup %7555  ;;  %v2132_v31 = vmul.f32 %v7554_v28, %v2116_v8 }
0x121f   :  { %v2131_v33 = vmul.f32 %v7556_v30, %v2115_v16 }
0x1220   :  { %v2138_v35 = vmul.f32 %v6250_v29, %v2132_v31  ;;  %v2600_v31 = vld [vmem:[#allocation5 + $0x2f0] sm:$0x7] }
0x1221   :  { %v2137_v36 = vmul.f32 %v6250_v29, %v2131_v33 }
0x1222   :  { %v7989_v38 = vadd.f32 %v6251_v34, %v2138_v35 }
0x1223   :  { %v7987_v32 = vadd.f32 %v6251_v34, %v2137_v36 }
0x1225   :  { %6841 = vmatprep.mubr.msk.f32.mxu0 %vm157_vm0, %v7987_v32  ;;  %6855 = vmatprep.mubr.msk.f32.mxu1 %vm157_vm0, %v7987_v32 }
0x1226   :  { %6842 = vmatmul.mubr.msk.f32.vlgmr.msra.gmra.mrb[16].mxu0 %vm157_vm0, %v7989_v38  ;;  %6856 = vmatmul.mubr.msk.f32.vlgmr.msra.gmra.mrb[24].mxu1 %vm157_vm0, %v7989_v38 }
0x1227   :  { %7278 = vmatpush3.bf16.msk.msra.mxu0 %vm7775_vm4, %v7273_v23  ;;  %6848 = vmatprep.mubr.msk.f32.mxu0 %vm157_vm0, %v7987_v32 }
0x122a   :  { %6849 = vmatmul.mubr.msk.f32.vlgmr.msra.gmra.mrb[18].mxu0 %vm157_vm0, %v7989_v38 }
0x12f9   :  { %v6843_v37 = vpop.f32.mrb[16].mxu0  ;;  %v6857_v42 = vpop.f32.mrb[24].mxu1 }
0x12fa   :  { %v2404_v43 = vadd.f32 %v6857_v42, %v6260_v39  ;;  %v2228_v44 = vpop.f32.mrb[17].mxu0  ;;  %v2398_v45 = vpop.f32.mrb[25].mxu1  ;;  %v2234_v4 = vadd.f32 %v6843_v37, %v6252_v40  ;;  %v2776_v37 = vld [vmem:[#allocation5 + $0x310] sm:$0xff]  ;;  %v2777_v42 = vld [vmem:[#allocation5 + $0x318] sm:$0x1] }
0x12fb   :  { %v2229_v46 = vadd.f32 %v6252_v40, %v2228_v44  ;;  %v2399_v47 = vadd.f32 %v6260_v39, %v2398_v45 }
0x12fd   :  { %v7291_v50 = vpack.c.bf16 %v2404_v43, %v2399_v47  ;;  %v6850_v51 = vpop.f32.mrb[18].mxu0  ;;  %6862 = vmatprep.mubr.msk.f32.mxu0 %vm461_vm6, %v2229_v46  ;;  %v7303_v43 = vpack.c.bf16 %v2777_v42, %v2776_v37  ;;  %v6279_v47 = vld [vmem:[#allocation5 + $0x320] ss:$0 sm:$0xff]  ;;  %v6305_v37 = vld [vmem:[#allocation5 + $0x388] ss:$0 sm:$0xff] }
0x12fe   :  { %v2319_v52 = vadd.f32 %v6850_v51, %v6256_v48  ;;  %v2313_v53 = vpop.f32.mrb[19].mxu0 }
0x12ff   :  { %v2314_v58 = vadd.f32 %v6256_v48, %v2313_v53  ;;  %7293 = vmatprep.subr.msk.bf16.mxu1 %vm7817_vm7, %v7291_v50 }
0x1300   :  { %7296 = vmatpush3.bf16.msk.msra.mxu1 %vm7817_vm7, %v7291_v50 }
0x1301   :  { %v7285_v60 = vpack.c.bf16 %v2319_v52, %v2314_v58  ;;  %6872 = vmatprep.subr.msk.mxu1 %vm665_vm11, %v2600_v31 }
0x1303   :  { %7287 = vmatprep.subr.msk.bf16.mxu0 %vm7828_vm8, %v7285_v60 }
0x1304   :  { %7290 = vmatpush3.bf16.xpose.msk.msra.mxu0 %vm7828_vm8, %v7285_v60 }
0x1305   :  { %7299 = vmatprep.subr.msk.bf16.mxu0 %vm7775_vm4, %v7297_v63 }
0x130b   :  { %6863 = vmatmul.mubr.msk.f32.vlgmr.msra.gmra.mrb[20].mxu0 %vm461_vm6, %v2234_v4 }
0x130c   :  { %7302 = vmatpush3.bf16.msk.msra.mxu0 %vm7775_vm4, %v7297_v63  ;;  %6881 = vmatprep.mubr.msk.f32.mxu0 %vm157_vm0, %v7987_v32 }
0x130d   :  { %7311 = vmatprep.subr.msk.bf16.mxu0 %vm7775_vm4, %v7309_v5 }
0x130f   :  { %6882 = vmatmul.mubr.msk.f32.vlgmr.msra.gmra.mrb[22].mxu0 %vm157_vm0, %v7989_v38 }
0x1310   :  { %7314 = vmatpush3.bf16.msk.msra.mxu0 %vm7775_vm4, %v7309_v5  ;;  %6895 = vmatprep.mubr.msk.f32.mxu0 %vm157_vm0, %v7987_v32 }
0x1313   :  { %6896 = vmatmul.mubr.msk.f32.vlgmr.msra.gmra.mrb[24].mxu0 %vm157_vm0, %v7989_v38 }
0x13de   :  { %v6864_v6 = vpop.f32.mrb[20].mxu0 }
0x13df   :  { %v2491_v7 = vadd.f32 %v6864_v6, %v7841_v2  ;;  %v2485_v8 = vpop.f32.mrb[21].mxu0 }
0x13e0   :  { %v2486_v16 = vadd.f32 %v2485_v8, %v7843_v3 }
0x13e1   :  { %v2497_v10 = vsel %vm553_vm9, %v2491_v7, -inf }
0x13e2   :  { %2498 = vmax.xlane.f32.xlu1 %v2497_v10  ;;  %v6883_v17 = vpop.f32.mrb[22].mxu0  ;;  %v2494_v11 = vsel %vm549_vm10, %v2486_v16, -inf  ;;  %v3226_v10 = vld [vmem:[#allocation5 + $0x348] sm:$0xff] }
0x13e3   :  { %v2773_v12 = vadd.f32 %v6883_v17, %v6275_v9  ;;  %v2767_v13 = vpop.f32.mrb[23].mxu0  ;;  %2495 = vmax.xlane.f32.xlu0 %v2494_v11  ;;  %v3227_v17 = vld [vmem:[#allocation5 + $0x350] sm:$0x1] }
0x13e4   :  { %v2768_v46 = vadd.f32 %v6275_v9, %v2767_v13  ;;  %v7327_v11 = vpack.c.bf16 %v3227_v17, %v3226_v10 }
0x13e6   :  { %v6897_v18 = vpop.f32.mrb[24].mxu0 }
0x13e7   :  { %v2943_v19 = vadd.f32 %v6897_v18, %v6283_v14  ;;  %v2937_v20 = vpop.f32.mrb[25].mxu0  ;;  %v3311_v18 = vld [vmem:[#allocation5 + $0x360] sm:$0xff] }
0x13e8   :  { %v2938_v21 = vadd.f32 %v6283_v14, %v2937_v20 }
0x13ea   :  { %v7321_v22 = vpack.c.bf16 %v2943_v19, %v2938_v21  ;;  %v3312_v19 = vld [vmem:[#allocation5 + $0x368] sm:$0x1] }
0x13ec   :  { %7323 = vmatprep.subr.msk.bf16.mxu0 %vm7817_vm7, %v7321_v22 }
0x13ed   :  { %7326 = vmatpush3.bf16.msk.msra.mxu0 %vm7817_vm7, %v7321_v22 }
0x13ee   :  { %7329 = vmatprep.subr.msk.bf16.mxu0 %vm7775_vm4, %v7327_v11 }
0x146f   :  { %v2499_v23 = vpop.xlane.xlu1 %2498 }
0x1470   :  { %v2501_v24 = vsub.f32 %v2491_v7, %v2499_v23  ;;  %v2496_v62 = vpop.xlane.xlu0 %2495  ;;  %v7333_v23 = vpack.c.bf16 %v3312_v19, %v3311_v18 }
0x1471   :  { %v2500_v25 = vsub.f32 %v2486_v16, %v2496_v62  ;;  %v3396_v62 = vld [vmem:[#allocation5 + $0x378] sm:$0xff] }
0x1472   :  { %v2504_v26 = vmul.f32 1.442695, %v2501_v24  ;;  %v3139_v24 = vld [vmem:[#allocation5 + $0x340] sm:$0x7] }
0x1473   :  { %v2502_v56 = vmul.f32 1.442695, %v2500_v25  ;;  %v3397_v25 = vld [vmem:[#allocation5 + $0x380] sm:$0x1] }
0x1474   :  { %7557 = vpow2.f32 %v2504_v26  ;;  %v7339_v26 = vpack.c.bf16 %v3397_v25, %v3396_v62 }
0x1475   :  { %7559 = vpow2.f32 %v2502_v56 }
0x147e   :  { %v7558_v27 = vpop.eup %7557 }
0x147f   :  { %v7560_v28 = vpop.eup %7559  ;;  %v2509_v29 = vsel %vm553_vm9, %v7558_v27, 0.0 }
0x1480   :  { %2510 = vadd.xlane.f32.xlu1 %v2509_v29  ;;  %v2506_v30 = vsel %vm549_vm10, %v7560_v28, 0.0 }
0x1481   :  { %2507 = vadd.xlane.f32.xlu0 %v2506_v30 }
0x150d   :  { %v2511_v33 = vpop.xlane.xlu1 %2510 }
0x150e   :  { %7561 = vrcp.f32 %v2511_v33  ;;  %v2508_v34 = vpop.xlane.xlu0 %2507  ;;  %v6301_v33 = vld [vmem:[#allocation5 + $0x370] ss:$0 sm:$0xff] }
0x150f   :  { %7563 = vrcp.f32 %v2508_v34 }
0x1518   :  { %v7562_v35 = vpop.eup %7561 }
0x1519   :  { %v7564_v36 = vpop.eup %7563  ;;  %v2515_v40 = vmul.f32 %v7562_v35, %v7558_v27 }
0x151a   :  { %v2514_v39 = vmul.f32 %v7564_v36, %v7560_v28  ;;  %v6297_v28 = vld [vmem:[#allocation5 + $0x358] ss:$0 sm:$0xff] }
0x151c   :  { %6869 = vmatprep.mubr.msk.f32.mxu1 %vm549_vm10, %v2514_v39 }
0x151d   :  { %6870 = vmatmul.mubr.msk.f32.vlgmr.msra.gmra.mrb[26].mxu1 %vm549_vm10, %v2515_v40 }
0x151e   :  { %6873 = vmatpush3.msk.msra.mxu1 %vm665_vm11, %v2600_v31 }
0x151f   :  { %7305 = vmatprep.subr.msk.bf16.mxu1 %vm7775_vm4, %v7303_v43 }
0x15f0   :  { %v6871_v44 = vpop.f32.mrb[26].mxu1 }
0x15f1   :  { %v2591_v45 = vpop.f32.mrb[27].mxu1 }
0x15f2   :  { %6874 = vmatprep.mubr.msk.f32.mxu1 %vm461_vm6, %v2591_v45 }
0x15f3   :  { %6875 = vmatmul.mubr.msk.f32.vlgmr.msra.gmra.mrb[28].mxu1 %vm461_vm6, %v6871_v44 }
0x15f4   :  { %7308 = vmatpush3.bf16.msk.msra.mxu1 %vm7775_vm4, %v7303_v43  ;;  %6888 = vmatprep.mubr.msk.f32.mxu1 %vm157_vm0, %v7987_v32 }
0x15f7   :  { %6889 = vmatmul.mubr.msk.f32.vlgmr.msra.gmra.mrb[30].mxu1 %vm157_vm0, %v7989_v38 }
0x15f8   :  { %6902 = vmatprep.mubr.msk.f32.mxu1 %vm461_vm6, %v2768_v46 }
0x16ca   :  { %v6890_v48 = vpop.f32.mrb[30].mxu1 }
0x16cb   :  { %v2858_v50 = vadd.f32 %v6890_v48, %v6279_v47  ;;  %v2852_v51 = vpop.f32.mrb[31].mxu1 }
0x16cc   :  { %v2853_v52 = vadd.f32 %v6279_v47, %v2852_v51  ;;  %v8107_v47 = vld [vmem:[#allocation5 + $0x120] sm:$0x3]  ;;  %v8110_v51 = vld [vmem:[#allocation5 + $0x118] sm:$0xff] }
0x16ce   :  { %v7315_v53 = vpack.c.bf16 %v2858_v50, %v2853_v52 }
0x16d0   :  { %7317 = vmatprep.subr.msk.bf16.mxu1 %vm7828_vm8, %v7315_v53 }
0x16d1   :  { %7320 = vmatpush3.bf16.xpose.msk.msra.mxu1 %vm7828_vm8, %v7315_v53 }
0x16d2   :  { %6912 = vmatprep.subr.msk.mxu1 %vm665_vm11, %v3139_v24 }
0x16d8   :  { %6903 = vmatmul.mubr.msk.f32.vlgmr.msra.gmra.mrb[32].mxu1 %vm461_vm6, %v2773_v12 }
0x16d9   :  { %6913 = vmatpush3.msk.msra.mxu1 %vm665_vm11, %v3139_v24 }
0x16da   :  { %7341 = vmatprep.subr.msk.bf16.mxu1 %vm7775_vm4, %v7339_v26 }
0x17ab   :  { %v6904_v54 = vpop.f32.mrb[32].mxu1 }
0x17ac   :  { %v3030_v55 = vadd.f32 %v6904_v54, %v7841_v2  ;;  %v3024_v58 = vpop.f32.mrb[33].mxu1 }
0x17ad   :  { %v3025_v60 = vadd.f32 %v3024_v58, %v7843_v3 }
0x17ae   :  { %v3036_v63 = vsel %vm553_vm9, %v3030_v55, -inf }
0x17af   :  { %3037 = vmax.xlane.f32.xlu1 %v3036_v63  ;;  %v3033_v59 = vsel %vm549_vm10, %v3025_v60, -inf }
0x17b0   :  { %3034 = vmax.xlane.f32.xlu0 %v3033_v59 }
0x183c   :  { %v3038_v61 = vpop.xlane.xlu1 %3037 }
0x183d   :  { %v3040_v4 = vsub.f32 %v3030_v55, %v3038_v61  ;;  %v3035_v5 = vpop.xlane.xlu0 %3034 }
0x183e   :  { %v3039_v6 = vsub.f32 %v3025_v60, %v3035_v5 }
0x183f   :  { %v3043_v7 = vmul.f32 1.442695, %v3040_v4 }
0x1840   :  { %v3041_v8 = vmul.f32 1.442695, %v3039_v6 }
0x1841   :  { %7565 = vpow2.f32 %v3043_v7 }
0x1842   :  { %7567 = vpow2.f32 %v3041_v8  ;;  %v3674_v8 = vld [vmem:[#allocation5 + $0x390] sm:$0x7] }
0x184b   :  { %v7566_v16 = vpop.eup %7565 }
0x184c   :  { %v7568_v9 = vpop.eup %7567  ;;  %v3048_v2 = vsel %vm553_vm9, %v7566_v16, 0.0 }
0x184d   :  { %3049 = vadd.xlane.f32.xlu1 %v3048_v2  ;;  %v3045_v3 = vsel %vm549_vm10, %v7568_v9, 0.0 }
0x184e   :  { %3046 = vadd.xlane.f32.xlu0 %v3045_v3 }
0x18da   :  { %v3050_v12 = vpop.xlane.xlu1 %3049 }
0x18db   :  { %7569 = vrcp.f32 %v3050_v12  ;;  %v3047_v13 = vpop.xlane.xlu0 %3046 }
0x18dc   :  { %7571 = vrcp.f32 %v3047_v13  ;;  %v6274_v13 = vld [vmem:[#allocation5 + $0x398] ss:$0 sm:$0xff] }
0x18e5   :  { %v7570_v14 = vpop.eup %7569 }
0x18e6   :  { %v7572_v20 = vpop.eup %7571  ;;  %v3054_v22 = vmul.f32 %v7570_v14, %v7566_v16 }
0x18e7   :  { %v3053_v21 = vmul.f32 %v7572_v20, %v7568_v9 }
0x18e9   :  { %6909 = vmatprep.mubr.msk.f32.mxu0 %vm549_vm10, %v3053_v21 }
0x18ea   :  { %6910 = vmatmul.mubr.msk.f32.vlgmr.msra.gmra.mrb[26].mxu0 %vm549_vm10, %v3054_v22 }
0x18eb   :  { %7332 = vmatpush3.bf16.msk.msra.mxu0 %vm7775_vm4, %v7327_v11  ;;  %6921 = vmatprep.mubr.msk.f32.mxu0 %vm157_vm0, %v7987_v32 }
0x18ec   :  { %7335 = vmatprep.subr.msk.bf16.mxu0 %vm7775_vm4, %v7333_v23 }
0x18ee   :  { %6922 = vmatmul.mubr.msk.f32.vlgmr.msra.gmra.mrb[28].mxu0 %vm157_vm0, %v7989_v38 }
0x18ef   :  { %7338 = vmatpush3.bf16.msk.msra.mxu0 %vm7775_vm4, %v7333_v23  ;;  %6928 = vmatprep.mubr.msk.f32.mxu0 %vm157_vm0, %v7987_v32 }
0x18f2   :  { %6929 = vmatmul.mubr.msk.f32.vlgmr.msra.gmra.mrb[30].mxu0 %vm157_vm0, %v7989_v38 }
0x19bd   :  { %v6911_v56 = vpop.f32.mrb[26].mxu0 }
0x19be   :  { %v3130_v27 = vpop.f32.mrb[27].mxu0 }
0x19bf   :  { %6914 = vmatprep.mubr.msk.f32.mxu1 %vm461_vm6, %v3130_v27 }
0x19c0   :  { %6915 = vmatmul.mubr.msk.f32.vlgmr.msra.gmra.mrb[28].mxu1 %vm461_vm6, %v6911_v56 }
0x19c1   :  { %v6923_v29 = vpop.f32.mrb[28].mxu0  ;;  %7344 = vmatpush3.bf16.msk.msra.mxu1 %vm7775_vm4, %v7339_v26  ;;  %6935 = vmatprep.mubr.msk.f32.mxu1 %vm157_vm0, %v7987_v32 }
0x19c2   :  { %v3302_v30 = vpop.f32.mrb[29].mxu0  ;;  %v3308_v32 = vadd.f32 %v6923_v29, %v6297_v28 }
0x19c3   :  { %v3303_v31 = vadd.f32 %v6297_v28, %v3302_v30 }
0x19c4   :  { %6936 = vmatmul.mubr.msk.f32.vlgmr.msra.gmra.mrb[34].mxu1 %vm157_vm0, %v7989_v38 }
0x19c5   :  { %v6930_v34 = vpop.f32.mrb[30].mxu0  ;;  %6942 = vmatprep.mubr.msk.f32.mxu0 %vm461_vm6, %v3303_v31  ;;  %v3803_v31 = vld [vmem:[#allocation5 + $0x3a0] sm:$0xff] }
0x19c6   :  { %v3393_v35 = vadd.f32 %v6930_v34, %v6301_v33  ;;  %v3387_v36 = vpop.f32.mrb[31].mxu0 }
0x19c7   :  { %v3388_v39 = vadd.f32 %v6301_v33, %v3387_v36  ;;  %v3804_v33 = vld [vmem:[#allocation5 + $0x3a8] sm:$0x1] }
0x19c8   :  { %v7357_v34 = vpack.c.bf16 %v3804_v33, %v3803_v31 }
0x19c9   :  { %v7345_v40 = vpack.c.bf16 %v3393_v35, %v3388_v39 }
0x19cb   :  { %7347 = vmatprep.subr.msk.bf16.mxu0 %vm7828_vm8, %v7345_v40 }
0x19cc   :  { %7350 = vmatpush3.bf16.xpose.msk.msra.mxu0 %vm7828_vm8, %v7345_v40 }
0x19cd   :  { %7359 = vmatprep.subr.msk.bf16.mxu0 %vm7775_vm4, %v7357_v34 }
0x19d3   :  { %6943 = vmatmul.mubr.msk.f32.vlgmr.msra.gmra.mrb[32].mxu0 %vm461_vm6, %v3308_v32 }
0x19d4   :  { %7362 = vmatpush3.bf16.msk.msra.mxu0 %vm7775_vm4, %v7357_v34 }
0x1a97   :  { %v6937_v42 = vpop.f32.mrb[34].mxu1 }
0x1a98   :  { %v3478_v43 = vadd.f32 %v6937_v42, %v6305_v37  ;;  %v3472_v38 = vpop.f32.mrb[35].mxu1 }
0x1a99   :  { %v3473_v44 = vadd.f32 %v6305_v37, %v3472_v38 }
0x1a9b   :  { %v7351_v45 = vpack.c.bf16 %v3478_v43, %v3473_v44  ;;  %v6319_v43 = vld [vmem:[#allocation5 + $0x298] ss:$0 sm:$0xff] }
0x1a9d   :  { %7353 = vmatprep.subr.msk.bf16.mxu1 %vm7817_vm7, %v7351_v45 }
0x1a9e   :  { %7356 = vmatpush3.bf16.msk.msra.mxu1 %vm7817_vm7, %v7351_v45 }
0x1a9f   :  { %6952 = vmatprep.subr.msk.mxu1 %vm665_vm11, %v3674_v8 }
0x1aa6   :  { %v6944_v46 = vpop.f32.mrb[32].mxu0 }
0x1aa7   :  { %v3565_v48 = vadd.f32 %v8107_v47, %v6944_v46  ;;  %v3559_v50 = vpop.f32.mrb[33].mxu0  ;;  %v6320_v46 = vld [vmem:[#allocation5 + $0x2a0] ss:$0 sm:$0xff] }
0x1aa8   :  { %v3560_v52 = vadd.f32 %v8110_v51, %v3559_v50 }
0x1aa9   :  { %v3571_v53 = vsel %vm553_vm9, %v3565_v48, -inf }
0x1aaa   :  { %3572 = vmax.xlane.f32.xlu1 %v3571_v53  ;;  %v3568_v54 = vsel %vm549_vm10, %v3560_v52, -inf }
0x1aab   :  { %3569 = vmax.xlane.f32.xlu0 %v3568_v54  ;;  %v3948_v54 = vld [vmem:[#allocation5 + $0x3b8] sm:$0xff] }
0x1b37   :  { %v3573_v55 = vpop.xlane.xlu1 %3572 }
0x1b38   :  { %v3575_v58 = vsub.f32 %v3565_v48, %v3573_v55  ;;  %v3570_v60 = vpop.xlane.xlu0 %3569  ;;  %v3949_v55 = vld [vmem:[#allocation5 + $0x3c0] sm:$0xff] }
0x1b39   :  { %v3574_v63 = vsub.f32 %v3560_v52, %v3570_v60  ;;  %v3950_v60 = vld [vmem:[#allocation5 + $0x3c8] sm:$0xff] }
0x1b3a   :  { %v3578_v59 = vmul.f32 1.442695, %v3575_v58  ;;  %v7363_v58 = vpack.c.bf16 %v3949_v55, %v3948_v54 }
0x1b3b   :  { %v3576_v61 = vmul.f32 1.442695, %v3574_v63  ;;  %v3951_v63 = vld [vmem:[#allocation5 + $0x3d0] sm:$0xff] }
0x1b3c   :  { %7573 = vpow2.f32 %v3578_v59  ;;  %v7367_v59 = vpack.c.bf16 %v3951_v63, %v3950_v60 }
0x1b3d   :  { %7575 = vpow2.f32 %v3576_v61  ;;  %v3952_v61 = vld [vmem:[#allocation5 + $0x3d8] sm:$0xf] }
0x1b46   :  { %v7574_v4 = vpop.eup %7573 }
0x1b47   :  { %v7576_v5 = vpop.eup %7575  ;;  %v3583_v6 = vsel %vm553_vm9, %v7574_v4, 0.0 }
0x1b48   :  { %3584 = vadd.xlane.f32.xlu1 %v3583_v6  ;;  %v3580_v7 = vsel %vm549_vm10, %v7576_v5, 0.0 }
0x1b49   :  { %3581 = vadd.xlane.f32.xlu0 %v3580_v7 }
0x1bd5   :  { %v3585_v16 = vpop.xlane.xlu1 %3584 }
0x1bd6   :  { %7577 = vrcp.f32 %v3585_v16  ;;  %v3582_v9 = vpop.xlane.xlu0 %3581 }
0x1bd7   :  { %7579 = vrcp.f32 %v3582_v9 }
0x1be0   :  { %v7578_v2 = vpop.eup %7577 }
0x1be1   :  { %v7580_v3 = vpop.eup %7579  ;;  %v3589_v17 = vmul.f32 %v7578_v2, %v7574_v4  ;;  %v6321_v4 = vld [vmem:[#allocation5 + $0x3b0] ss:$0 sm:$0xff] }
0x1be2   :  { %v3588_v10 = vmul.f32 %v7580_v3, %v7576_v5 }
0x1be4   :  { %6949 = vmatprep.mubr.msk.f32.mxu1 %vm549_vm10, %v3588_v10 }
0x1be5   :  { %6950 = vmatmul.mubr.msk.f32.vlgmr.msra.gmra.mrb[36].mxu1 %vm549_vm10, %v3589_v17 }
0x1be6   :  { %6953 = vmatpush3.msk.msra.mxu1 %vm665_vm11, %v3674_v8 }
0x1be7   :  { %7364 = vmatprep.subr.bf16.mxu1 %v7363_v58 }
0x1cb8   :  { %v6951_v11 = vpop.f32.mrb[36].mxu1 }
0x1cb9   :  { %v3665_v12 = vpop.f32.mrb[37].mxu1 }
0x1cba   :  { %6954 = vmatprep.mubr.msk.f32.mxu1 %vm461_vm6, %v3665_v12 }
0x1cbb   :  { %6955 = vmatmul.mubr.msk.f32.vlgmr.msra.gmra.mrb[28].mxu1 %vm461_vm6, %v6951_v11 }
0x1cbc   :  { %7366 = vmatpush3.bf16.msra.mxu1 %v7363_v58 }
0x1cbd   :  { %7368 = vmatprep.subr.bf16.mxu1 %v7367_v59 }
0x1cc0   :  { %7370 = vmatpush3.bf16.msra.mxu1 %v7367_v59 }
0x1cc1   :  { %6972 = vmatprep.subr.msk.mxu1 %vm2024_vm12, %v3952_v61 }
0x1cc4   :  { %6973 = vmatpush3.msk.msra.mxu1 %vm2024_vm12, %v3952_v61  ;;  %v6325_v61 = vld [vmem:[#allocation5 + $0x3e0] ss:$0 sm:$0xff] }
0x1d8e   :  { %v6956_v14 = vpop.f32.mrb[28].mxu1 }
0x1d8f   :  { %v7485_v18 = vadd.f32 %v6956_v14, %v6274_v13  ;;  %v3750_v19 = vpop.f32.mrb[29].mxu1 }
0x1d90   :  { %v7486_v20 = vadd.f32 %v6274_v13, %v3750_v19 }
0x1d91   :  { %v8124_v21 = vadd.f32 %v7485_v18, %v7964_v0 }
0x1d92   :  { %v8127_v22 = vadd.f32 %v7486_v20, %v7967_v1 }
0x1d93   :  { %v3768_v23 = vsel %vm161_vm1, %v8124_v21, 0.0 }
0x1d94   :  { %3769 = vadd.xlane.f32.xlu1 %v3768_v23  ;;  %v3765_v24 = vsel %vm157_vm0, %v8127_v22, 0.0 }
0x1d95   :  { %3766 = vadd.xlane.f32.xlu0 %v3765_v24 }
0x1e21   :  { %v3770_v62 = vpop.xlane.xlu1 %3769 }
0x1e22   :  { %v3772_v25 = vmul.f32 0.11111111, %v3770_v62  ;;  %v3767_v26 = vpop.xlane.xlu0 %3766 }
0x1e23   :  { %v3771_v56 = vmul.f32 0.11111111, %v3767_v26 }
0x1e24   :  { %v3774_v27 = vsub.f32 %v8124_v21, %v3772_v25 }
0x1e25   :  { %v3773_v0 = vsub.f32 %v8127_v22, %v3771_v56 }
0x1e26   :  { %v3776_v28 = vmul.f32 %v3774_v27, %v3774_v27 }
0x1e27   :  { %v3775_v29 = vmul.f32 %v3773_v0, %v3773_v0 }
0x1e28   :  { %v3780_v1 = vsel %vm161_vm1, %v3776_v28, 0.0 }
0x1e29   :  { %3781 = vadd.xlane.f32.xlu1 %v3780_v1  ;;  %v3777_v30 = vsel %vm157_vm0, %v3775_v29, 0.0 }
0x1e2a   :  { %3778 = vadd.xlane.f32.xlu0 %v3777_v30 }
0x1eb6   :  { %v3782_v35 = vpop.xlane.xlu1 %3781 }
0x1eb7   :  { %v3784_v36 = vmul.f32 0.11111111, %v3782_v35  ;;  %v3779_v39 = vpop.xlane.xlu0 %3778 }
0x1eb8   :  { %v3783_v40 = vmul.f32 0.11111111, %v3779_v39 }
0x1eb9   :  { %v3786_v32 = vadd.f32 1e-05, %v3784_v36 }
0x1eba   :  { %v3785_v37 = vadd.f32 1e-05, %v3783_v40 }
0x1ebb   :  { %7581 = vrsqrt.f32 %v3786_v32 }
0x1ebc   :  { %7583 = vrsqrt.f32 %v3785_v37 }
0x1ec5   :  { %v7582_v42 = vpop.eup %7581 }
0x1ec6   :  { %v7584_v38 = vpop.eup %7583  ;;  %v3790_v44 = vmul.f32 %v7582_v42, %v3774_v27 }
0x1ec7   :  { %v3789_v45 = vmul.f32 %v7584_v38, %v3773_v0 }
0x1ec8   :  { %v3796_v48 = vmul.f32 %v6319_v43, %v3790_v44 }
0x1ec9   :  { %v3795_v50 = vmul.f32 %v6319_v43, %v3789_v45 }
0x1eca   :  { %v3802_v53 = vadd.f32 %v6320_v46, %v3796_v48 }
0x1ecb   :  { %v3801_v52 = vadd.f32 %v6320_v46, %v3795_v50 }
0x1ecd   :  { %6961 = vmatprep.mubr.msk.f32.mxu0 %vm157_vm0, %v3801_v52 }
0x1ece   :  { %6962 = vmatmul.mubr.msk.f32.vlgmr.msra.gmra.mrb[34].mxu0 %vm157_vm0, %v3802_v53 }
0x1fa1   :  { %v6963_v5 = vpop.f32.mrb[34].mxu0 }
0x1fa2   :  { %v3891_v6 = vadd.f32 %v6963_v5, %v6321_v4  ;;  %v3885_v7 = vpop.f32.mrb[35].mxu0 }
0x1fa3   :  { %v3886_v8 = vadd.f32 %v6321_v4, %v3885_v7 }
0x1fa4   :  { %v3897_v16 = vmul.f32 0.70710677, %v3891_v6  ;;  %v3895_v60 = vmul.f32 0.5, %v3891_v6 }
0x1fa5   :  { %v3896_v9 = vmul.f32 0.70710677, %v3886_v8  ;;  %v3894_v55 = vmul.f32 0.5, %v3886_v8 }
0x1fa6   :  { %v3903_v2 = vand.u32 2147483647, %v3897_v16  ;;  %vm3899_vm2 = vcmp.ge.f32.partialorder %v3897_v16, 0.0 }
0x1fa7   :  { %v3902_v3 = vand.u32 2147483647, %v3896_v9  ;;  %vm3898_vm3 = vcmp.ge.f32.partialorder %v3896_v9, 0.0  ;;  %v3901_v46 = vsel %vm3899_vm2, 1.0, %v7718_v41 }
0x1fa8   :  { %v3905_v10 = vmul.f32 0.3275911, %v3903_v2  ;;  %v3931_v13 = vsub.f32 0.0, %v3903_v2  ;;  %v3900_v52 = vsel %vm3898_vm3, 1.0, %v7718_v41 }
0x1fa9   :  { %v3904_v17 = vmul.f32 0.3275911, %v3902_v3  ;;  %v3930_v14 = vsub.f32 0.0, %v3902_v3 }
0x1faa   :  { %v3907_v11 = vadd.f32 1.0, %v3905_v10  ;;  %v3933_v19 = vmul.f32 %v3931_v13, %v3903_v2 }
0x1fab   :  { %v3906_v12 = vadd.f32 1.0, %v3904_v17  ;;  %v3932_v24 = vmul.f32 %v3930_v14, %v3902_v3 }
0x1fac   :  { %7585 = vrcp.f32 %v3907_v11  ;;  %v3936_v26 = vmul.f32 1.442695, %v3933_v19  ;;  %v4085_v19 = vld [vmem:[#allocation5 + $0x408] sm:$0xff] }
0x1fad   :  { %7587 = vrcp.f32 %v3906_v12  ;;  %v3934_v0 = vmul.f32 1.442695, %v3932_v24  ;;  %v4176_v24 = vld [vmem:[#allocation5 + $0x420] sm:$0xff] }
0x1fae   :  { %7589 = vpow2.f32 %v3936_v26 }
0x1faf   :  { %7591 = vpow2.f32 %v3934_v0 }
0x1fb6   :  { %v7586_v18 = vpop.eup %7585 }
0x1fb7   :  { %v7588_v20 = vpop.eup %7587  ;;  %v3913_v23 = vmul.f32 1.0614054, %v7586_v18 }
0x1fb8   :  { %v3912_v62 = vmul.f32 1.0614054, %v7588_v20  ;;  %v7590_v37 = vpop.eup %7589 }
0x1fb9   :  { %v3915_v25 = vadd.f32 -1.4531521, %v3913_v23  ;;  %v7592_v43 = vpop.eup %7591 }
0x1fba   :  { %v3914_v56 = vadd.f32 -1.4531521, %v3912_v62  ;;  %v4177_v62 = vld [vmem:[#allocation5 + $0x428] sm:$0x1] }
0x1fbb   :  { %v3917_v27 = vmul.f32 %v7586_v18, %v3915_v25  ;;  %v7377_v25 = vpack.c.bf16 %v4177_v62, %v4176_v24 }
0x1fbc   :  { %v3916_v28 = vmul.f32 %v7588_v20, %v3914_v56 }
0x1fbd   :  { %v3919_v29 = vadd.f32 1.4214138, %v3917_v27 }
0x1fbe   :  { %v3918_v1 = vadd.f32 1.4214138, %v3916_v28 }
0x1fbf   :  { %v3921_v30 = vmul.f32 %v7586_v18, %v3919_v29 }
0x1fc0   :  { %v3920_v31 = vmul.f32 %v7588_v20, %v3918_v1 }
0x1fc1   :  { %v3923_v33 = vadd.f32 -0.28449672, %v3921_v30  ;;  %v6329_v30 = vld [vmem:[#allocation5 + $0x3e8] ss:$0 sm:$0xff] }
0x1fc2   :  { %v3922_v34 = vadd.f32 -0.28449672, %v3920_v31 }
0x1fc3   :  { %v3925_v35 = vmul.f32 %v7586_v18, %v3923_v33 }
0x1fc4   :  { %v3924_v36 = vmul.f32 %v7588_v20, %v3922_v34 }
0x1fc5   :  { %v3927_v39 = vadd.f32 0.2548296, %v3925_v35  ;;  %v6330_v35 = vld [vmem:[#allocation5 + $0x3f0] ss:$0 sm:$0xff] }
0x1fc6   :  { %v3926_v40 = vadd.f32 0.2548296, %v3924_v36 }
0x1fc7   :  { %v3929_v32 = vmul.f32 %v7586_v18, %v3927_v39 }
0x1fc8   :  { %v3928_v42 = vmul.f32 %v7588_v20, %v3926_v40  ;;  %v4086_v20 = vld [vmem:[#allocation5 + $0x410] sm:$0x1]  ;;  %v4261_v40 = vld [vmem:[#allocation5 + $0x438] sm:$0xff] }
0x1fc9   :  { %v3939_v38 = vmul.f32 %v7590_v37, %v3929_v32  ;;  %v7371_v23 = vpack.c.bf16 %v4086_v20, %v4085_v19  ;;  %v4262_v32 = vld [vmem:[#allocation5 + $0x440] sm:$0x1] }
0x1fca   :  { %v3938_v44 = vmul.f32 %v7592_v43, %v3928_v42  ;;  %v7383_v43 = vpack.c.bf16 %v4262_v32, %v4261_v40 }
0x1fcb   :  { %v3941_v45 = vsub.f32 1.0, %v3939_v38  ;;  %7373 = vmatprep.subr.msk.bf16.mxu0 %vm7775_vm4, %v7371_v23  ;;  %v6331_v38 = vld [vmem:[#allocation5 + $0x418] ss:$0 sm:$0xff] }
0x1fcc   :  { %v3940_v48 = vsub.f32 1.0, %v3938_v44  ;;  %7376 = vmatpush3.bf16.msk.msra.mxu0 %vm7775_vm4, %v7371_v23  ;;  %v6362_v23 = vld [vmem:[#allocation5 + $0x498] ss:$0 sm:$0xff] }
0x1fcd   :  { %v3943_v50 = vmul.f32 %v3941_v45, %v3901_v46  ;;  %7379 = vmatprep.subr.msk.bf16.mxu0 %vm7775_vm4, %v7377_v25 }
0x1fce   :  { %v3942_v53 = vmul.f32 %v3940_v48, %v3900_v52  ;;  %v6335_v48 = vld [vmem:[#allocation5 + $0x430] ss:$0 sm:$0xff] }
0x1fcf   :  { %v3945_v54 = vadd.f32 1.0, %v3943_v50 }
0x1fd0   :  { %v3944_v58 = vadd.f32 1.0, %v3942_v53 }
0x1fd1   :  { %v3947_v59 = vmul.f32 %v3945_v54, %v3895_v60  ;;  %v4630_v54 = vld [vmem:[#allocation5 + $0x458] sm:$0xff]  ;;  %v6339_v60 = vld [vmem:[#allocation5 + $0x448] ss:$0 sm:$0xff] }
0x1fd2   :  { %v3946_v63 = vmul.f32 %v3944_v58, %v3894_v55  ;;  %v4631_v55 = vld [vmem:[#allocation5 + $0x460] sm:$0x1] }
0x1fd4   :  { %6974 = vmatprep.mubr.msk.f32.mxu1 %vm2017_vm15, %v3946_v63 }
0x1fd5   :  { %6975 = vmatmul.mubr.msk.f32.vlgmr.msra.gmra.mrb[38].mxu1 %vm2017_vm15, %v3947_v59 }
0x20a8   :  { %v6976_v4 = vpop.f32.mrb[38].mxu1 }
0x20a9   :  { %v4039_v5 = vadd.f32 %v6976_v4, %v6325_v61  ;;  %v4033_v7 = vpop.f32.mrb[39].mxu1 }
0x20aa   :  { %v4034_v16 = vadd.f32 %v6325_v61, %v4033_v7  ;;  %v7401_v61 = vpack.c.bf16 %v4631_v55, %v4630_v54  ;;  %v6358_v54 = vld [vmem:[#allocation5 + $0x480] ss:$0 sm:$0xff] }
0x20ab   :  { %v8150_v9 = vmul.f32 %v4039_v5, %v8124_v21 }
0x20ac   :  { %v8153_v2 = vmul.f32 %v4034_v16, %v8127_v22 }
0x20ad   :  { %v4049_v6 = vsel %vm161_vm1, %v8150_v9, 0.0 }
0x20ae   :  { %4050 = vadd.xlane.f32.xlu1 %v4049_v6  ;;  %v4046_v8 = vsel %vm157_vm0, %v8153_v2, 0.0  ;;  %v4800_v6 = vld [vmem:[#allocation5 + $0x488] sm:$0xff] }
0x20af   :  { %4047 = vadd.xlane.f32.xlu0 %v4046_v8  ;;  %v4801_v8 = vld [vmem:[#allocation5 + $0x490] sm:$0x1] }
0x213b   :  { %v4051_v3 = vpop.xlane.xlu1 %4050 }
0x213c   :  { %v4053_v10 = vmul.f32 0.11111111, %v4051_v3  ;;  %v4048_v17 = vpop.xlane.xlu0 %4047 }
0x213d   :  { %v4052_v11 = vmul.f32 0.11111111, %v4048_v17 }
0x213e   :  { %v4055_v12 = vsub.f32 %v8150_v9, %v4053_v10  ;;  %v7413_v10 = vpack.c.bf16 %v4801_v8, %v4800_v6 }
0x213f   :  { %v4054_v21 = vsub.f32 %v8153_v2, %v4052_v11 }
0x2140   :  { %v4057_v13 = vmul.f32 %v4055_v12, %v4055_v12 }
0x2141   :  { %v4056_v14 = vmul.f32 %v4054_v21, %v4054_v21 }
0x2142   :  { %v4061_v22 = vsel %vm161_vm1, %v4057_v13, 0.0  ;;  %v6354_v13 = vld [vmem:[#allocation5 + $0x468] ss:$0 sm:$0xff] }
0x2143   :  { %4062 = vadd.xlane.f32.xlu1 %v4061_v22  ;;  %v4058_v18 = vsel %vm157_vm0, %v4056_v14, 0.0 }
0x2144   :  { %4059 = vadd.xlane.f32.xlu0 %v4058_v18 }
0x21d0   :  { %v4063_v26 = vpop.xlane.xlu1 %4062 }
0x21d1   :  { %v4065_v56 = vmul.f32 0.11111111, %v4063_v26  ;;  %v4060_v27 = vpop.xlane.xlu0 %4059 }
0x21d2   :  { %v4064_v0 = vmul.f32 0.11111111, %v4060_v27 }
0x21d3   :  { %v4067_v28 = vadd.f32 1e-05, %v4065_v56 }
0x21d4   :  { %v4066_v29 = vadd.f32 1e-05, %v4064_v0 }
0x21d5   :  { %7593 = vrsqrt.f32 %v4067_v28 }
0x21d6   :  { %7595 = vrsqrt.f32 %v4066_v29 }
0x21df   :  { %v7594_v1 = vpop.eup %7593 }
0x21e0   :  { %v7596_v31 = vpop.eup %7595  ;;  %v4071_v33 = vmul.f32 %v7594_v1, %v4055_v12 }
0x21e1   :  { %v4070_v34 = vmul.f32 %v7596_v31, %v4054_v21 }
0x21e2   :  { %v4077_v36 = vmul.f32 %v6329_v30, %v4071_v33 }
0x21e3   :  { %v4076_v39 = vmul.f32 %v6329_v30, %v4070_v34 }
0x21e4   :  { %v8171_v42 = vadd.f32 %v6330_v35, %v4077_v36  ;;  %v4539_v36 = vld [vmem:[#allocation5 + $0x450] sm:$0x7] }
0x21e5   :  { %v8169_v37 = vadd.f32 %v6330_v35, %v4076_v39 }
0x21e7   :  { %6981 = vmatprep.mubr.msk.f32.mxu0 %vm157_vm0, %v8169_v37 }
0x21e8   :  { %6982 = vmatmul.mubr.msk.f32.vlgmr.msra.gmra.mrb[36].mxu0 %vm157_vm0, %v8171_v42 }
0x21e9   :  { %7382 = vmatpush3.bf16.msk.msra.mxu0 %vm7775_vm4, %v7377_v25  ;;  %6988 = vmatprep.mubr.msk.f32.mxu0 %vm157_vm0, %v8169_v37 }
0x21ea   :  { %7385 = vmatprep.subr.msk.bf16.mxu0 %vm7775_vm4, %v7383_v43 }
0x21ec   :  { %6989 = vmatmul.mubr.msk.f32.vlgmr.msra.gmra.mrb[38].mxu0 %vm157_vm0, %v8171_v42 }
0x21ed   :  { %7388 = vmatpush3.bf16.msk.msra.mxu0 %vm7775_vm4, %v7383_v43  ;;  %6995 = vmatprep.mubr.msk.f32.mxu0 %vm157_vm0, %v8169_v37 }
0x21f0   :  { %6996 = vmatmul.mubr.msk.f32.vlgmr.msra.gmra.mrb[40].mxu0 %vm157_vm0, %v8171_v42 }
0x22bb   :  { %v6983_v44 = vpop.f32.mrb[36].mxu0 }
0x22bc   :  { %v4167_v45 = vpop.f32.mrb[37].mxu0  ;;  %v4173_v3 = vadd.f32 %v6983_v44, %v6331_v38 }
0x22bd   :  { %v4168_v46 = vadd.f32 %v6331_v38, %v4167_v45  ;;  %v4715_v45 = vld [vmem:[#allocation5 + $0x470] sm:$0xff] }
0x22bf   :  { %v6990_v50 = vpop.f32.mrb[38].mxu0  ;;  %7002 = vmatprep.mubr.msk.f32.mxu1 %vm461_vm6, %v4168_v46  ;;  %v4716_v46 = vld [vmem:[#allocation5 + $0x478] sm:$0x1] }
0x22c0   :  { %v4258_v52 = vadd.f32 %v6990_v50, %v6335_v48  ;;  %v4252_v53 = vpop.f32.mrb[39].mxu0 }
0x22c1   :  { %v4253_v58 = vadd.f32 %v6335_v48, %v4252_v53  ;;  %v7407_v48 = vpack.c.bf16 %v4716_v46, %v4715_v45 }
0x22c3   :  { %v7389_v63 = vpack.c.bf16 %v4258_v52, %v4253_v58  ;;  %v6997_v59 = vpop.f32.mrb[40].mxu0 }
0x22c4   :  { %v4343_v4 = vadd.f32 %v6997_v59, %v6339_v60  ;;  %v4337_v5 = vpop.f32.mrb[41].mxu0 }
0x22c5   :  { %v4338_v7 = vadd.f32 %v6339_v60, %v4337_v5  ;;  %7391 = vmatprep.subr.msk.bf16.mxu1 %vm7828_vm8, %v7389_v63 }
0x22c6   :  { %7394 = vmatpush3.bf16.xpose.msk.msra.mxu1 %vm7828_vm8, %v7389_v63 }
0x22c7   :  { %v7395_v16 = vpack.c.bf16 %v4343_v4, %v4338_v7  ;;  %7403 = vmatprep.subr.msk.bf16.mxu1 %vm7775_vm4, %v7401_v61 }
0x22c9   :  { %7397 = vmatprep.subr.msk.bf16.mxu0 %vm7817_vm7, %v7395_v16 }
0x22ca   :  { %7400 = vmatpush3.bf16.msk.msra.mxu0 %vm7817_vm7, %v7395_v16 }
0x22cb   :  { %7012 = vmatprep.subr.msk.mxu0 %vm665_vm11, %v4539_v36 }
0x22cd   :  { %7003 = vmatmul.mubr.msk.f32.vlgmr.msra.gmra.mrb[40].mxu1 %vm461_vm6, %v4173_v3 }
0x22ce   :  { %7406 = vmatpush3.bf16.msk.msra.mxu1 %vm7775_vm4, %v7401_v61  ;;  %7021 = vmatprep.mubr.msk.f32.mxu1 %vm157_vm0, %v8169_v37 }
0x22cf   :  { %7415 = vmatprep.subr.msk.bf16.mxu1 %vm7775_vm4, %v7413_v10 }
0x22d1   :  { %7022 = vmatmul.mubr.msk.f32.vlgmr.msra.gmra.mrb[42].mxu1 %vm157_vm0, %v8171_v42 }
0x22d2   :  { %7418 = vmatpush3.bf16.msk.msra.mxu1 %vm7775_vm4, %v7413_v10  ;;  %7035 = vmatprep.mubr.msk.f32.mxu1 %vm157_vm0, %v8169_v37 }
0x22d5   :  { %7036 = vmatmul.mubr.msk.f32.vlgmr.msra.gmra.mrb[44].mxu1 %vm157_vm0, %v8171_v42 }
0x23a0   :  { %v7004_v17 = vpop.f32.mrb[40].mxu1 }
0x23a1   :  { %v4430_v11 = vadd.f32 %v8107_v47, %v7004_v17  ;;  %v4424_v12 = vpop.f32.mrb[41].mxu1 }
0x23a2   :  { %v4425_v21 = vadd.f32 %v8110_v51, %v4424_v12 }
0x23a3   :  { %v4436_v14 = vsel %vm553_vm9, %v4430_v11, -inf }
0x23a4   :  { %4437 = vmax.xlane.f32.xlu1 %v4436_v14  ;;  %v7023_v22 = vpop.f32.mrb[42].mxu1  ;;  %v4433_v18 = vsel %vm549_vm10, %v4425_v21, -inf }
0x23a5   :  { %v4712_v19 = vadd.f32 %v7023_v22, %v6354_v13  ;;  %v4706_v20 = vpop.f32.mrb[43].mxu1  ;;  %4434 = vmax.xlane.f32.xlu0 %v4433_v18  ;;  %v5165_v18 = vld [vmem:[#allocation5 + $0x4a8] sm:$0xff] }
0x23a6   :  { %v4707_v53 = vadd.f32 %v6354_v13, %v4706_v20 }
0x23a8   :  { %v7037_v24 = vpop.f32.mrb[44].mxu1 }
0x23a9   :  { %v4882_v62 = vadd.f32 %v7037_v24, %v6362_v23  ;;  %v4876_v25 = vpop.f32.mrb[45].mxu1 }
0x23aa   :  { %v4877_v26 = vadd.f32 %v6362_v23, %v4876_v25  ;;  %v5250_v25 = vld [vmem:[#allocation5 + $0x4c0] sm:$0xff] }
0x23ac   :  { %v7425_v56 = vpack.c.bf16 %v4882_v62, %v4877_v26  ;;  %v5251_v26 = vld [vmem:[#allocation5 + $0x4c8] sm:$0x1] }
0x23ae   :  { %7427 = vmatprep.subr.msk.bf16.mxu1 %vm7817_vm7, %v7425_v56 }
0x23af   :  { %7430 = vmatpush3.bf16.msk.msra.mxu1 %vm7817_vm7, %v7425_v56 }
0x2431   :  { %v4438_v27 = vpop.xlane.xlu1 %4437 }
0x2432   :  { %v4440_v0 = vsub.f32 %v4430_v11, %v4438_v27  ;;  %v4435_v28 = vpop.xlane.xlu0 %4434 }
0x2433   :  { %v4439_v29 = vsub.f32 %v4425_v21, %v4435_v28  ;;  %v7437_v28 = vpack.c.bf16 %v5251_v26, %v5250_v25 }
0x2434   :  { %v4443_v1 = vmul.f32 1.442695, %v4440_v0 }
0x2435   :  { %v4441_v30 = vmul.f32 1.442695, %v4439_v29  ;;  %v5078_v29 = vld [vmem:[#allocation5 + $0x4a0] sm:$0x7] }
0x2436   :  { %7597 = vpow2.f32 %v4443_v1  ;;  %v5335_v1 = vld [vmem:[#allocation5 + $0x4d8] sm:$0xff] }
0x2437   :  { %7599 = vpow2.f32 %v4441_v30  ;;  %v5336_v30 = vld [vmem:[#allocation5 + $0x4e0] sm:$0x1] }
0x2440   :  { %v7598_v31 = vpop.eup %7597 }
0x2441   :  { %v7600_v33 = vpop.eup %7599  ;;  %v4448_v34 = vsel %vm553_vm9, %v7598_v31, 0.0 }
0x2442   :  { %4449 = vadd.xlane.f32.xlu1 %v4448_v34  ;;  %v4445_v35 = vsel %vm549_vm10, %v7600_v33, 0.0 }
0x2443   :  { %4446 = vadd.xlane.f32.xlu0 %v4445_v35  ;;  %v6376_v35 = vld [vmem:[#allocation5 + $0x4b8] ss:$0 sm:$0xff] }
0x24cf   :  { %v4450_v39 = vpop.xlane.xlu1 %4449 }
0x24d0   :  { %7601 = vrcp.f32 %v4450_v39  ;;  %v4447_v40 = vpop.xlane.xlu0 %4446 }
0x24d1   :  { %7603 = vrcp.f32 %v4447_v40 }
0x24da   :  { %v7602_v32 = vpop.eup %7601 }
0x24db   :  { %v7604_v43 = vpop.eup %7603  ;;  %v4454_v44 = vmul.f32 %v7602_v32, %v7598_v31  ;;  %v7443_v31 = vpack.c.bf16 %v5336_v30, %v5335_v1  ;;  %v6380_v32 = vld [vmem:[#allocation5 + $0x4d0] ss:$0 sm:$0xff] }
0x24dc   :  { %v4453_v38 = vmul.f32 %v7604_v43, %v7600_v33 }
0x24de   :  { %7009 = vmatprep.mubr.msk.f32.mxu0 %vm549_vm10, %v4453_v38 }
0x24df   :  { %7010 = vmatmul.mubr.msk.f32.vlgmr.msra.gmra.mrb[42].mxu0 %vm549_vm10, %v4454_v44 }
0x24e0   :  { %7013 = vmatpush3.msk.msra.mxu0 %vm665_vm11, %v4539_v36 }
0x24e1   :  { %7409 = vmatprep.subr.msk.bf16.mxu0 %vm7775_vm4, %v7407_v48 }
0x25b2   :  { %v7011_v50 = vpop.f32.mrb[42].mxu0 }
0x25b3   :  { %v4530_v52 = vpop.f32.mrb[43].mxu0 }
0x25b4   :  { %7014 = vmatprep.mubr.msk.f32.mxu0 %vm461_vm6, %v4530_v52 }
0x25b5   :  { %7015 = vmatmul.mubr.msk.f32.vlgmr.msra.gmra.mrb[44].mxu0 %vm461_vm6, %v7011_v50 }
0x25b6   :  { %7412 = vmatpush3.bf16.msk.msra.mxu0 %vm7775_vm4, %v7407_v48  ;;  %7028 = vmatprep.mubr.msk.f32.mxu0 %vm157_vm0, %v8169_v37  ;;  %v6384_v48 = vld [vmem:[#allocation5 + $0x4e8] ss:$0 sm:$0xff] }
0x25b9   :  { %7029 = vmatmul.mubr.msk.f32.vlgmr.msra.gmra.mrb[46].mxu0 %vm157_vm0, %v8171_v42 }
0x25ba   :  { %7042 = vmatprep.mubr.msk.f32.mxu0 %vm461_vm6, %v4707_v53 }
0x268c   :  { %v7030_v55 = vpop.f32.mrb[46].mxu0 }
0x268d   :  { %v4797_v58 = vadd.f32 %v7030_v55, %v6358_v54  ;;  %v4791_v60 = vpop.f32.mrb[47].mxu0 }
0x268e   :  { %v4792_v63 = vadd.f32 %v6358_v54, %v4791_v60 }
0x2690   :  { %v7419_v59 = vpack.c.bf16 %v4797_v58, %v4792_v63 }
0x2692   :  { %7421 = vmatprep.subr.msk.bf16.mxu0 %vm7828_vm8, %v7419_v59 }
0x2693   :  { %7424 = vmatpush3.bf16.xpose.msk.msra.mxu0 %vm7828_vm8, %v7419_v59 }
0x2694   :  { %7052 = vmatprep.subr.msk.mxu0 %vm665_vm11, %v5078_v29 }
0x269a   :  { %7043 = vmatmul.mubr.msk.f32.vlgmr.msra.gmra.mrb[48].mxu0 %vm461_vm6, %v4712_v19  ;;  %v5166_v19 = vld [vmem:[#allocation5 + $0x4b0] sm:$0x1] }
0x269b   :  { %v7431_v20 = vpack.c.bf16 %v5166_v19, %v5165_v18  ;;  %7053 = vmatpush3.msk.msra.mxu0 %vm665_vm11, %v5078_v29  ;;  %v6353_v19 = vld [vmem:[#allocation5 + $0x4f8] ss:$0 sm:$0xff] }
0x269c   :  { %7445 = vmatprep.subr.msk.bf16.mxu0 %vm7775_vm4, %v7443_v31 }
0x269d   :  { %7433 = vmatprep.subr.msk.bf16.mxu1 %vm7775_vm4, %v7431_v20 }
0x276d   :  { %v7044_v61 = vpop.f32.mrb[48].mxu0 }
0x276e   :  { %v4969_v4 = vadd.f32 %v8107_v47, %v7044_v61  ;;  %v4963_v5 = vpop.f32.mrb[49].mxu0 }
0x276f   :  { %v4964_v7 = vadd.f32 %v8110_v51, %v4963_v5 }
0x2770   :  { %v4975_v16 = vsel %vm553_vm9, %v4969_v4, -inf }
0x2771   :  { %4976 = vmax.xlane.f32.xlu1 %v4975_v16  ;;  %v4972_v6 = vsel %vm549_vm10, %v4964_v7, -inf }
0x2772   :  { %4973 = vmax.xlane.f32.xlu0 %v4972_v6 }
0x27fe   :  { %v4977_v8 = vpop.xlane.xlu1 %4976 }
0x27ff   :  { %v4979_v3 = vsub.f32 %v4969_v4, %v4977_v8  ;;  %v4974_v10 = vpop.xlane.xlu0 %4973 }
0x2800   :  { %v4978_v17 = vsub.f32 %v4964_v7, %v4974_v10  ;;  %v5613_v10 = vld [vmem:[#allocation5 + $0x4f0] sm:$0x7] }
0x2801   :  { %v4982_v11 = vmul.f32 1.442695, %v4979_v3 }
0x2802   :  { %v4980_v12 = vmul.f32 1.442695, %v4978_v17 }
0x2803   :  { %7605 = vpow2.f32 %v4982_v11 }
0x2804   :  { %7607 = vpow2.f32 %v4980_v12 }
0x280d   :  { %v7606_v21 = vpop.eup %7605 }
0x280e   :  { %v7608_v13 = vpop.eup %7607  ;;  %v4987_v14 = vsel %vm553_vm9, %v7606_v21, 0.0 }
0x280f   :  { %4988 = vadd.xlane.f32.xlu1 %v4987_v14  ;;  %v4984_v22 = vsel %vm549_vm10, %v7608_v13, 0.0 }
0x2810   :  { %4985 = vadd.xlane.f32.xlu0 %v4984_v22 }
0x289c   :  { %v4989_v23 = vpop.xlane.xlu1 %4988 }
0x289d   :  { %7609 = vrcp.f32 %v4989_v23  ;;  %v4986_v24 = vpop.xlane.xlu0 %4985 }
0x289e   :  { %7611 = vrcp.f32 %v4986_v24 }
0x28a7   :  { %v7610_v62 = vpop.eup %7609 }
0x28a8   :  { %v7612_v56 = vpop.eup %7611  ;;  %v4993_v0 = vmul.f32 %v7610_v62, %v7606_v21 }
0x28a9   :  { %v4992_v27 = vmul.f32 %v7612_v56, %v7608_v13 }
0x28ab   :  { %7049 = vmatprep.mubr.msk.f32.mxu1 %vm549_vm10, %v4992_v27 }
0x28ac   :  { %7050 = vmatmul.mubr.msk.f32.vlgmr.msra.gmra.mrb[46].mxu1 %vm549_vm10, %v4993_v0 }
0x28ad   :  { %7436 = vmatpush3.bf16.msk.msra.mxu1 %vm7775_vm4, %v7431_v20  ;;  %7061 = vmatprep.mubr.msk.f32.mxu1 %vm157_vm0, %v8169_v37 }
0x28ae   :  { %7439 = vmatprep.subr.msk.bf16.mxu1 %vm7775_vm4, %v7437_v28 }
0x28b0   :  { %7062 = vmatmul.mubr.msk.f32.vlgmr.msra.gmra.mrb[48].mxu1 %vm157_vm0, %v8171_v42 }
0x28b1   :  { %7442 = vmatpush3.bf16.msk.msra.mxu1 %vm7775_vm4, %v7437_v28  ;;  %7068 = vmatprep.mubr.msk.f32.mxu1 %vm157_vm0, %v8169_v37 }
0x28b4   :  { %7069 = vmatmul.mubr.msk.f32.vlgmr.msra.gmra.mrb[50].mxu1 %vm157_vm0, %v8171_v42 }
0x297f   :  { %v7051_v33 = vpop.f32.mrb[46].mxu1 }
0x2980   :  { %v5069_v34 = vpop.f32.mrb[47].mxu1 }
0x2981   :  { %7054 = vmatprep.mubr.msk.f32.mxu0 %vm461_vm6, %v5069_v34 }
0x2982   :  { %7055 = vmatmul.mubr.msk.f32.vlgmr.msra.gmra.mrb[44].mxu0 %vm461_vm6, %v7051_v33 }
0x2983   :  { %v7063_v36 = vpop.f32.mrb[48].mxu1  ;;  %7448 = vmatpush3.bf16.msk.msra.mxu0 %vm7775_vm4, %v7443_v31  ;;  %7075 = vmatprep.mubr.msk.f32.mxu0 %vm157_vm0, %v8169_v37 }
0x2984   :  { %v5241_v39 = vpop.f32.mrb[49].mxu1  ;;  %v5247_v37 = vadd.f32 %v7063_v36, %v6376_v35  ;;  %v5743_v36 = vld [vmem:[#allocation5 + $0x508] sm:$0x1] }
0x2985   :  { %v5242_v40 = vadd.f32 %v6376_v35, %v5241_v39  ;;  %v5742_v35 = vld [vmem:[#allocation5 + $0x500] sm:$0xff] }
0x2986   :  { %7076 = vmatmul.mubr.msk.f32.vlgmr.msra.gmra.mrb[50].mxu0 %vm157_vm0, %v8171_v42  ;;  %v7461_v39 = vpack.c.bf16 %v5743_v36, %v5742_v35 }
0x2987   :  { %v7070_v43 = vpop.f32.mrb[50].mxu1  ;;  %7082 = vmatprep.mubr.msk.f32.mxu1 %vm461_vm6, %v5242_v40 }
0x2988   :  { %v5332_v38 = vadd.f32 %v7070_v43, %v6380_v32  ;;  %v5326_v44 = vpop.f32.mrb[51].mxu1 }
0x2989   :  { %v5327_v45 = vadd.f32 %v6380_v32, %v5326_v44 }
0x298b   :  { %v7449_v46 = vpack.c.bf16 %v5332_v38, %v5327_v45 }
0x298d   :  { %7451 = vmatprep.subr.msk.bf16.mxu1 %vm7828_vm8, %v7449_v46 }
0x298e   :  { %7454 = vmatpush3.bf16.xpose.msk.msra.mxu1 %vm7828_vm8, %v7449_v46  ;;  %vm7720_vm8 = vmmov 0  }
0x298f   :  { %7463 = vmatprep.subr.msk.bf16.mxu1 %vm7775_vm4, %v7461_v39 }
0x2995   :  { %7083 = vmatmul.mubr.msk.f32.vlgmr.msra.gmra.mrb[52].mxu1 %vm461_vm6, %v5247_v37  ;;  %v6398_v37 = vld [vmem:[#allocation5 + $0x3f8] ss:$0 sm:$0xff] }
0x2996   :  { %7466 = vmatpush3.bf16.msk.msra.mxu1 %vm7775_vm4, %v7461_v39 }
0x2a59   :  { %v7077_v50 = vpop.f32.mrb[50].mxu0 }
0x2a5a   :  { %v5417_v52 = vadd.f32 %v7077_v50, %v6384_v48  ;;  %v5411_v42 = vpop.f32.mrb[51].mxu0 }
0x2a5b   :  { %v5412_v53 = vadd.f32 %v6384_v48, %v5411_v42  ;;  %v6399_v42 = vld [vmem:[#allocation5 + $0x400] ss:$0 sm:$0xff] }
0x2a5d   :  { %v7455_v54 = vpack.c.bf16 %v5417_v52, %v5412_v53 }
0x2a5f   :  { %7457 = vmatprep.subr.msk.bf16.mxu0 %vm7817_vm7, %v7455_v54 }
0x2a60   :  { %7460 = vmatpush3.bf16.msk.msra.mxu0 %vm7817_vm7, %v7455_v54 }
0x2a61   :  { %7092 = vmatprep.subr.msk.mxu0 %vm665_vm11, %v5613_v10 }
0x2a68   :  { %v7084_v55 = vpop.f32.mrb[52].mxu1 }
0x2a69   :  { %v5504_v58 = vadd.f32 %v8107_v47, %v7084_v55  ;;  %v5498_v57 = vpop.f32.mrb[53].mxu1 }
0x2a6a   :  { %v5499_v60 = vadd.f32 %v8110_v51, %v5498_v57  ;;  %v5887_v57 = vld [vmem:[#allocation5 + $0x518] sm:$0xff] }
0x2a6b   :  { %v5510_v63 = vsel %vm553_vm9, %v5504_v58, -inf }
0x2a6c   :  { %5511 = vmax.xlane.f32.xlu1 %v5510_v63  ;;  %v5507_v59 = vsel %vm549_vm10, %v5499_v60, -inf }
0x2a6d   :  { %5508 = vmax.xlane.f32.xlu0 %v5507_v59  ;;  %v5889_v59 = vld [vmem:[#allocation5 + $0x528] sm:$0xff] }
0x2af9   :  { %v5512_v61 = vpop.xlane.xlu1 %5511 }
0x2afa   :  { %v5514_v4 = vsub.f32 %v5504_v58, %v5512_v61  ;;  %v5509_v5 = vpop.xlane.xlu0 %5508  ;;  %v5890_v61 = vld [vmem:[#allocation5 + $0x530] sm:$0xff] }
0x2afb   :  { %v5513_v7 = vsub.f32 %v5499_v60, %v5509_v5  ;;  %v5888_v60 = vld [vmem:[#allocation5 + $0x520] sm:$0xff]  ;;  %v5891_v5 = vld [vmem:[#allocation5 + $0x538] sm:$0xf] }
0x2afc   :  { %v5517_v16 = vmul.f32 1.442695, %v5514_v4  ;;  %v7467_v63 = vpack.c.bf16 %v5888_v60, %v5887_v57  ;;  %v7471_v4 = vpack.c.bf16 %v5890_v61, %v5889_v59  ;;  %v7719_v59 = vmov 0.0|0.0  }
0x2afd   :  { %v5515_v6 = vmul.f32 1.442695, %v5513_v7  ;;  %v6400_v7 = vld [vmem:[#allocation5 + $0x510] ss:$0 sm:$0xff]  ;;  %7475 = vmatprep.subr.bf16.mxu1 %v7719_v59  ;;  %v7721_v61 = vmov 0.0  }
0x2afe   :  { %7613 = vpow2.f32 %v5517_v16 }
0x2aff   :  { %7615 = vpow2.f32 %v5515_v6 }
0x2b08   :  { %v7614_v8 = vpop.eup %7613 }
0x2b09   :  { %v7616_v3 = vpop.eup %7615  ;;  %v5522_v47 = vsel %vm553_vm9, %v7614_v8, 0.0 }
0x2b0a   :  { %5523 = vadd.xlane.f32.xlu1 %v5522_v47  ;;  %v5519_v51 = vsel %vm549_vm10, %v7616_v3, 0.0 }
0x2b0b   :  { %5520 = vadd.xlane.f32.xlu0 %v5519_v51 }
0x2b97   :  { %v5524_v17 = vpop.xlane.xlu1 %5523 }
0x2b98   :  { %7617 = vrcp.f32 %v5524_v17  ;;  %v5521_v11 = vpop.xlane.xlu0 %5520 }
0x2b99   :  { %7619 = vrcp.f32 %v5521_v11 }
0x2ba2   :  { %v7618_v12 = vpop.eup %7617 }
0x2ba3   :  { %v7620_v21 = vpop.eup %7619  ;;  %v5528_v14 = vmul.f32 %v7618_v12, %v7614_v8 }
0x2ba4   :  { %v5527_v13 = vmul.f32 %v7620_v21, %v7616_v3 }
0x2ba6   :  { %7089 = vmatprep.mubr.msk.f32.mxu0 %vm549_vm10, %v5527_v13 }
0x2ba7   :  { %7090 = vmatmul.mubr.msk.f32.vlgmr.msra.gmra.mrb[52].mxu0 %vm549_vm10, %v5528_v14 }
0x2ba8   :  { %7093 = vmatpush3.msk.msra.mxu0 %vm665_vm11, %v5613_v10 }
0x2ba9   :  { %7468 = vmatprep.subr.bf16.mxu0 %v7467_v63 }
0x2c7a   :  { %v7091_v22 = vpop.f32.mrb[52].mxu0 }
0x2c7b   :  { %v5604_v18 = vpop.f32.mrb[53].mxu0 }
0x2c7c   :  { %7094 = vmatprep.mubr.msk.f32.mxu0 %vm461_vm6, %v5604_v18 }
0x2c7d   :  { %7095 = vmatmul.mubr.msk.f32.vlgmr.msra.gmra.mrb[44].mxu0 %vm461_vm6, %v7091_v22 }
0x2c7e   :  { %7470 = vmatpush3.bf16.msra.mxu0 %v7467_v63 }
0x2c7f   :  { %7472 = vmatprep.subr.bf16.mxu0 %v7471_v4 }
0x2c82   :  { %7474 = vmatpush3.bf16.msra.mxu0 %v7471_v4  ;;  %v6404_v4 = vld [vmem:[#allocation5 + $0x540] ss:$0 sm:$0xff] }
0x2c83   :  { %7112 = vmatprep.subr.msk.mxu0 %vm2024_vm12, %v5891_v5 }
0x2c86   :  { %7113 = vmatpush3.msk.msra.mxu0 %vm2024_vm12, %v5891_v5 }
0x2d50   :  { %v7096_v20 = vpop.f32.mrb[44].mxu0 }
0x2d51   :  { %v7487_v23 = vadd.f32 %v7096_v20, %v6353_v19  ;;  %v5689_v24 = vpop.f32.mrb[45].mxu0 }
0x2d52   :  { %v7488_v62 = vadd.f32 %v6353_v19, %v5689_v24 }
0x2d53   :  { %v8306_v25 = vadd.f32 %v7487_v23, %v8150_v9 }
0x2d54   :  { %v8309_v26 = vadd.f32 %v7488_v62, %v8153_v2 }
0x2d55   :  { %v5707_v56 = vsel %vm161_vm1, %v8306_v25, 0.0 }
0x2d56   :  { %5708 = vadd.xlane.f32.xlu1 %v5707_v56  ;;  %v5704_v27 = vsel %vm157_vm0, %v8309_v26, 0.0 }
0x2d57   :  { %5705 = vadd.xlane.f32.xlu0 %v5704_v27 }
0x2de3   :  { %v5709_v0 = vpop.xlane.xlu1 %5708 }
0x2de4   :  { %v5711_v28 = vmul.f32 0.11111111, %v5709_v0  ;;  %v5706_v29 = vpop.xlane.xlu0 %5705 }
0x2de5   :  { %v5710_v1 = vmul.f32 0.11111111, %v5706_v29 }
0x2de6   :  { %v5713_v30 = vsub.f32 %v8306_v25, %v5711_v28 }
0x2de7   :  { %v5712_v9 = vsub.f32 %v8309_v26, %v5710_v1 }
0x2de8   :  { %v5715_v31 = vmul.f32 %v5713_v30, %v5713_v30 }
0x2de9   :  { %v5714_v33 = vmul.f32 %v5712_v9, %v5712_v9 }
0x2dea   :  { %v5719_v2 = vsel %vm161_vm1, %v5715_v31, 0.0 }
0x2deb   :  { %5720 = vadd.xlane.f32.xlu1 %v5719_v2  ;;  %v5716_v34 = vsel %vm157_vm0, %v5714_v33, 0.0 }
0x2dec   :  { %5717 = vadd.xlane.f32.xlu0 %v5716_v34 }
0x2e78   :  { %v5721_v40 = vpop.xlane.xlu1 %5720 }
0x2e79   :  { %v5723_v32 = vmul.f32 0.11111111, %v5721_v40  ;;  %v5718_v43 = vpop.xlane.xlu0 %5717 }
0x2e7a   :  { %v5722_v38 = vmul.f32 0.11111111, %v5718_v43 }
0x2e7b   :  { %v5725_v44 = vadd.f32 1e-05, %v5723_v32 }
0x2e7c   :  { %v5724_v45 = vadd.f32 1e-05, %v5722_v38 }
0x2e7d   :  { %7621 = vrsqrt.f32 %v5725_v44 }
0x2e7e   :  { %7623 = vrsqrt.f32 %v5724_v45 }
0x2e87   :  { %v7622_v46 = vpop.eup %7621 }
0x2e88   :  { %v7624_v48 = vpop.eup %7623  ;;  %v5729_v50 = vmul.f32 %v7622_v46, %v5713_v30 }
0x2e89   :  { %v5728_v52 = vmul.f32 %v7624_v48, %v5712_v9 }
0x2e8a   :  { %v5735_v53 = vmul.f32 %v6398_v37, %v5729_v50 }
0x2e8b   :  { %v5734_v54 = vmul.f32 %v6398_v37, %v5728_v52 }
0x2e8c   :  { %v5741_v58 = vadd.f32 %v6399_v42, %v5735_v53 }
0x2e8d   :  { %v5740_v55 = vadd.f32 %v6399_v42, %v5734_v54 }
0x2e8f   :  { %7101 = vmatprep.mubr.msk.f32.mxu1 %vm157_vm0, %v5740_v55 }
0x2e90   :  { %7102 = vmatmul.mubr.msk.f32.vlgmr.msra.gmra.mrb[54].mxu1 %vm157_vm0, %v5741_v58 }
0x2e91   :  { %7121 = vmatprep.mubr.msk.f32.mxu1 %vm7720_vm8, %v7721_v61 }
0x2f63   :  { %v7103_v16 = vpop.f32.mrb[54].mxu1 }
0x2f64   :  { %v5830_v6 = vadd.f32 %v7103_v16, %v6400_v7  ;;  %v5824_v8 = vpop.f32.mrb[55].mxu1 }
0x2f65   :  { %v5825_v3 = vadd.f32 %v6400_v7, %v5824_v8 }
0x2f66   :  { %v5836_v47 = vmul.f32 0.70710677, %v5830_v6  ;;  %v5834_v57 = vmul.f32 0.5, %v5830_v6 }
0x2f67   :  { %v5835_v51 = vmul.f32 0.70710677, %v5825_v3  ;;  %v5833_v55 = vmul.f32 0.5, %v5825_v3  ;;  %v6060_v3 = vld [vmem:[#allocation5 + $0x548] sm:$0xff] }
0x2f68   :  { %v5842_v10 = vand.u32 2147483647, %v5836_v47  ;;  %vm5838_vm1 = vcmp.ge.f32.partialorder %v5836_v47, 0.0  ;;  %v6061_v47 = vld [vmem:[#allocation5 + $0x550] sm:$0x1] }
0x2f69   :  { %v5841_v17 = vand.u32 2147483647, %v5835_v51  ;;  %vm5837_vm6 = vcmp.ge.f32.partialorder %v5835_v51, 0.0  ;;  %v5840_v48 = vsel %vm5838_vm1, 1.0, %v7718_v41 }
0x2f6a   :  { %v5844_v11 = vmul.f32 0.3275911, %v5842_v10  ;;  %v5870_v14 = vsub.f32 0.0, %v5842_v10  ;;  %v5839_v42 = vsel %vm5837_vm6, 1.0, %v7718_v41 }
0x2f6b   :  { %v5843_v12 = vmul.f32 0.3275911, %v5841_v17  ;;  %v5869_v22 = vsub.f32 0.0, %v5841_v17 }
0x2f6c   :  { %v5846_v21 = vadd.f32 1.0, %v5844_v11  ;;  %v5872_v19 = vmul.f32 %v5870_v14, %v5842_v10  ;;  %v5983_v10 = vld [vmem:[#allocation5 + $0x110] sm:$0x3] }
0x2f6d   :  { %v5845_v13 = vadd.f32 1.0, %v5843_v12  ;;  %v5871_v24 = vmul.f32 %v5869_v22, %v5841_v17  ;;  %v7480_v17 = vpack.c.bf16 %v6061_v47, %v6060_v3 }
0x2f6e   :  { %7625 = vrcp.f32 %v5846_v21  ;;  %v5875_v27 = vmul.f32 1.442695, %v5872_v19 }
0x2f6f   :  { %7627 = vrcp.f32 %v5845_v13  ;;  %v5873_v29 = vmul.f32 1.442695, %v5871_v24 }
0x2f70   :  { %7629 = vpow2.f32 %v5875_v27 }
0x2f71   :  { %7631 = vpow2.f32 %v5873_v29 }
0x2f78   :  { %v7626_v18 = vpop.eup %7625 }
0x2f79   :  { %v7628_v20 = vpop.eup %7627  ;;  %v5852_v23 = vmul.f32 1.0614054, %v7626_v18 }
0x2f7a   :  { %v5851_v62 = vmul.f32 1.0614054, %v7628_v20  ;;  %v7630_v43 = vpop.eup %7629 }
0x2f7b   :  { %v5854_v56 = vadd.f32 -1.4531521, %v5852_v23  ;;  %v7632_v44 = vpop.eup %7631 }
0x2f7c   :  { %v5853_v0 = vadd.f32 -1.4531521, %v5851_v62 }
0x2f7d   :  { %v5856_v28 = vmul.f32 %v7626_v18, %v5854_v56 }
0x2f7e   :  { %v5855_v1 = vmul.f32 %v7628_v20, %v5853_v0 }
0x2f7f   :  { %v5858_v30 = vadd.f32 1.4214138, %v5856_v28 }
0x2f80   :  { %v5857_v9 = vadd.f32 1.4214138, %v5855_v1 }
0x2f81   :  { %v5860_v31 = vmul.f32 %v7626_v18, %v5858_v30 }
0x2f82   :  { %v5859_v33 = vmul.f32 %v7628_v20, %v5857_v9 }
0x2f83   :  { %v5862_v2 = vadd.f32 -0.28449672, %v5860_v31 }
0x2f84   :  { %v5861_v34 = vadd.f32 -0.28449672, %v5859_v33 }
0x2f85   :  { %v5864_v35 = vmul.f32 %v7626_v18, %v5862_v2 }
0x2f86   :  { %v5863_v36 = vmul.f32 %v7628_v20, %v5861_v34 }
0x2f87   :  { %v5866_v39 = vadd.f32 0.2548296, %v5864_v35 }
0x2f88   :  { %v5865_v40 = vadd.f32 0.2548296, %v5863_v36 }
0x2f89   :  { %v5868_v32 = vmul.f32 %v7626_v18, %v5866_v39 }
0x2f8a   :  { %v5867_v38 = vmul.f32 %v7628_v20, %v5865_v40 }
0x2f8b   :  { %v5878_v45 = vmul.f32 %v7630_v43, %v5868_v32 }
0x2f8c   :  { %v5877_v46 = vmul.f32 %v7632_v44, %v5867_v38 }
0x2f8d   :  { %v5880_v37 = vsub.f32 1.0, %v5878_v45 }
0x2f8e   :  { %v5879_v50 = vsub.f32 1.0, %v5877_v46 }
0x2f8f   :  { %v5882_v52 = vmul.f32 %v5880_v37, %v5840_v48 }
0x2f90   :  { %v5881_v53 = vmul.f32 %v5879_v50, %v5839_v42 }
0x2f91   :  { %v5884_v54 = vadd.f32 1.0, %v5882_v52 }
0x2f92   :  { %v5883_v58 = vadd.f32 1.0, %v5881_v53 }
0x2f93   :  { %v5886_v63 = vmul.f32 %v5884_v54, %v5834_v57 }
0x2f94   :  { %v5885_v60 = vmul.f32 %v5883_v58, %v5833_v55 }
0x2f96   :  { %7114 = vmatprep.mubr.msk.f32.mxu0 %vm2017_vm15, %v5885_v60 }
0x2f97   :  { %7115 = vmatmul.mubr.msk.f32.vlgmr.msra.gmra.mrb[54].mxu0 %vm2017_vm15, %v5886_v63 }
0x306a   :  { %v7116_v5 = vpop.f32.mrb[54].mxu0 }
0x306b   :  { %v5978_v41 = vadd.f32 %v7116_v5, %v6404_v4  ;;  %v5972_v7 = vpop.f32.mrb[55].mxu0 }
0x306c   :  { %v5973_v16 = vadd.f32 %v6404_v4, %v5972_v7 }
0x306d   :  { %v5982_v8 = vmul.f32 %v5978_v41, %v8306_v25 }
0x306e   :  { %v5981_v6 = vmul.f32 %v5973_v16, %v8309_v26  ;;  %v6410_v26 = vld [vmem:[#allocation5 + $0x558] ss:$0 sm:$0xff] }
0x3070   :  { %v7476_v51 = vpack.c.bf16 %v5982_v8, %v5981_v6 }
0x3072   :  { %7478 = vmatpush3.bf16.msk.msra.mxu1 %vm7817_vm7, %v7476_v51 }
0x3073   :  { %7479 = vmatprep.subr.bf16.mxu1 %v7719_v59 }
0x3075   :  { %7122 = vmatmul.mubr.msk.f32.vlgmr.msra.gmra.mrb[56].mxu1 %vm549_vm10, %v5983_v10 }
0x3076   :  { %7482 = vmatpush3.bf16.msk.msra.mxu1 %vm7775_vm4, %v7480_v17  ;;  %7128 = vmatprep.mubr.msk.f32.mxu1 %vm7720_vm8, %v7721_v61 }
0x3148   :  { %v6056_v11 = vpop.f32.mrb[56].mxu1 }
0x3149   :  { %v7123_v25 = vpop.f32.mrb[57].mxu1  ;;  %7129 = vmatmul.mubr.msk.f32.vlgmr.msra.gmra.mrb[58].mxu1 %vm157_vm0, %v6056_v11 }
0x321c   :  { %v6139_v12 = vpop.f32.mrb[58].mxu1 }
0x321d   :  { %v6140_v21 = vadd.f32 %v6410_v26, %v6139_v12  ;;  %v7130_v13 = vpop.f32.mrb[59].mxu1 }
0x321f   :  { %v6143_v49 = vsel %vm579_vm5, %v6140_v21, -inf }
0x3220   :  { %6144 = vmax.xlane.f32.xlu0 %v6143_v49 }
0x32ad   :  { %v6145_v14 = vpop.xlane.xlu0 %6144 }
0x32ae   :  { %v6146_v22 = vsub.f32 %v6140_v21, %v6145_v14 }
0x32b0   :  { %v6147_v18 = vmul.f32 1.442695, %v6146_v22 }
0x32b2   :  { %7633 = vpow2.f32 %v6147_v18 }
0x32bc   :  { %v7634_v19 = vpop.eup %7633 }
0x32bd   :  { %v6149_v15 = vsel %vm579_vm5, %v7634_v19, 0.0 }
0x32be   :  { %6150 = vadd.xlane.f32.xlu1 %v6149_v15 }
0x334b   :  { %v6151_v20 = vpop.xlane.xlu1 %6150 }
0x334c   :  { %7635 = vrcp.f32 %v6151_v20 }
0x3356   :  { %v7636_v23 = vpop.eup %7635 }
0x3357   :  { %v6153_v24 = vmul.f32 %v7636_v23, %v7634_v19 }
0x3359   :  { %6154 = vst [vmem:[#allocation7] sm:$0x3] %v6153_v24 }
0x335a   :  { %7694 = shalt.err (!%p7691_p6)
}
0x335b   :  { %s7695_s12 = scalar_lea.hbm %s8357_s2, 32 }
0x335c   :  { %p7696_p7 = scmp.ne.s32.totalorder %s8357_s2, %s7695_s12  ;;  %p7699_p8 = scmp.lt.u32.totalorder %s7695_s12, %s8357_s2 }
0x335e   :  { %p7701_p9 = pnand %p7699_p8, %p7696_p7 }
0x3360   :  { %7704 = shalt.err (!%p7701_p9)
}
0x3361   :  { %6164 = dma.vmem_to_hbm [thread:$0]  %s6162_s8, 32, %s8357_s2, [#allocation4]  }
0x3362   :  { %7709 = dma.done.wait [#allocation4], 32  }
0x3363   :  { %7710 = vsyncadd [#allocation4], 4294967264 }
0x3364   :  { %6168 = vsyncpa [#allocation3], 1 }
0x3365   :  { %6169 = vsyncpa [#allocation6], 1 }
0x3366   :  { %6170 = vsyncpa [#allocation4], 1 }

</bundles_post_ra>
